<compile_context>
chip_gen: v6e
topology: v6e:2x2x1
jax: 0.10.0
libtpu: 0.0.40
codegen_flags: <defaults>
</compile_context>

<pallas_src>
import math
import functools

import jax
import jax.numpy as jnp
from jax.experimental import pallas as pl
from jax.experimental.pallas import tpu as pltpu

VMEM = pltpu.MemorySpace.VMEM

PARAM_DTYPE = jnp.bfloat16    # storage dtype for the big weight matrices
COMPUTE_DTYPE = jnp.bfloat16  # MXU input dtype (accumulation is always f32)

# rows of the packed per-layer (NUM_VEC, D) vector array
(VEC_LN1_G, VEC_LN1_B, VEC_BO, VEC_LS1,
 VEC_LN2_G, VEC_LN2_B, VEC_B2, VEC_LS2, NUM_VEC) = range(9)


def _pick_tile(n, max_tile=8):
    """Largest divisor of n that is <= max_tile."""
    t = 1
    for c in range(1, min(n, max_tile) + 1):
        if n % c == 0:
            t = c
    return t


def _ln(z, g, b, eps=1e-5):
    mu = jnp.mean(z, axis=-1, keepdims=True)
    var = jnp.mean((z - mu) ** 2, axis=-1, keepdims=True)
    return (z - mu) * jax.lax.rsqrt(var + eps) * g + b


# ----------------------------------------------------------------------------
# Kernels
# ----------------------------------------------------------------------------
def patch_embed_kernel(patch_ref, w_ref, b_ref, cls_ref, pos_ref, o_ref):
    # patch_ref: (TB, P, K) -> o_ref: (TB, P+1, D); cls/token rows written directly.
    TB = patch_ref.shape[0]
    w = w_ref[...]
    bias = b_ref[...].astype(jnp.float32)                       # (1, D)
    pos = pos_ref[...].astype(jnp.float32)                      # (S, D)
    cls_row = (cls_ref[...].astype(jnp.float32) + pos[0:1, :]).astype(o_ref.dtype)
    pos_tok = pos[1:, :]                                         # (P, D)
    for i in range(TB):
        tok = jnp.dot(patch_ref[i].astype(COMPUTE_DTYPE), w,
                      preferred_element_type=jnp.float32) + bias + pos_tok
        o_ref[i, 0:1, :] = cls_row
        o_ref[i, 1:, :] = tok.astype(o_ref.dtype)


def encoder_kernel(x_ref, vec_ref, wqkv_ref, bqkv_ref, wo_ref, w1_ref, b1_ref,
                   w2_ref, o_ref, res_ref, *, num_heads, causal):
    layer = pl.program_id(1)

    @pl.when(layer == 0)
    def _init():
        res_ref[...] = x_ref[...].astype(jnp.float32)

    TB, S, D = x_ref.shape
    H = num_heads
    Dh = D // H
    cd = COMPUTE_DTYPE

    vd = vec_ref[0].astype(jnp.float32)                          # (NUM_VEC, D)
    ln1_g, ln1_b = vd[VEC_LN1_G:VEC_LN1_G + 1], vd[VEC_LN1_B:VEC_LN1_B + 1]
    bo, ls1 = vd[VEC_BO:VEC_BO + 1], vd[VEC_LS1:VEC_LS1 + 1]
    ln2_g, ln2_b = vd[VEC_LN2_G:VEC_LN2_G + 1], vd[VEC_LN2_B:VEC_LN2_B + 1]
    b2, ls2 = vd[VEC_B2:VEC_B2 + 1], vd[VEC_LS2:VEC_LS2 + 1]

    wqkv = wqkv_ref[0]                 # (D, 3D) bf16; 1/sqrt(Dh) folded into Wq cols
    bqkv = bqkv_ref[0]                 # (1, 3D)  f32, lane-dense
    wo = wo_ref[0]                     # (D, D)   bf16
    w1 = w1_ref[0]                     # (D, dff) bf16
    b1 = b1_ref[0]                     # (1, dff) f32
    w2 = w2_ref[0]                     # (dff, D) bf16

    if causal:                         # single 2-D iota pair, reused by all heads
        rows = jax.lax.broadcasted_iota(jnp.int32, (S, S), 0)
        cols = jax.lax.broadcasted_iota(jnp.int32, (S, S), 1)

    for b in range(TB):                # weights stay resident; DMA amortized over TB
        x = res_ref[b]                                           # (S, D) f32 residual

        # ---- multi-head self-attention (pre-LN) ----
        h1 = _ln(x, ln1_g, ln1_b).astype(cd)
        qkv = jnp.dot(h1, wqkv, preferred_element_type=jnp.float32) + bqkv   # (S, 3D)
        ctx = []
        for hd in range(H):
            q = qkv[:, hd * Dh:(hd + 1) * Dh].astype(cd)          # already 1/sqrt(Dh)-scaled
            k = qkv[:, D + hd * Dh:D + (hd + 1) * Dh].astype(cd)
            v = qkv[:, 2 * D + hd * Dh:2 * D + (hd + 1) * Dh].astype(cd)
            s = jax.lax.dot_general(q, k, (((1,), (1,)), ((), ())),
                                    preferred_element_type=jnp.float32)      # (S, S)
            if causal:
                s = jnp.where(cols > rows, jnp.float32(-1e30), s)
            s = s - jnp.max(s, axis=-1, keepdims=True)
            e = jnp.exp(s)
            p = e * pl.reciprocal(jnp.sum(e, axis=-1, keepdims=True), approx=True)
            ctx.append(jnp.dot(p.astype(cd), v, preferred_element_type=jnp.float32))
        ctx_cat = jnp.concatenate(ctx, axis=-1).astype(cd)                  # (S, D)
        attn = jnp.dot(ctx_cat, wo, preferred_element_type=jnp.float32) + bo
        x = x + ls1 * attn

        # ---- MLP (pre-LN) ----
        h2 = _ln(x, ln2_g, ln2_b).astype(cd)
        m = jnp.dot(h2, w1, preferred_element_type=jnp.float32) + b1
        m = jax.nn.gelu(m, approximate=True)        # tanh GELU -> EUP slot
        m = jnp.dot(m.astype(cd), w2, preferred_element_type=jnp.float32) + b2
        x = x + ls2 * m

        res_ref[b] = x

    @pl.when(layer == pl.num_programs(1) - 1)        # store once per batch block
    def _store():
        o_ref[...] = res_ref[...].astype(o_ref.dtype)


def ln_proj_kernel(x_ref, g_ref, b_ref, w_ref, o_ref):
    # LayerNorm followed by bias-free projection: (tb, D) -> (tb, P)
    h = _ln(x_ref[...].astype(jnp.float32), g_ref[...].astype(jnp.float32),
            b_ref[...].astype(jnp.float32))
    o_ref[...] = jnp.dot(h.astype(COMPUTE_DTYPE), w_ref[...],
                         preferred_element_type=jnp.float32).astype(o_ref.dtype)


def clip_logits_kernel(img_ref, txt_ref, scale_ref, li_ref):
    img = img_ref[...].astype(jnp.float32)
    txt = txt_ref[...].astype(jnp.float32)
    img_n = img * jax.lax.rsqrt(jnp.sum(img * img, axis=-1, keepdims=True) + 1e-12)
    txt_n = txt * jax.lax.rsqrt(jnp.sum(txt * txt, axis=-1, keepdims=True) + 1e-12)
    s = jnp.exp(scale_ref[...].astype(jnp.float32))              # (1,1), vector exp
    li = jax.lax.dot_general(img_n, txt_n, (((1,), (1,)), ((), ())),
                             preferred_element_type=jnp.float32)
    li_ref[...] = (li * s).astype(li_ref.dtype)


# ----------------------------------------------------------------------------
# Pallas wrappers
# ----------------------------------------------------------------------------
def patch_embed(patches, conv_w, conv_b, cls_tok, pos_emb, batch_tile=None):
    B, P, K = patches.shape
    D = conv_w.shape[-1]
    S = P + 1
    TB = batch_tile or _pick_tile(B, 8)
    return pl.pallas_call(
        patch_embed_kernel,
        out_shape=jax.ShapeDtypeStruct((B, S, D), jnp.float32),
        grid=(B // TB,),
        in_specs=[
            pl.BlockSpec((TB, P, K), lambda b: (b, 0, 0)),
            pl.BlockSpec((K, D), lambda b: (0, 0)),
            pl.BlockSpec((1, D), lambda b: (0, 0)),
            pl.BlockSpec((1, D), lambda b: (0, 0)),
            pl.BlockSpec((S, D), lambda b: (0, 0)),
        ],
        out_specs=pl.BlockSpec((TB, S, D), lambda b: (b, 0, 0)),
        compiler_params=pltpu.CompilerParams(dimension_semantics=("parallel",)),
    )(patches, conv_w, conv_b, cls_tok, pos_emb)


def transformer_encoder(x, p, num_heads, causal, batch_tile=None):
    """Fused L-layer pre-LN transformer; grid=(batch_blocks, layer)."""
    B, S, D = x.shape
    L, NV, _ = p["vec"].shape
    dff = p["w1"].shape[-1]
    TB = batch_tile or _pick_tile(B, 8)
    kernel = functools.partial(encoder_kernel, num_heads=num_heads, causal=causal)
    return pl.pallas_call(
        kernel,
        out_shape=jax.ShapeDtypeStruct((B, S, D), jnp.bfloat16),
        grid=(B // TB, L),
        in_specs=[
            pl.BlockSpec((TB, S, D), lambda bi, l: (bi, 0, 0)),      # x (read @ l==0)
            pl.BlockSpec((1, NV, D), lambda bi, l: (l, 0, 0)),       # packed vectors
            pl.BlockSpec((1, D, 3 * D), lambda bi, l: (l, 0, 0)),    # Wq|Wk|Wv packed
            pl.BlockSpec((1, 1, 3 * D), lambda bi, l: (l, 0, 0)),    # bq|bk|bv packed
            pl.BlockSpec((1, D, D), lambda bi, l: (l, 0, 0)),        # Wo
            pl.BlockSpec((1, D, dff), lambda bi, l: (l, 0, 0)),      # W1
            pl.BlockSpec((1, 1, dff), lambda bi, l: (l, 0, 0)),      # b1
            pl.BlockSpec((1, dff, D), lambda bi, l: (l, 0, 0)),      # W2
        ],
        out_specs=pl.BlockSpec((TB, S, D), lambda bi, l: (bi, 0, 0)),
        scratch_shapes=[pltpu.VMEM((TB, S, D), jnp.float32)],        # resident residual
        compiler_params=pltpu.CompilerParams(
            dimension_semantics=("parallel", "arbitrary"),
            # re-derive per generation: 64 MiB fits v7x physical, well under v5e/v6e.
            vmem_limit_bytes=64 * 1024 * 1024),
    )(x, p["vec"], p["w_qkv"], p["b_qkv"], p["w_o"], p["w1"], p["b1"], p["w2"])


def ln_proj(x, g, b, w):
    B, D = x.shape
    P = w.shape[1]
    tb = 256 if (B % 256 == 0) else B          # row-tiled for large contrastive batches
    return pl.pallas_call(
        ln_proj_kernel,
        out_shape=jax.ShapeDtypeStruct((B, P), jnp.float32),
        grid=(B // tb,),
        in_specs=[
            pl.BlockSpec((tb, D), lambda i: (i, 0)),
            pl.BlockSpec((1, D), lambda i: (0, 0)),
            pl.BlockSpec((1, D), lambda i: (0, 0)),
            pl.BlockSpec((D, P), lambda i: (0, 0)),
        ],
        out_specs=pl.BlockSpec((tb, P), lambda i: (i, 0)),
        compiler_params=pltpu.CompilerParams(dimension_semantics=("parallel",)),
    )(x, g, b, w)


def clip_logits(img_emb, txt_emb, logit_scale):
    B_i, B_t = img_emb.shape[0], txt_emb.shape[0]
    li = pl.pallas_call(
        clip_logits_kernel,
        out_shape=jax.ShapeDtypeStruct((B_i, B_t), jnp.float32),
        in_specs=[pl.BlockSpec(memory_space=VMEM)] * 3,
        out_specs=pl.BlockSpec(memory_space=VMEM),
    )(img_emb, txt_emb, logit_scale)
    return li, li.T                     # logits_per_text is the transpose (wrapper-side)


# ----------------------------------------------------------------------------
# Parameter construction (reference init, packed into kernel-friendly layouts)
# ----------------------------------------------------------------------------
def init_encoder_params(key, L, D, dff, H, attn_std, fc_std, proj_std, layer_scale):
    Dh = D // H
    qk_scale = Dh ** -0.5
    keys = jax.random.split(key, L * 6)

    def nrm(k, shape, std):
        return std * jax.random.normal(k, shape, jnp.float32)

    w_qkv, b_qkv, w_o, vec, w1, b1, w2 = [], [], [], [], [], [], []
    for l in range(L):
        kq, kk, kv, ko, k1, k2 = keys[l * 6:(l + 1) * 6]
        wq = nrm(kq, (D, D), attn_std) * qk_scale      # fold 1/sqrt(Dh) into Wq (bq==0)
        wk = nrm(kk, (D, D), attn_std)
        wv = nrm(kv, (D, D), attn_std)
        w_qkv.append(jnp.concatenate([wq, wk, wv], axis=1))          # (D, 3D)
        b_qkv.append(jnp.zeros((1, 3 * D), jnp.float32))             # lane-dense biases
        w_o.append(nrm(ko, (D, D), proj_std))                        # (D, D)
        vec.append(jnp.stack([
            jnp.ones((D,), jnp.float32),                  # ln1 gamma
            jnp.zeros((D,), jnp.float32),                 # ln1 beta
            jnp.zeros((D,), jnp.float32),                 # attn out bias
            jnp.full((D,), layer_scale, jnp.float32),     # layer scale 1
            jnp.ones((D,), jnp.float32),                  # ln2 gamma
            jnp.zeros((D,), jnp.float32),                 # ln2 beta
            jnp.zeros((D,), jnp.float32),                 # mlp out bias
            jnp.full((D,), layer_scale, jnp.float32),     # layer scale 2
        ], axis=0))                                       # (NUM_VEC, D)
        w1.append(nrm(k1, (D, dff), fc_std))
        b1.append(jnp.zeros((1, dff), jnp.float32))
        w2.append(nrm(k2, (dff, D), proj_std))

    stk = lambda xs: jnp.stack(xs, axis=0)
    return dict(
        vec=stk(vec),                                     # (L, NUM_VEC, D) f32
        w_qkv=stk(w_qkv).astype(PARAM_DTYPE),             # (L, D, 3D)
        b_qkv=stk(b_qkv),                                 # (L, 1, 3D) f32
        w_o=stk(w_o).astype(PARAM_DTYPE),                 # (L, D, D)
        w1=stk(w1).astype(PARAM_DTYPE),                   # (L, D, dff)
        b1=stk(b1),                                       # (L, 1, dff) f32
        w2=stk(w2).astype(PARAM_DTYPE),                   # (L, dff, D)
    )


def init_params(key, cfg):
    D = cfg["embed_dim"]
    dff = cfg["d_ff"]
    ps = cfg["patch_size"]
    num_patches = (cfg["image_size"] // ps) ** 2
    attn_std = D ** -0.5
    fc_std = (2 * D) ** -0.5
    proj_std = (D ** -0.5) * (2 * cfg["vit_num_blocks"]) ** -0.5

    k_vit, k_txt, k_rest = jax.random.split(key, 3)
    keys = iter(jax.random.split(k_rest, 16))

    def nrm(shape, std):
        return std * jax.random.normal(next(keys), shape, jnp.float32)

    return dict(
        conv_w=nrm((cfg["in_channels"] * ps * ps, D), attn_std).astype(PARAM_DTYPE),
        conv_b=jnp.zeros((1, D), jnp.float32),
        class_token=(D ** -0.5) * jax.random.uniform(next(keys), (1, D), jnp.float32),
        img_pos_emb=nrm((num_patches + 1, D), 0.02),
        vit=init_encoder_params(k_vit, cfg["vit_num_blocks"], D, dff,
                                cfg["vit_num_heads"], attn_std, fc_std, proj_std,
                                cfg["layer_scale"]),
        img_ln_g=jnp.ones((1, D), jnp.float32),
        img_ln_b=jnp.zeros((1, D), jnp.float32),
        img_proj_w=nrm((D, cfg["proj_dim"]), attn_std).astype(PARAM_DTYPE),
        text_emb=nrm((cfg["vocab_size"], D), 0.02),
        txt_pos_emb=nrm((cfg["context_dim"], D), 0.01),
        txt=init_encoder_params(k_txt, 1, D, dff, cfg["text_num_heads"],
                                attn_std, fc_std, proj_std, cfg["layer_scale"]),
        txt_ln_g=jnp.ones((1, D), jnp.float32),
        txt_ln_b=jnp.zeros((1, D), jnp.float32),
        txt_proj_w=nrm((D, cfg["proj_dim"]), attn_std).astype(PARAM_DTYPE),
        logit_scale=jnp.array([[math.log(1.0 / cfg["temperature"])]], jnp.float32),
    )


# ----------------------------------------------------------------------------
# Forward orchestration
# ----------------------------------------------------------------------------
def extract_patches(img, ps):
    # img: (B, C, H, W) NCHW -> (B, num_patches, C*ps*ps), same order as conv patchify
    B, C, H, W = img.shape
    x = img.reshape(B, C, H // ps, ps, W // ps, ps)
    x = x.transpose(0, 2, 4, 1, 3, 5)            # (B, H/ps, W/ps, C, ps, ps)
    return x.reshape(B, (H // ps) * (W // ps), C * ps * ps)


def encode_img(img, params, cfg):
    patches = extract_patches(img, cfg["patch_size"])
    x = patch_embed(patches, params["conv_w"], params["conv_b"],
                    params["class_token"], params["img_pos_emb"])       # (B, S, D)
    x = transformer_encoder(x, params["vit"], cfg["vit_num_heads"], causal=False)
    cls_out = x[:, 0, :]
    return ln_proj(cls_out, params["img_ln_g"], params["img_ln_b"],
                   params["img_proj_w"])


def encode_txt(tokens, params, cfg):
    B, _ = tokens.shape
    x = jnp.take(params["text_emb"], tokens, axis=0)                    # (B, L, D)
    x = x + params["txt_pos_emb"][None, :, :]
    x = transformer_encoder(x, params["txt"], cfg["text_num_heads"], causal=True)
    eot = jnp.argmax(tokens, axis=-1)                                   # EOT = max token id
    sel = x[jnp.arange(B), eot]                                         # (B, D)
    return ln_proj(sel, params["txt_ln_g"], params["txt_ln_b"],
                   params["txt_proj_w"])


def clip_forward(img, tokens, params, cfg):
    img_emb = encode_img(img, params, cfg)
    txt_emb = encode_txt(tokens, params, cfg)
    return clip_logits(img_emb, txt_emb, params["logit_scale"])


# ----------------------------------------------------------------------------
if __name__ == "__main__":
    cfg = dict(
        image_size=16, patch_size=4, embed_dim=32, proj_dim=16, d_ff=64,
        vit_num_heads=4, vit_num_blocks=2, text_num_heads=4, context_dim=8,
        layer_scale=1e-6, temperature=0.07, in_channels=3, vocab_size=512,
    )
    key = jax.random.PRNGKey(0)
    k_p, k_img, k_txt = jax.random.split(key, 3)

    params = init_params(k_p, cfg)
    img = jax.random.normal(
        k_img, (2, cfg["in_channels"], cfg["image_size"], cfg["image_size"]),
        jnp.float32)
    tokens = jax.random.randint(
        k_txt, (2, cfg["context_dim"]), 0, cfg["vocab_size"], jnp.int32)

    fwd = jax.jit(functools.partial(clip_forward, cfg=cfg))
    logits_i, logits_t = fwd(img, tokens, params)
    jax.block_until_ready((logits_i, logits_t))

    assert logits_i.shape == (2, 2) and logits_t.shape == (2, 2)
    assert bool(jnp.all(jnp.isfinite(logits_i))) and bool(jnp.all(jnp.isfinite(logits_t)))
    print("KERNEL_OK")
</pallas_src>

<mosaic_0001>
module attributes {stable_mosaic.version = 11 : i64} {
  func.func @patch_embed_kernel(%arg0: i32, %arg1: memref<2x16x48xf32, #tpu.memory_space<vmem>>, %arg2: memref<48x32xbf16, #tpu.memory_space<vmem>>, %arg3: memref<1x32xf32, #tpu.memory_space<vmem>>, %arg4: memref<1x32xf32, #tpu.memory_space<vmem>>, %arg5: memref<17x32xf32, #tpu.memory_space<vmem>>, %arg6: memref<2x17x32xf32, #tpu.memory_space<vmem>>) attributes {dimension_semantics = [#tpu.dimension_semantics<parallel>], iteration_bounds = array<i64: 1>, scalar_prefetch = 0 : i64, scratch_operands = 0 : i64, tpu.core_type = #tpu.core_type<tc>, window_params = [{transform_indices = @transform_0, window_bounds = array<i64: 2, 16, 48>}, {pipeline_mode = #tpu.pipeline_mode<synchronous>, transform_indices = @transform_1, window_bounds = array<i64: 48, 32>}, {pipeline_mode = #tpu.pipeline_mode<synchronous>, transform_indices = @transform_2, window_bounds = array<i64: 1, 32>}, {pipeline_mode = #tpu.pipeline_mode<synchronous>, transform_indices = @transform_3, window_bounds = array<i64: 1, 32>}, {pipeline_mode = #tpu.pipeline_mode<synchronous>, transform_indices = @transform_4, window_bounds = array<i64: 17, 32>}, {transform_indices = @transform_5, window_bounds = array<i64: 2, 17, 32>}]} {
    %c0 = arith.constant 0 : index
    %c0_0 = arith.constant 0 : index
    %0 = vector.load %arg2[%c0, %c0_0] : memref<48x32xbf16, #tpu.memory_space<vmem>>, vector<48x32xbf16>
    %c0_1 = arith.constant 0 : index
    %c0_2 = arith.constant 0 : index
    %1 = vector.load %arg3[%c0_1, %c0_2] : memref<1x32xf32, #tpu.memory_space<vmem>>, vector<1x32xf32>
    %c0_3 = arith.constant 0 : index
    %c0_4 = arith.constant 0 : index
    %2 = vector.load %arg5[%c0_3, %c0_4] : memref<17x32xf32, #tpu.memory_space<vmem>>, vector<17x32xf32>
    %c0_5 = arith.constant 0 : index
    %c0_6 = arith.constant 0 : index
    %3 = vector.load %arg4[%c0_5, %c0_6] : memref<1x32xf32, #tpu.memory_space<vmem>>, vector<1x32xf32>
    %4 = vector.extract_strided_slice %2 {offsets = [0, 0], sizes = [1, 32], strides = [1, 1]} : vector<17x32xf32> to vector<1x32xf32>
    %5 = arith.addf %3, %4 : vector<1x32xf32>
    %6 = vector.extract_strided_slice %2 {offsets = [1, 0], sizes = [16, 32], strides = [1, 1]} : vector<17x32xf32> to vector<16x32xf32>
    %c0_7 = arith.constant 0 : index
    %c0_8 = arith.constant 0 : index
    %c0_9 = arith.constant 0 : index
    %7 = vector.load %arg1[%c0_7, %c0_8, %c0_9] : memref<2x16x48xf32, #tpu.memory_space<vmem>>, vector<1x16x48xf32>
    %8 = vector.shape_cast %7 : vector<1x16x48xf32> to vector<16x48xf32>
    %9 = arith.truncf %8 : vector<16x48xf32> to vector<16x48xbf16>
    %cst = arith.constant dense<0.000000e+00> : vector<16x32xf32>
    %10 = tpu.matmul %9, %0, %cst {dimension_numbers = #tpu.dot_dimension_numbers<[1], [0], [0], [1], [0, 0, 1, 1], [], []>} : vector<16x48xbf16>, vector<48x32xbf16>, vector<16x32xf32> -> vector<16x32xf32>
    %11 = vector.broadcast %1 : vector<1x32xf32> to vector<16x32xf32>
    %12 = arith.addf %10, %11 : vector<16x32xf32>
    %13 = arith.addf %12, %6 : vector<16x32xf32>
    %c0_10 = arith.constant 0 : index
    %c0_11 = arith.constant 0 : index
    %c0_12 = arith.constant 0 : index
    %14 = vector.load %arg6[%c0_10, %c0_11, %c0_12] : memref<2x17x32xf32, #tpu.memory_space<vmem>>, vector<1x1x32xf32>
    %15 = vector.shape_cast %14 : vector<1x1x32xf32> to vector<1x32xf32>
    %16 = vector.shape_cast %5 : vector<1x32xf32> to vector<1x1x32xf32>
    tpu.vector_store %arg6[%c0_10, %c0_11, %c0_12], %16 {strides = array<i32>} : memref<2x17x32xf32, #tpu.memory_space<vmem>>, vector<1x1x32xf32>,
    %c0_13 = arith.constant 0 : index
    %c1 = arith.constant 1 : index
    %c0_14 = arith.constant 0 : index
    %17 = vector.load %arg6[%c0_13, %c1, %c0_14] : memref<2x17x32xf32, #tpu.memory_space<vmem>>, vector<1x16x32xf32>
    %18 = vector.shape_cast %17 : vector<1x16x32xf32> to vector<16x32xf32>
    %19 = vector.shape_cast %13 : vector<16x32xf32> to vector<1x16x32xf32>
    tpu.vector_store %arg6[%c0_13, %c1, %c0_14], %19 {strides = array<i32>} : memref<2x17x32xf32, #tpu.memory_space<vmem>>, vector<1x16x32xf32>,
    %c1_15 = arith.constant 1 : index
    %c0_16 = arith.constant 0 : index
    %c0_17 = arith.constant 0 : index
    %20 = vector.load %arg1[%c1_15, %c0_16, %c0_17] : memref<2x16x48xf32, #tpu.memory_space<vmem>>, vector<1x16x48xf32>
    %21 = vector.shape_cast %20 : vector<1x16x48xf32> to vector<16x48xf32>
    %22 = arith.truncf %21 : vector<16x48xf32> to vector<16x48xbf16>
    %cst_18 = arith.constant dense<0.000000e+00> : vector<16x32xf32>
    %23 = tpu.matmul %22, %0, %cst_18 {dimension_numbers = #tpu.dot_dimension_numbers<[1], [0], [0], [1], [0, 0, 1, 1], [], []>} : vector<16x48xbf16>, vector<48x32xbf16>, vector<16x32xf32> -> vector<16x32xf32>
    %24 = vector.broadcast %1 : vector<1x32xf32> to vector<16x32xf32>
    %25 = arith.addf %23, %24 : vector<16x32xf32>
    %26 = arith.addf %25, %6 : vector<16x32xf32>
    %c1_19 = arith.constant 1 : index
    %c0_20 = arith.constant 0 : index
    %c0_21 = arith.constant 0 : index
    %27 = vector.load %arg6[%c1_19, %c0_20, %c0_21] : memref<2x17x32xf32, #tpu.memory_space<vmem>>, vector<1x1x32xf32>
    %28 = vector.shape_cast %27 : vector<1x1x32xf32> to vector<1x32xf32>
    %29 = vector.shape_cast %5 : vector<1x32xf32> to vector<1x1x32xf32>
    tpu.vector_store %arg6[%c1_19, %c0_20, %c0_21], %29 {strides = array<i32>} : memref<2x17x32xf32, #tpu.memory_space<vmem>>, vector<1x1x32xf32>,
    %c1_22 = arith.constant 1 : index
    %c1_23 = arith.constant 1 : index
    %c0_24 = arith.constant 0 : index
    %30 = vector.load %arg6[%c1_22, %c1_23, %c0_24] : memref<2x17x32xf32, #tpu.memory_space<vmem>>, vector<1x16x32xf32>
    %31 = vector.shape_cast %30 : vector<1x16x32xf32> to vector<16x32xf32>
    %32 = vector.shape_cast %26 : vector<16x32xf32> to vector<1x16x32xf32>
    tpu.vector_store %arg6[%c1_22, %c1_23, %c0_24], %32 {strides = array<i32>} : memref<2x17x32xf32, #tpu.memory_space<vmem>>, vector<1x16x32xf32>,
    return
  }
  func.func @transform_0(%arg0: i32) -> (i32, i32, i32) {
    %c0_i32 = arith.constant 0 : i32
    %c0_i32_0 = arith.constant 0 : i32
    %c0_i32_1 = arith.constant 0 : i32
    return %arg0, %c0_i32, %c0_i32_0 : i32, i32, i32
  }
  func.func @transform_1(%arg0: i32) -> (i32, i32) {
    %c0_i32 = arith.constant 0 : i32
    %c0_i32_0 = arith.constant 0 : i32
    %c0_i32_1 = arith.constant 0 : i32
    return %c0_i32, %c0_i32_0 : i32, i32
  }
  func.func @transform_2(%arg0: i32) -> (i32, i32) {
    %c0_i32 = arith.constant 0 : i32
    %c0_i32_0 = arith.constant 0 : i32
    %c0_i32_1 = arith.constant 0 : i32
    return %c0_i32, %c0_i32_0 : i32, i32
  }
  func.func @transform_3(%arg0: i32) -> (i32, i32) {
    %c0_i32 = arith.constant 0 : i32
    %c0_i32_0 = arith.constant 0 : i32
    %c0_i32_1 = arith.constant 0 : i32
    return %c0_i32, %c0_i32_0 : i32, i32
  }
  func.func @transform_4(%arg0: i32) -> (i32, i32) {
    %c0_i32 = arith.constant 0 : i32
    %c0_i32_0 = arith.constant 0 : i32
    %c0_i32_1 = arith.constant 0 : i32
    return %c0_i32, %c0_i32_0 : i32, i32
  }
  func.func @transform_5(%arg0: i32) -> (i32, i32, i32) {
    %c0_i32 = arith.constant 0 : i32
    %c0_i32_0 = arith.constant 0 : i32
    %c0_i32_1 = arith.constant 0 : i32
    return %arg0, %c0_i32, %c0_i32_0 : i32, i32, i32
  }
}

module attributes {stable_mosaic.version = 11 : i64} {
  func.func @ln_proj_kernel(%arg0: i32, %arg1: memref<2x32xbf16, #tpu.memory_space<vmem>>, %arg2: memref<1x32xf32, #tpu.memory_space<vmem>>, %arg3: memref<1x32xf32, #tpu.memory_space<vmem>>, %arg4: memref<32x16xbf16, #tpu.memory_space<vmem>>, %arg5: memref<2x16xf32, #tpu.memory_space<vmem>>) attributes {dimension_semantics = [#tpu.dimension_semantics<parallel>], iteration_bounds = array<i64: 1>, scalar_prefetch = 0 : i64, scratch_operands = 0 : i64, tpu.core_type = #tpu.core_type<tc>, window_params = [{transform_indices = @transform_0, window_bounds = array<i64: 2, 32>}, {pipeline_mode = #tpu.pipeline_mode<synchronous>, transform_indices = @transform_1, window_bounds = array<i64: 1, 32>}, {pipeline_mode = #tpu.pipeline_mode<synchronous>, transform_indices = @transform_2, window_bounds = array<i64: 1, 32>}, {pipeline_mode = #tpu.pipeline_mode<synchronous>, transform_indices = @transform_3, window_bounds = array<i64: 32, 16>}, {transform_indices = @transform_4, window_bounds = array<i64: 2, 16>}]} {
    %c0 = arith.constant 0 : index
    %c0_0 = arith.constant 0 : index
    %0 = vector.load %arg1[%c0, %c0_0] : memref<2x32xbf16, #tpu.memory_space<vmem>>, vector<2x32xbf16>
    %1 = arith.extf %0 : vector<2x32xbf16> to vector<2x32xf32>
    %c0_1 = arith.constant 0 : index
    %c0_2 = arith.constant 0 : index
    %2 = vector.load %arg2[%c0_1, %c0_2] : memref<1x32xf32, #tpu.memory_space<vmem>>, vector<1x32xf32>
    %c0_3 = arith.constant 0 : index
    %c0_4 = arith.constant 0 : index
    %3 = vector.load %arg3[%c0_3, %c0_4] : memref<1x32xf32, #tpu.memory_space<vmem>>, vector<1x32xf32>
    %cst = arith.constant dense<0.000000e+00> : vector<2xf32>
    %4 = vector.multi_reduction <add>, %1, %cst [1] : vector<2x32xf32> to vector<2xf32>
    %5 = vector.shape_cast %4 : vector<2xf32> to vector<2x1xf32>
    %cst_5 = arith.constant 3.200000e+01 : f32
    %6 = vector.broadcast %cst_5 : f32 to vector<2x1xf32>
    %7 = arith.divf %5, %6 : vector<2x1xf32>
    %8 = vector.broadcast %7 : vector<2x1xf32> to vector<2x32xf32>
    %9 = arith.subf %1, %8 : vector<2x32xf32>
    %10 = arith.mulf %9, %9 : vector<2x32xf32>
    %cst_6 = arith.constant dense<0.000000e+00> : vector<2xf32>
    %11 = vector.multi_reduction <add>, %10, %cst_6 [1] : vector<2x32xf32> to vector<2xf32>
    %12 = vector.shape_cast %11 : vector<2xf32> to vector<2x1xf32>
    %cst_7 = arith.constant 3.200000e+01 : f32
    %13 = vector.broadcast %cst_7 : f32 to vector<2x1xf32>
    %14 = arith.divf %12, %13 : vector<2x1xf32>
    %15 = vector.broadcast %7 : vector<2x1xf32> to vector<2x32xf32>
    %16 = arith.subf %1, %15 : vector<2x32xf32>
    %cst_8 = arith.constant 9.99999974E-6 : f32
    %17 = vector.broadcast %cst_8 : f32 to vector<2x1xf32>
    %18 = arith.addf %14, %17 : vector<2x1xf32>
    %19 = math.rsqrt %18 : vector<2x1xf32>
    %20 = vector.broadcast %19 : vector<2x1xf32> to vector<2x32xf32>
    %21 = arith.mulf %16, %20 : vector<2x32xf32>
    %22 = vector.broadcast %2 : vector<1x32xf32> to vector<2x32xf32>
    %23 = arith.mulf %21, %22 : vector<2x32xf32>
    %24 = vector.broadcast %3 : vector<1x32xf32> to vector<2x32xf32>
    %25 = arith.addf %23, %24 : vector<2x32xf32>
    %26 = arith.truncf %25 : vector<2x32xf32> to vector<2x32xbf16>
    %c0_9 = arith.constant 0 : index
    %c0_10 = arith.constant 0 : index
    %27 = vector.load %arg4[%c0_9, %c0_10] : memref<32x16xbf16, #tpu.memory_space<vmem>>, vector<32x16xbf16>
    %cst_11 = arith.constant dense<0.000000e+00> : vector<2x16xf32>
    %28 = tpu.matmul %26, %27, %cst_11 {dimension_numbers = #tpu.dot_dimension_numbers<[1], [0], [0], [1], [0, 0, 1, 1], [], []>} : vector<2x32xbf16>, vector<32x16xbf16>, vector<2x16xf32> -> vector<2x16xf32>
    %c0_12 = arith.constant 0 : index
    %c0_13 = arith.constant 0 : index
    %29 = vector.load %arg5[%c0_12, %c0_13] : memref<2x16xf32, #tpu.memory_space<vmem>>, vector<2x16xf32>
    tpu.vector_store %arg5[%c0_12, %c0_13], %28 {strides = array<i32>} : memref<2x16xf32, #tpu.memory_space<vmem>>, vector<2x16xf32>,
    return
  }
  func.func @transform_0(%arg0: i32) -> (i32, i32) {
    %c0_i32 = arith.constant 0 : i32
    %c0_i32_0 = arith.constant 0 : i32
    return %arg0, %c0_i32 : i32, i32
  }
  func.func @transform_1(%arg0: i32) -> (i32, i32) {
    %c0_i32 = arith.constant 0 : i32
    %c0_i32_0 = arith.constant 0 : i32
    %c0_i32_1 = arith.constant 0 : i32
    return %c0_i32, %c0_i32_0 : i32, i32
  }
  func.func @transform_2(%arg0: i32) -> (i32, i32) {
    %c0_i32 = arith.constant 0 : i32
    %c0_i32_0 = arith.constant 0 : i32
    %c0_i32_1 = arith.constant 0 : i32
    return %c0_i32, %c0_i32_0 : i32, i32
  }
  func.func @transform_3(%arg0: i32) -> (i32, i32) {
    %c0_i32 = arith.constant 0 : i32
    %c0_i32_0 = arith.constant 0 : i32
    %c0_i32_1 = arith.constant 0 : i32
    return %c0_i32, %c0_i32_0 : i32, i32
  }
  func.func @transform_4(%arg0: i32) -> (i32, i32) {
    %c0_i32 = arith.constant 0 : i32
    %c0_i32_0 = arith.constant 0 : i32
    return %arg0, %c0_i32 : i32, i32
  }
}

module attributes {stable_mosaic.version = 11 : i64} {
  func.func @encoder_kernel(%arg0: i32, %arg1: i32, %arg2: memref<2x17x32xf32, #tpu.memory_space<vmem>>, %arg3: memref<1x8x32xf32, #tpu.memory_space<vmem>>, %arg4: memref<1x32x96xbf16, #tpu.memory_space<vmem>>, %arg5: memref<1x1x96xf32, #tpu.memory_space<vmem>>, %arg6: memref<1x32x32xbf16, #tpu.memory_space<vmem>>, %arg7: memref<1x32x64xbf16, #tpu.memory_space<vmem>>, %arg8: memref<1x1x64xf32, #tpu.memory_space<vmem>>, %arg9: memref<1x64x32xbf16, #tpu.memory_space<vmem>>, %arg10: memref<2x17x32xbf16, #tpu.memory_space<vmem>>, %arg11: memref<2x17x32xf32, #tpu.memory_space<vmem>>) attributes {dimension_semantics = [#tpu.dimension_semantics<parallel>, #tpu.dimension_semantics<arbitrary>], iteration_bounds = array<i64: 1, 2>, scalar_prefetch = 0 : i64, scratch_operands = 1 : i64, tpu.core_type = #tpu.core_type<tc>, window_params = [{transform_indices = @transform_0, window_bounds = array<i64: 2, 17, 32>}, {transform_indices = @transform_1, window_bounds = array<i64: 1, 8, 32>}, {transform_indices = @transform_2, window_bounds = array<i64: 1, 32, 96>}, {transform_indices = @transform_3, window_bounds = array<i64: 1, 1, 96>}, {transform_indices = @transform_4, window_bounds = array<i64: 1, 32, 32>}, {transform_indices = @transform_5, window_bounds = array<i64: 1, 32, 64>}, {transform_indices = @transform_6, window_bounds = array<i64: 1, 1, 64>}, {transform_indices = @transform_7, window_bounds = array<i64: 1, 64, 32>}, {transform_indices = @transform_8, window_bounds = array<i64: 2, 17, 32>}]} {
    %c0_i32 = arith.constant 0 : i32
    %0 = arith.cmpi eq, %arg1, %c0_i32 : i32
    %1 = arith.extui %0 : i1 to i32
    %c0_i32_0 = arith.constant 0 : i32
    %2 = arith.cmpi ne, %1, %c0_i32_0 : i32
    scf.if %2 {
      %c0_100 = arith.constant 0 : index
      %c0_101 = arith.constant 0 : index
      %c0_102 = arith.constant 0 : index
      %350 = vector.load %arg2[%c0_100, %c0_101, %c0_102] : memref<2x17x32xf32, #tpu.memory_space<vmem>>, vector<2x17x32xf32>
      %c0_103 = arith.constant 0 : index
      %c0_104 = arith.constant 0 : index
      %c0_105 = arith.constant 0 : index
      %351 = vector.load %arg11[%c0_103, %c0_104, %c0_105] : memref<2x17x32xf32, #tpu.memory_space<vmem>>, vector<2x17x32xf32>
      tpu.vector_store %arg11[%c0_103, %c0_104, %c0_105], %350 {strides = array<i32>} : memref<2x17x32xf32, #tpu.memory_space<vmem>>, vector<2x17x32xf32>,
    } else {
    }
    %c0 = arith.constant 0 : index
    %c0_1 = arith.constant 0 : index
    %c0_2 = arith.constant 0 : index
    %3 = vector.load %arg3[%c0, %c0_1, %c0_2] : memref<1x8x32xf32, #tpu.memory_space<vmem>>, vector<1x8x32xf32>
    %4 = vector.shape_cast %3 : vector<1x8x32xf32> to vector<8x32xf32>
    %5 = vector.extract_strided_slice %4 {offsets = [0, 0], sizes = [1, 32], strides = [1, 1]} : vector<8x32xf32> to vector<1x32xf32>
    %6 = vector.extract_strided_slice %4 {offsets = [1, 0], sizes = [1, 32], strides = [1, 1]} : vector<8x32xf32> to vector<1x32xf32>
    %7 = vector.extract_strided_slice %4 {offsets = [2, 0], sizes = [1, 32], strides = [1, 1]} : vector<8x32xf32> to vector<1x32xf32>
    %8 = vector.extract_strided_slice %4 {offsets = [3, 0], sizes = [1, 32], strides = [1, 1]} : vector<8x32xf32> to vector<1x32xf32>
    %9 = vector.extract_strided_slice %4 {offsets = [4, 0], sizes = [1, 32], strides = [1, 1]} : vector<8x32xf32> to vector<1x32xf32>
    %10 = vector.extract_strided_slice %4 {offsets = [5, 0], sizes = [1, 32], strides = [1, 1]} : vector<8x32xf32> to vector<1x32xf32>
    %11 = vector.extract_strided_slice %4 {offsets = [6, 0], sizes = [1, 32], strides = [1, 1]} : vector<8x32xf32> to vector<1x32xf32>
    %12 = vector.extract_strided_slice %4 {offsets = [7, 0], sizes = [1, 32], strides = [1, 1]} : vector<8x32xf32> to vector<1x32xf32>
    %c0_3 = arith.constant 0 : index
    %c0_4 = arith.constant 0 : index
    %c0_5 = arith.constant 0 : index
    %13 = vector.load %arg4[%c0_3, %c0_4, %c0_5] : memref<1x32x96xbf16, #tpu.memory_space<vmem>>, vector<1x32x96xbf16>
    %14 = vector.shape_cast %13 : vector<1x32x96xbf16> to vector<32x96xbf16>
    %c0_6 = arith.constant 0 : index
    %c0_7 = arith.constant 0 : index
    %c0_8 = arith.constant 0 : index
    %15 = vector.load %arg5[%c0_6, %c0_7, %c0_8] : memref<1x1x96xf32, #tpu.memory_space<vmem>>, vector<1x1x96xf32>
    %16 = vector.shape_cast %15 : vector<1x1x96xf32> to vector<1x96xf32>
    %c0_9 = arith.constant 0 : index
    %c0_10 = arith.constant 0 : index
    %c0_11 = arith.constant 0 : index
    %17 = vector.load %arg6[%c0_9, %c0_10, %c0_11] : memref<1x32x32xbf16, #tpu.memory_space<vmem>>, vector<1x32x32xbf16>
    %18 = vector.shape_cast %17 : vector<1x32x32xbf16> to vector<32x32xbf16>
    %c0_12 = arith.constant 0 : index
    %c0_13 = arith.constant 0 : index
    %c0_14 = arith.constant 0 : index
    %19 = vector.load %arg7[%c0_12, %c0_13, %c0_14] : memref<1x32x64xbf16, #tpu.memory_space<vmem>>, vector<1x32x64xbf16>
    %20 = vector.shape_cast %19 : vector<1x32x64xbf16> to vector<32x64xbf16>
    %c0_15 = arith.constant 0 : index
    %c0_16 = arith.constant 0 : index
    %c0_17 = arith.constant 0 : index
    %21 = vector.load %arg8[%c0_15, %c0_16, %c0_17] : memref<1x1x64xf32, #tpu.memory_space<vmem>>, vector<1x1x64xf32>
    %22 = vector.shape_cast %21 : vector<1x1x64xf32> to vector<1x64xf32>
    %c0_18 = arith.constant 0 : index
    %c0_19 = arith.constant 0 : index
    %c0_20 = arith.constant 0 : index
    %23 = vector.load %arg9[%c0_18, %c0_19, %c0_20] : memref<1x64x32xbf16, #tpu.memory_space<vmem>>, vector<1x64x32xbf16>
    %24 = vector.shape_cast %23 : vector<1x64x32xbf16> to vector<64x32xbf16>
    %c0_21 = arith.constant 0 : index
    %c0_22 = arith.constant 0 : index
    %c0_23 = arith.constant 0 : index
    %25 = vector.load %arg11[%c0_21, %c0_22, %c0_23] : memref<2x17x32xf32, #tpu.memory_space<vmem>>, vector<1x17x32xf32>
    %26 = vector.shape_cast %25 : vector<1x17x32xf32> to vector<17x32xf32>
    %cst = arith.constant dense<0.000000e+00> : vector<17xf32>
    %27 = vector.multi_reduction <add>, %26, %cst [1] : vector<17x32xf32> to vector<17xf32>
    %28 = vector.shape_cast %27 : vector<17xf32> to vector<17x1xf32>
    %cst_24 = arith.constant 3.200000e+01 : f32
    %29 = vector.broadcast %cst_24 : f32 to vector<17x1xf32>
    %30 = arith.divf %28, %29 : vector<17x1xf32>
    %31 = vector.broadcast %30 : vector<17x1xf32> to vector<17x32xf32>
    %32 = arith.subf %26, %31 : vector<17x32xf32>
    %33 = arith.mulf %32, %32 : vector<17x32xf32>
    %cst_25 = arith.constant dense<0.000000e+00> : vector<17xf32>
    %34 = vector.multi_reduction <add>, %33, %cst_25 [1] : vector<17x32xf32> to vector<17xf32>
    %35 = vector.shape_cast %34 : vector<17xf32> to vector<17x1xf32>
    %cst_26 = arith.constant 3.200000e+01 : f32
    %36 = vector.broadcast %cst_26 : f32 to vector<17x1xf32>
    %37 = arith.divf %35, %36 : vector<17x1xf32>
    %38 = vector.broadcast %30 : vector<17x1xf32> to vector<17x32xf32>
    %39 = arith.subf %26, %38 : vector<17x32xf32>
    %cst_27 = arith.constant 9.99999974E-6 : f32
    %40 = vector.broadcast %cst_27 : f32 to vector<17x1xf32>
    %41 = arith.addf %37, %40 : vector<17x1xf32>
    %42 = math.rsqrt %41 : vector<17x1xf32>
    %43 = vector.broadcast %42 : vector<17x1xf32> to vector<17x32xf32>
    %44 = arith.mulf %39, %43 : vector<17x32xf32>
    %45 = vector.broadcast %5 : vector<1x32xf32> to vector<17x32xf32>
    %46 = arith.mulf %44, %45 : vector<17x32xf32>
    %47 = vector.broadcast %6 : vector<1x32xf32> to vector<17x32xf32>
    %48 = arith.addf %46, %47 : vector<17x32xf32>
    %49 = arith.truncf %48 : vector<17x32xf32> to vector<17x32xbf16>
    %cst_28 = arith.constant dense<0.000000e+00> : vector<17x96xf32>
    %50 = tpu.matmul %49, %14, %cst_28 {dimension_numbers = #tpu.dot_dimension_numbers<[1], [0], [0], [1], [0, 0, 1, 1], [], []>} : vector<17x32xbf16>, vector<32x96xbf16>, vector<17x96xf32> -> vector<17x96xf32>
    %51 = vector.broadcast %16 : vector<1x96xf32> to vector<17x96xf32>
    %52 = arith.addf %50, %51 : vector<17x96xf32>
    %53 = vector.extract_strided_slice %52 {offsets = [0, 0], sizes = [17, 8], strides = [1, 1]} : vector<17x96xf32> to vector<17x8xf32>
    %54 = arith.truncf %53 : vector<17x8xf32> to vector<17x8xbf16>
    %55 = vector.extract_strided_slice %52 {offsets = [0, 32], sizes = [17, 8], strides = [1, 1]} : vector<17x96xf32> to vector<17x8xf32>
    %56 = arith.truncf %55 : vector<17x8xf32> to vector<17x8xbf16>
    %57 = vector.extract_strided_slice %52 {offsets = [0, 64], sizes = [17, 8], strides = [1, 1]} : vector<17x96xf32> to vector<17x8xf32>
    %58 = arith.truncf %57 : vector<17x8xf32> to vector<17x8xbf16>
    %cst_29 = arith.constant dense<0.000000e+00> : vector<17x17xf32>
    %59 = tpu.matmul %54, %56, %cst_29 {dimension_numbers = #tpu.dot_dimension_numbers<[1], [1], [0], [0], [0, 0, 1, 0], [], []>} : vector<17x8xbf16>, vector<17x8xbf16>, vector<17x17xf32> -> vector<17x17xf32>
    %cst_30 = arith.constant dense<0xFF800000> : vector<17xf32>
    %60 = vector.multi_reduction <maximumf>, %59, %cst_30 [1] : vector<17x17xf32> to vector<17xf32>
    %61 = vector.shape_cast %60 : vector<17xf32> to vector<17x1xf32>
    %62 = vector.broadcast %61 : vector<17x1xf32> to vector<17x17xf32>
    %63 = arith.subf %59, %62 : vector<17x17xf32>
    %64 = math.exp %63 : vector<17x17xf32>
    %cst_31 = arith.constant dense<0.000000e+00> : vector<17xf32>
    %65 = vector.multi_reduction <add>, %64, %cst_31 [1] : vector<17x17xf32> to vector<17xf32>
    %66 = vector.shape_cast %65 : vector<17xf32> to vector<17x1xf32>
    %67 = tpu.reciprocal %66 {approx = true} : vector<17x1xf32> -> vector<17x1xf32>
    %68 = vector.broadcast %67 : vector<17x1xf32> to vector<17x17xf32>
    %69 = arith.mulf %64, %68 : vector<17x17xf32>
    %70 = arith.truncf %69 : vector<17x17xf32> to vector<17x17xbf16>
    %cst_32 = arith.constant dense<0.000000e+00> : vector<17x8xf32>
    %71 = tpu.matmul %70, %58, %cst_32 {dimension_numbers = #tpu.dot_dimension_numbers<[1], [0], [0], [1], [0, 0, 1, 1], [], []>} : vector<17x17xbf16>, vector<17x8xbf16>, vector<17x8xf32> -> vector<17x8xf32>
    %72 = vector.extract_strided_slice %52 {offsets = [0, 8], sizes = [17, 8], strides = [1, 1]} : vector<17x96xf32> to vector<17x8xf32>
    %73 = arith.truncf %72 : vector<17x8xf32> to vector<17x8xbf16>
    %74 = vector.extract_strided_slice %52 {offsets = [0, 40], sizes = [17, 8], strides = [1, 1]} : vector<17x96xf32> to vector<17x8xf32>
    %75 = arith.truncf %74 : vector<17x8xf32> to vector<17x8xbf16>
    %76 = vector.extract_strided_slice %52 {offsets = [0, 72], sizes = [17, 8], strides = [1, 1]} : vector<17x96xf32> to vector<17x8xf32>
    %77 = arith.truncf %76 : vector<17x8xf32> to vector<17x8xbf16>
    %cst_33 = arith.constant dense<0.000000e+00> : vector<17x17xf32>
    %78 = tpu.matmul %73, %75, %cst_33 {dimension_numbers = #tpu.dot_dimension_numbers<[1], [1], [0], [0], [0, 0, 1, 0], [], []>} : vector<17x8xbf16>, vector<17x8xbf16>, vector<17x17xf32> -> vector<17x17xf32>
    %cst_34 = arith.constant dense<0xFF800000> : vector<17xf32>
    %79 = vector.multi_reduction <maximumf>, %78, %cst_34 [1] : vector<17x17xf32> to vector<17xf32>
    %80 = vector.shape_cast %79 : vector<17xf32> to vector<17x1xf32>
    %81 = vector.broadcast %80 : vector<17x1xf32> to vector<17x17xf32>
    %82 = arith.subf %78, %81 : vector<17x17xf32>
    %83 = math.exp %82 : vector<17x17xf32>
    %cst_35 = arith.constant dense<0.000000e+00> : vector<17xf32>
    %84 = vector.multi_reduction <add>, %83, %cst_35 [1] : vector<17x17xf32> to vector<17xf32>
    %85 = vector.shape_cast %84 : vector<17xf32> to vector<17x1xf32>
    %86 = tpu.reciprocal %85 {approx = true} : vector<17x1xf32> -> vector<17x1xf32>
    %87 = vector.broadcast %86 : vector<17x1xf32> to vector<17x17xf32>
    %88 = arith.mulf %83, %87 : vector<17x17xf32>
    %89 = arith.truncf %88 : vector<17x17xf32> to vector<17x17xbf16>
    %cst_36 = arith.constant dense<0.000000e+00> : vector<17x8xf32>
    %90 = tpu.matmul %89, %77, %cst_36 {dimension_numbers = #tpu.dot_dimension_numbers<[1], [0], [0], [1], [0, 0, 1, 1], [], []>} : vector<17x17xbf16>, vector<17x8xbf16>, vector<17x8xf32> -> vector<17x8xf32>
    %91 = vector.extract_strided_slice %52 {offsets = [0, 16], sizes = [17, 8], strides = [1, 1]} : vector<17x96xf32> to vector<17x8xf32>
    %92 = arith.truncf %91 : vector<17x8xf32> to vector<17x8xbf16>
    %93 = vector.extract_strided_slice %52 {offsets = [0, 48], sizes = [17, 8], strides = [1, 1]} : vector<17x96xf32> to vector<17x8xf32>
    %94 = arith.truncf %93 : vector<17x8xf32> to vector<17x8xbf16>
    %95 = vector.extract_strided_slice %52 {offsets = [0, 80], sizes = [17, 8], strides = [1, 1]} : vector<17x96xf32> to vector<17x8xf32>
    %96 = arith.truncf %95 : vector<17x8xf32> to vector<17x8xbf16>
    %cst_37 = arith.constant dense<0.000000e+00> : vector<17x17xf32>
    %97 = tpu.matmul %92, %94, %cst_37 {dimension_numbers = #tpu.dot_dimension_numbers<[1], [1], [0], [0], [0, 0, 1, 0], [], []>} : vector<17x8xbf16>, vector<17x8xbf16>, vector<17x17xf32> -> vector<17x17xf32>
    %cst_38 = arith.constant dense<0xFF800000> : vector<17xf32>
    %98 = vector.multi_reduction <maximumf>, %97, %cst_38 [1] : vector<17x17xf32> to vector<17xf32>
    %99 = vector.shape_cast %98 : vector<17xf32> to vector<17x1xf32>
    %100 = vector.broadcast %99 : vector<17x1xf32> to vector<17x17xf32>
    %101 = arith.subf %97, %100 : vector<17x17xf32>
    %102 = math.exp %101 : vector<17x17xf32>
    %cst_39 = arith.constant dense<0.000000e+00> : vector<17xf32>
    %103 = vector.multi_reduction <add>, %102, %cst_39 [1] : vector<17x17xf32> to vector<17xf32>
    %104 = vector.shape_cast %103 : vector<17xf32> to vector<17x1xf32>
    %105 = tpu.reciprocal %104 {approx = true} : vector<17x1xf32> -> vector<17x1xf32>
    %106 = vector.broadcast %105 : vector<17x1xf32> to vector<17x17xf32>
    %107 = arith.mulf %102, %106 : vector<17x17xf32>
    %108 = arith.truncf %107 : vector<17x17xf32> to vector<17x17xbf16>
    %cst_40 = arith.constant dense<0.000000e+00> : vector<17x8xf32>
    %109 = tpu.matmul %108, %96, %cst_40 {dimension_numbers = #tpu.dot_dimension_numbers<[1], [0], [0], [1], [0, 0, 1, 1], [], []>} : vector<17x17xbf16>, vector<17x8xbf16>, vector<17x8xf32> -> vector<17x8xf32>
    %110 = vector.extract_strided_slice %52 {offsets = [0, 24], sizes = [17, 8], strides = [1, 1]} : vector<17x96xf32> to vector<17x8xf32>
    %111 = arith.truncf %110 : vector<17x8xf32> to vector<17x8xbf16>
    %112 = vector.extract_strided_slice %52 {offsets = [0, 56], sizes = [17, 8], strides = [1, 1]} : vector<17x96xf32> to vector<17x8xf32>
    %113 = arith.truncf %112 : vector<17x8xf32> to vector<17x8xbf16>
    %114 = vector.extract_strided_slice %52 {offsets = [0, 88], sizes = [17, 8], strides = [1, 1]} : vector<17x96xf32> to vector<17x8xf32>
    %115 = arith.truncf %114 : vector<17x8xf32> to vector<17x8xbf16>
    %cst_41 = arith.constant dense<0.000000e+00> : vector<17x17xf32>
    %116 = tpu.matmul %111, %113, %cst_41 {dimension_numbers = #tpu.dot_dimension_numbers<[1], [1], [0], [0], [0, 0, 1, 0], [], []>} : vector<17x8xbf16>, vector<17x8xbf16>, vector<17x17xf32> -> vector<17x17xf32>
    %cst_42 = arith.constant dense<0xFF800000> : vector<17xf32>
    %117 = vector.multi_reduction <maximumf>, %116, %cst_42 [1] : vector<17x17xf32> to vector<17xf32>
    %118 = vector.shape_cast %117 : vector<17xf32> to vector<17x1xf32>
    %119 = vector.broadcast %118 : vector<17x1xf32> to vector<17x17xf32>
    %120 = arith.subf %116, %119 : vector<17x17xf32>
    %121 = math.exp %120 : vector<17x17xf32>
    %cst_43 = arith.constant dense<0.000000e+00> : vector<17xf32>
    %122 = vector.multi_reduction <add>, %121, %cst_43 [1] : vector<17x17xf32> to vector<17xf32>
    %123 = vector.shape_cast %122 : vector<17xf32> to vector<17x1xf32>
    %124 = tpu.reciprocal %123 {approx = true} : vector<17x1xf32> -> vector<17x1xf32>
    %125 = vector.broadcast %124 : vector<17x1xf32> to vector<17x17xf32>
    %126 = arith.mulf %121, %125 : vector<17x17xf32>
    %127 = arith.truncf %126 : vector<17x17xf32> to vector<17x17xbf16>
    %cst_44 = arith.constant dense<0.000000e+00> : vector<17x8xf32>
    %128 = tpu.matmul %127, %115, %cst_44 {dimension_numbers = #tpu.dot_dimension_numbers<[1], [0], [0], [1], [0, 0, 1, 1], [], []>} : vector<17x17xbf16>, vector<17x8xbf16>, vector<17x8xf32> -> vector<17x8xf32>
    %129 = tpu.concatenate %71, %90, %109, %128 in 1 : vector<17x8xf32>, vector<17x8xf32>, vector<17x8xf32>, vector<17x8xf32> -> vector<17x32xf32>
    %130 = arith.truncf %129 : vector<17x32xf32> to vector<17x32xbf16>
    %cst_45 = arith.constant dense<0.000000e+00> : vector<17x32xf32>
    %131 = tpu.matmul %130, %18, %cst_45 {dimension_numbers = #tpu.dot_dimension_numbers<[1], [0], [0], [1], [0, 0, 1, 1], [], []>} : vector<17x32xbf16>, vector<32x32xbf16>, vector<17x32xf32> -> vector<17x32xf32>
    %132 = vector.broadcast %7 : vector<1x32xf32> to vector<17x32xf32>
    %133 = arith.addf %131, %132 : vector<17x32xf32>
    %134 = vector.broadcast %8 : vector<1x32xf32> to vector<17x32xf32>
    %135 = arith.mulf %134, %133 : vector<17x32xf32>
    %136 = arith.addf %26, %135 : vector<17x32xf32>
    %cst_46 = arith.constant dense<0.000000e+00> : vector<17xf32>
    %137 = vector.multi_reduction <add>, %136, %cst_46 [1] : vector<17x32xf32> to vector<17xf32>
    %138 = vector.shape_cast %137 : vector<17xf32> to vector<17x1xf32>
    %cst_47 = arith.constant 3.200000e+01 : f32
    %139 = vector.broadcast %cst_47 : f32 to vector<17x1xf32>
    %140 = arith.divf %138, %139 : vector<17x1xf32>
    %141 = vector.broadcast %140 : vector<17x1xf32> to vector<17x32xf32>
    %142 = arith.subf %136, %141 : vector<17x32xf32>
    %143 = arith.mulf %142, %142 : vector<17x32xf32>
    %cst_48 = arith.constant dense<0.000000e+00> : vector<17xf32>
    %144 = vector.multi_reduction <add>, %143, %cst_48 [1] : vector<17x32xf32> to vector<17xf32>
    %145 = vector.shape_cast %144 : vector<17xf32> to vector<17x1xf32>
    %cst_49 = arith.constant 3.200000e+01 : f32
    %146 = vector.broadcast %cst_49 : f32 to vector<17x1xf32>
    %147 = arith.divf %145, %146 : vector<17x1xf32>
    %148 = vector.broadcast %140 : vector<17x1xf32> to vector<17x32xf32>
    %149 = arith.subf %136, %148 : vector<17x32xf32>
    %cst_50 = arith.constant 9.99999974E-6 : f32
    %150 = vector.broadcast %cst_50 : f32 to vector<17x1xf32>
    %151 = arith.addf %147, %150 : vector<17x1xf32>
    %152 = math.rsqrt %151 : vector<17x1xf32>
    %153 = vector.broadcast %152 : vector<17x1xf32> to vector<17x32xf32>
    %154 = arith.mulf %149, %153 : vector<17x32xf32>
    %155 = vector.broadcast %9 : vector<1x32xf32> to vector<17x32xf32>
    %156 = arith.mulf %154, %155 : vector<17x32xf32>
    %157 = vector.broadcast %10 : vector<1x32xf32> to vector<17x32xf32>
    %158 = arith.addf %156, %157 : vector<17x32xf32>
    %159 = arith.truncf %158 : vector<17x32xf32> to vector<17x32xbf16>
    %cst_51 = arith.constant dense<0.000000e+00> : vector<17x64xf32>
    %160 = tpu.matmul %159, %20, %cst_51 {dimension_numbers = #tpu.dot_dimension_numbers<[1], [0], [0], [1], [0, 0, 1, 1], [], []>} : vector<17x32xbf16>, vector<32x64xbf16>, vector<17x64xf32> -> vector<17x64xf32>
    %161 = vector.broadcast %22 : vector<1x64xf32> to vector<17x64xf32>
    %162 = arith.addf %160, %161 : vector<17x64xf32>
    %163 = arith.mulf %162, %162 : vector<17x64xf32>
    %164 = arith.mulf %162, %163 : vector<17x64xf32>
    %cst_52 = arith.constant 4.471500e-02 : f32
    %165 = vector.broadcast %cst_52 : f32 to vector<17x64xf32>
    %166 = arith.mulf %165, %164 : vector<17x64xf32>
    %167 = arith.addf %162, %166 : vector<17x64xf32>
    %cst_53 = arith.constant 0.797884583 : f32
    %168 = vector.broadcast %cst_53 : f32 to vector<17x64xf32>
    %169 = arith.mulf %168, %167 : vector<17x64xf32>
    %170 = math.tanh %169 : vector<17x64xf32>
    %cst_54 = arith.constant 1.000000e+00 : f32
    %171 = vector.broadcast %cst_54 : f32 to vector<17x64xf32>
    %172 = arith.addf %171, %170 : vector<17x64xf32>
    %cst_55 = arith.constant 5.000000e-01 : f32
    %173 = vector.broadcast %cst_55 : f32 to vector<17x64xf32>
    %174 = arith.mulf %173, %172 : vector<17x64xf32>
    %175 = arith.mulf %162, %174 : vector<17x64xf32>
    %176 = arith.truncf %175 : vector<17x64xf32> to vector<17x64xbf16>
    %cst_56 = arith.constant dense<0.000000e+00> : vector<17x32xf32>
    %177 = tpu.matmul %176, %24, %cst_56 {dimension_numbers = #tpu.dot_dimension_numbers<[1], [0], [0], [1], [0, 0, 1, 1], [], []>} : vector<17x64xbf16>, vector<64x32xbf16>, vector<17x32xf32> -> vector<17x32xf32>
    %178 = vector.broadcast %11 : vector<1x32xf32> to vector<17x32xf32>
    %179 = arith.addf %177, %178 : vector<17x32xf32>
    %180 = vector.broadcast %12 : vector<1x32xf32> to vector<17x32xf32>
    %181 = arith.mulf %180, %179 : vector<17x32xf32>
    %182 = arith.addf %136, %181 : vector<17x32xf32>
    %c0_57 = arith.constant 0 : index
    %c0_58 = arith.constant 0 : index
    %c0_59 = arith.constant 0 : index
    %183 = vector.load %arg11[%c0_57, %c0_58, %c0_59] : memref<2x17x32xf32, #tpu.memory_space<vmem>>, vector<1x17x32xf32>
    %184 = vector.shape_cast %183 : vector<1x17x32xf32> to vector<17x32xf32>
    %185 = vector.shape_cast %182 : vector<17x32xf32> to vector<1x17x32xf32>
    tpu.vector_store %arg11[%c0_57, %c0_58, %c0_59], %185 {strides = array<i32>} : memref<2x17x32xf32, #tpu.memory_space<vmem>>, vector<1x17x32xf32>,
    %c1 = arith.constant 1 : index
    %c0_60 = arith.constant 0 : index
    %c0_61 = arith.constant 0 : index
    %186 = vector.load %arg11[%c1, %c0_60, %c0_61] : memref<2x17x32xf32, #tpu.memory_space<vmem>>, vector<1x17x32xf32>
    %187 = vector.shape_cast %186 : vector<1x17x32xf32> to vector<17x32xf32>
    %cst_62 = arith.constant dense<0.000000e+00> : vector<17xf32>
    %188 = vector.multi_reduction <add>, %187, %cst_62 [1] : vector<17x32xf32> to vector<17xf32>
    %189 = vector.shape_cast %188 : vector<17xf32> to vector<17x1xf32>
    %cst_63 = arith.constant 3.200000e+01 : f32
    %190 = vector.broadcast %cst_63 : f32 to vector<17x1xf32>
    %191 = arith.divf %189, %190 : vector<17x1xf32>
    %192 = vector.broadcast %191 : vector<17x1xf32> to vector<17x32xf32>
    %193 = arith.subf %187, %192 : vector<17x32xf32>
    %194 = arith.mulf %193, %193 : vector<17x32xf32>
    %cst_64 = arith.constant dense<0.000000e+00> : vector<17xf32>
    %195 = vector.multi_reduction <add>, %194, %cst_64 [1] : vector<17x32xf32> to vector<17xf32>
    %196 = vector.shape_cast %195 : vector<17xf32> to vector<17x1xf32>
    %cst_65 = arith.constant 3.200000e+01 : f32
    %197 = vector.broadcast %cst_65 : f32 to vector<17x1xf32>
    %198 = arith.divf %196, %197 : vector<17x1xf32>
    %199 = vector.broadcast %191 : vector<17x1xf32> to vector<17x32xf32>
    %200 = arith.subf %187, %199 : vector<17x32xf32>
    %cst_66 = arith.constant 9.99999974E-6 : f32
    %201 = vector.broadcast %cst_66 : f32 to vector<17x1xf32>
    %202 = arith.addf %198, %201 : vector<17x1xf32>
    %203 = math.rsqrt %202 : vector<17x1xf32>
    %204 = vector.broadcast %203 : vector<17x1xf32> to vector<17x32xf32>
    %205 = arith.mulf %200, %204 : vector<17x32xf32>
    %206 = vector.broadcast %5 : vector<1x32xf32> to vector<17x32xf32>
    %207 = arith.mulf %205, %206 : vector<17x32xf32>
    %208 = vector.broadcast %6 : vector<1x32xf32> to vector<17x32xf32>
    %209 = arith.addf %207, %208 : vector<17x32xf32>
    %210 = arith.truncf %209 : vector<17x32xf32> to vector<17x32xbf16>
    %cst_67 = arith.constant dense<0.000000e+00> : vector<17x96xf32>
    %211 = tpu.matmul %210, %14, %cst_67 {dimension_numbers = #tpu.dot_dimension_numbers<[1], [0], [0], [1], [0, 0, 1, 1], [], []>} : vector<17x32xbf16>, vector<32x96xbf16>, vector<17x96xf32> -> vector<17x96xf32>
    %212 = vector.broadcast %16 : vector<1x96xf32> to vector<17x96xf32>
    %213 = arith.addf %211, %212 : vector<17x96xf32>
    %214 = vector.extract_strided_slice %213 {offsets = [0, 0], sizes = [17, 8], strides = [1, 1]} : vector<17x96xf32> to vector<17x8xf32>
    %215 = arith.truncf %214 : vector<17x8xf32> to vector<17x8xbf16>
    %216 = vector.extract_strided_slice %213 {offsets = [0, 32], sizes = [17, 8], strides = [1, 1]} : vector<17x96xf32> to vector<17x8xf32>
    %217 = arith.truncf %216 : vector<17x8xf32> to vector<17x8xbf16>
    %218 = vector.extract_strided_slice %213 {offsets = [0, 64], sizes = [17, 8], strides = [1, 1]} : vector<17x96xf32> to vector<17x8xf32>
    %219 = arith.truncf %218 : vector<17x8xf32> to vector<17x8xbf16>
    %cst_68 = arith.constant dense<0.000000e+00> : vector<17x17xf32>
    %220 = tpu.matmul %215, %217, %cst_68 {dimension_numbers = #tpu.dot_dimension_numbers<[1], [1], [0], [0], [0, 0, 1, 0], [], []>} : vector<17x8xbf16>, vector<17x8xbf16>, vector<17x17xf32> -> vector<17x17xf32>
    %cst_69 = arith.constant dense<0xFF800000> : vector<17xf32>
    %221 = vector.multi_reduction <maximumf>, %220, %cst_69 [1] : vector<17x17xf32> to vector<17xf32>
    %222 = vector.shape_cast %221 : vector<17xf32> to vector<17x1xf32>
    %223 = vector.broadcast %222 : vector<17x1xf32> to vector<17x17xf32>
    %224 = arith.subf %220, %223 : vector<17x17xf32>
    %225 = math.exp %224 : vector<17x17xf32>
    %cst_70 = arith.constant dense<0.000000e+00> : vector<17xf32>
    %226 = vector.multi_reduction <add>, %225, %cst_70 [1] : vector<17x17xf32> to vector<17xf32>
    %227 = vector.shape_cast %226 : vector<17xf32> to vector<17x1xf32>
    %228 = tpu.reciprocal %227 {approx = true} : vector<17x1xf32> -> vector<17x1xf32>
    %229 = vector.broadcast %228 : vector<17x1xf32> to vector<17x17xf32>
    %230 = arith.mulf %225, %229 : vector<17x17xf32>
    %231 = arith.truncf %230 : vector<17x17xf32> to vector<17x17xbf16>
    %cst_71 = arith.constant dense<0.000000e+00> : vector<17x8xf32>
    %232 = tpu.matmul %231, %219, %cst_71 {dimension_numbers = #tpu.dot_dimension_numbers<[1], [0], [0], [1], [0, 0, 1, 1], [], []>} : vector<17x17xbf16>, vector<17x8xbf16>, vector<17x8xf32> -> vector<17x8xf32>
    %233 = vector.extract_strided_slice %213 {offsets = [0, 8], sizes = [17, 8], strides = [1, 1]} : vector<17x96xf32> to vector<17x8xf32>
    %234 = arith.truncf %233 : vector<17x8xf32> to vector<17x8xbf16>
    %235 = vector.extract_strided_slice %213 {offsets = [0, 40], sizes = [17, 8], strides = [1, 1]} : vector<17x96xf32> to vector<17x8xf32>
    %236 = arith.truncf %235 : vector<17x8xf32> to vector<17x8xbf16>
    %237 = vector.extract_strided_slice %213 {offsets = [0, 72], sizes = [17, 8], strides = [1, 1]} : vector<17x96xf32> to vector<17x8xf32>
    %238 = arith.truncf %237 : vector<17x8xf32> to vector<17x8xbf16>
    %cst_72 = arith.constant dense<0.000000e+00> : vector<17x17xf32>
    %239 = tpu.matmul %234, %236, %cst_72 {dimension_numbers = #tpu.dot_dimension_numbers<[1], [1], [0], [0], [0, 0, 1, 0], [], []>} : vector<17x8xbf16>, vector<17x8xbf16>, vector<17x17xf32> -> vector<17x17xf32>
    %cst_73 = arith.constant dense<0xFF800000> : vector<17xf32>
    %240 = vector.multi_reduction <maximumf>, %239, %cst_73 [1] : vector<17x17xf32> to vector<17xf32>
    %241 = vector.shape_cast %240 : vector<17xf32> to vector<17x1xf32>
    %242 = vector.broadcast %241 : vector<17x1xf32> to vector<17x17xf32>
    %243 = arith.subf %239, %242 : vector<17x17xf32>
    %244 = math.exp %243 : vector<17x17xf32>
    %cst_74 = arith.constant dense<0.000000e+00> : vector<17xf32>
    %245 = vector.multi_reduction <add>, %244, %cst_74 [1] : vector<17x17xf32> to vector<17xf32>
    %246 = vector.shape_cast %245 : vector<17xf32> to vector<17x1xf32>
    %247 = tpu.reciprocal %246 {approx = true} : vector<17x1xf32> -> vector<17x1xf32>
    %248 = vector.broadcast %247 : vector<17x1xf32> to vector<17x17xf32>
    %249 = arith.mulf %244, %248 : vector<17x17xf32>
    %250 = arith.truncf %249 : vector<17x17xf32> to vector<17x17xbf16>
    %cst_75 = arith.constant dense<0.000000e+00> : vector<17x8xf32>
    %251 = tpu.matmul %250, %238, %cst_75 {dimension_numbers = #tpu.dot_dimension_numbers<[1], [0], [0], [1], [0, 0, 1, 1], [], []>} : vector<17x17xbf16>, vector<17x8xbf16>, vector<17x8xf32> -> vector<17x8xf32>
    %252 = vector.extract_strided_slice %213 {offsets = [0, 16], sizes = [17, 8], strides = [1, 1]} : vector<17x96xf32> to vector<17x8xf32>
    %253 = arith.truncf %252 : vector<17x8xf32> to vector<17x8xbf16>
    %254 = vector.extract_strided_slice %213 {offsets = [0, 48], sizes = [17, 8], strides = [1, 1]} : vector<17x96xf32> to vector<17x8xf32>
    %255 = arith.truncf %254 : vector<17x8xf32> to vector<17x8xbf16>
    %256 = vector.extract_strided_slice %213 {offsets = [0, 80], sizes = [17, 8], strides = [1, 1]} : vector<17x96xf32> to vector<17x8xf32>
    %257 = arith.truncf %256 : vector<17x8xf32> to vector<17x8xbf16>
    %cst_76 = arith.constant dense<0.000000e+00> : vector<17x17xf32>
    %258 = tpu.matmul %253, %255, %cst_76 {dimension_numbers = #tpu.dot_dimension_numbers<[1], [1], [0], [0], [0, 0, 1, 0], [], []>} : vector<17x8xbf16>, vector<17x8xbf16>, vector<17x17xf32> -> vector<17x17xf32>
    %cst_77 = arith.constant dense<0xFF800000> : vector<17xf32>
    %259 = vector.multi_reduction <maximumf>, %258, %cst_77 [1] : vector<17x17xf32> to vector<17xf32>
    %260 = vector.shape_cast %259 : vector<17xf32> to vector<17x1xf32>
    %261 = vector.broadcast %260 : vector<17x1xf32> to vector<17x17xf32>
    %262 = arith.subf %258, %261 : vector<17x17xf32>
    %263 = math.exp %262 : vector<17x17xf32>
    %cst_78 = arith.constant dense<0.000000e+00> : vector<17xf32>
    %264 = vector.multi_reduction <add>, %263, %cst_78 [1] : vector<17x17xf32> to vector<17xf32>
    %265 = vector.shape_cast %264 : vector<17xf32> to vector<17x1xf32>
    %266 = tpu.reciprocal %265 {approx = true} : vector<17x1xf32> -> vector<17x1xf32>
    %267 = vector.broadcast %266 : vector<17x1xf32> to vector<17x17xf32>
    %268 = arith.mulf %263, %267 : vector<17x17xf32>
    %269 = arith.truncf %268 : vector<17x17xf32> to vector<17x17xbf16>
    %cst_79 = arith.constant dense<0.000000e+00> : vector<17x8xf32>
    %270 = tpu.matmul %269, %257, %cst_79 {dimension_numbers = #tpu.dot_dimension_numbers<[1], [0], [0], [1], [0, 0, 1, 1], [], []>} : vector<17x17xbf16>, vector<17x8xbf16>, vector<17x8xf32> -> vector<17x8xf32>
    %271 = vector.extract_strided_slice %213 {offsets = [0, 24], sizes = [17, 8], strides = [1, 1]} : vector<17x96xf32> to vector<17x8xf32>
    %272 = arith.truncf %271 : vector<17x8xf32> to vector<17x8xbf16>
    %273 = vector.extract_strided_slice %213 {offsets = [0, 56], sizes = [17, 8], strides = [1, 1]} : vector<17x96xf32> to vector<17x8xf32>
    %274 = arith.truncf %273 : vector<17x8xf32> to vector<17x8xbf16>
    %275 = vector.extract_strided_slice %213 {offsets = [0, 88], sizes = [17, 8], strides = [1, 1]} : vector<17x96xf32> to vector<17x8xf32>
    %276 = arith.truncf %275 : vector<17x8xf32> to vector<17x8xbf16>
    %cst_80 = arith.constant dense<0.000000e+00> : vector<17x17xf32>
    %277 = tpu.matmul %272, %274, %cst_80 {dimension_numbers = #tpu.dot_dimension_numbers<[1], [1], [0], [0], [0, 0, 1, 0], [], []>} : vector<17x8xbf16>, vector<17x8xbf16>, vector<17x17xf32> -> vector<17x17xf32>
    %cst_81 = arith.constant dense<0xFF800000> : vector<17xf32>
    %278 = vector.multi_reduction <maximumf>, %277, %cst_81 [1] : vector<17x17xf32> to vector<17xf32>
    %279 = vector.shape_cast %278 : vector<17xf32> to vector<17x1xf32>
    %280 = vector.broadcast %279 : vector<17x1xf32> to vector<17x17xf32>
    %281 = arith.subf %277, %280 : vector<17x17xf32>
    %282 = math.exp %281 : vector<17x17xf32>
    %cst_82 = arith.constant dense<0.000000e+00> : vector<17xf32>
    %283 = vector.multi_reduction <add>, %282, %cst_82 [1] : vector<17x17xf32> to vector<17xf32>
    %284 = vector.shape_cast %283 : vector<17xf32> to vector<17x1xf32>
    %285 = tpu.reciprocal %284 {approx = true} : vector<17x1xf32> -> vector<17x1xf32>
    %286 = vector.broadcast %285 : vector<17x1xf32> to vector<17x17xf32>
    %287 = arith.mulf %282, %286 : vector<17x17xf32>
    %288 = arith.truncf %287 : vector<17x17xf32> to vector<17x17xbf16>
    %cst_83 = arith.constant dense<0.000000e+00> : vector<17x8xf32>
    %289 = tpu.matmul %288, %276, %cst_83 {dimension_numbers = #tpu.dot_dimension_numbers<[1], [0], [0], [1], [0, 0, 1, 1], [], []>} : vector<17x17xbf16>, vector<17x8xbf16>, vector<17x8xf32> -> vector<17x8xf32>
    %290 = tpu.concatenate %232, %251, %270, %289 in 1 : vector<17x8xf32>, vector<17x8xf32>, vector<17x8xf32>, vector<17x8xf32> -> vector<17x32xf32>
    %291 = arith.truncf %290 : vector<17x32xf32> to vector<17x32xbf16>
    %cst_84 = arith.constant dense<0.000000e+00> : vector<17x32xf32>
    %292 = tpu.matmul %291, %18, %cst_84 {dimension_numbers = #tpu.dot_dimension_numbers<[1], [0], [0], [1], [0, 0, 1, 1], [], []>} : vector<17x32xbf16>, vector<32x32xbf16>, vector<17x32xf32> -> vector<17x32xf32>
    %293 = vector.broadcast %7 : vector<1x32xf32> to vector<17x32xf32>
    %294 = arith.addf %292, %293 : vector<17x32xf32>
    %295 = vector.broadcast %8 : vector<1x32xf32> to vector<17x32xf32>
    %296 = arith.mulf %295, %294 : vector<17x32xf32>
    %297 = arith.addf %187, %296 : vector<17x32xf32>
    %cst_85 = arith.constant dense<0.000000e+00> : vector<17xf32>
    %298 = vector.multi_reduction <add>, %297, %cst_85 [1] : vector<17x32xf32> to vector<17xf32>
    %299 = vector.shape_cast %298 : vector<17xf32> to vector<17x1xf32>
    %cst_86 = arith.constant 3.200000e+01 : f32
    %300 = vector.broadcast %cst_86 : f32 to vector<17x1xf32>
    %301 = arith.divf %299, %300 : vector<17x1xf32>
    %302 = vector.broadcast %301 : vector<17x1xf32> to vector<17x32xf32>
    %303 = arith.subf %297, %302 : vector<17x32xf32>
    %304 = arith.mulf %303, %303 : vector<17x32xf32>
    %cst_87 = arith.constant dense<0.000000e+00> : vector<17xf32>
    %305 = vector.multi_reduction <add>, %304, %cst_87 [1] : vector<17x32xf32> to vector<17xf32>
    %306 = vector.shape_cast %305 : vector<17xf32> to vector<17x1xf32>
    %cst_88 = arith.constant 3.200000e+01 : f32
    %307 = vector.broadcast %cst_88 : f32 to vector<17x1xf32>
    %308 = arith.divf %306, %307 : vector<17x1xf32>
    %309 = vector.broadcast %301 : vector<17x1xf32> to vector<17x32xf32>
    %310 = arith.subf %297, %309 : vector<17x32xf32>
    %cst_89 = arith.constant 9.99999974E-6 : f32
    %311 = vector.broadcast %cst_89 : f32 to vector<17x1xf32>
    %312 = arith.addf %308, %311 : vector<17x1xf32>
    %313 = math.rsqrt %312 : vector<17x1xf32>
    %314 = vector.broadcast %313 : vector<17x1xf32> to vector<17x32xf32>
    %315 = arith.mulf %310, %314 : vector<17x32xf32>
    %316 = vector.broadcast %9 : vector<1x32xf32> to vector<17x32xf32>
    %317 = arith.mulf %315, %316 : vector<17x32xf32>
    %318 = vector.broadcast %10 : vector<1x32xf32> to vector<17x32xf32>
    %319 = arith.addf %317, %318 : vector<17x32xf32>
    %320 = arith.truncf %319 : vector<17x32xf32> to vector<17x32xbf16>
    %cst_90 = arith.constant dense<0.000000e+00> : vector<17x64xf32>
    %321 = tpu.matmul %320, %20, %cst_90 {dimension_numbers = #tpu.dot_dimension_numbers<[1], [0], [0], [1], [0, 0, 1, 1], [], []>} : vector<17x32xbf16>, vector<32x64xbf16>, vector<17x64xf32> -> vector<17x64xf32>
    %322 = vector.broadcast %22 : vector<1x64xf32> to vector<17x64xf32>
    %323 = arith.addf %321, %322 : vector<17x64xf32>
    %324 = arith.mulf %323, %323 : vector<17x64xf32>
    %325 = arith.mulf %323, %324 : vector<17x64xf32>
    %cst_91 = arith.constant 4.471500e-02 : f32
    %326 = vector.broadcast %cst_91 : f32 to vector<17x64xf32>
    %327 = arith.mulf %326, %325 : vector<17x64xf32>
    %328 = arith.addf %323, %327 : vector<17x64xf32>
    %cst_92 = arith.constant 0.797884583 : f32
    %329 = vector.broadcast %cst_92 : f32 to vector<17x64xf32>
    %330 = arith.mulf %329, %328 : vector<17x64xf32>
    %331 = math.tanh %330 : vector<17x64xf32>
    %cst_93 = arith.constant 1.000000e+00 : f32
    %332 = vector.broadcast %cst_93 : f32 to vector<17x64xf32>
    %333 = arith.addf %332, %331 : vector<17x64xf32>
    %cst_94 = arith.constant 5.000000e-01 : f32
    %334 = vector.broadcast %cst_94 : f32 to vector<17x64xf32>
    %335 = arith.mulf %334, %333 : vector<17x64xf32>
    %336 = arith.mulf %323, %335 : vector<17x64xf32>
    %337 = arith.truncf %336 : vector<17x64xf32> to vector<17x64xbf16>
    %cst_95 = arith.constant dense<0.000000e+00> : vector<17x32xf32>
    %338 = tpu.matmul %337, %24, %cst_95 {dimension_numbers = #tpu.dot_dimension_numbers<[1], [0], [0], [1], [0, 0, 1, 1], [], []>} : vector<17x64xbf16>, vector<64x32xbf16>, vector<17x32xf32> -> vector<17x32xf32>
    %339 = vector.broadcast %11 : vector<1x32xf32> to vector<17x32xf32>
    %340 = arith.addf %338, %339 : vector<17x32xf32>
    %341 = vector.broadcast %12 : vector<1x32xf32> to vector<17x32xf32>
    %342 = arith.mulf %341, %340 : vector<17x32xf32>
    %343 = arith.addf %297, %342 : vector<17x32xf32>
    %c1_96 = arith.constant 1 : index
    %c0_97 = arith.constant 0 : index
    %c0_98 = arith.constant 0 : index
    %344 = vector.load %arg11[%c1_96, %c0_97, %c0_98] : memref<2x17x32xf32, #tpu.memory_space<vmem>>, vector<1x17x32xf32>
    %345 = vector.shape_cast %344 : vector<1x17x32xf32> to vector<17x32xf32>
    %346 = vector.shape_cast %343 : vector<17x32xf32> to vector<1x17x32xf32>
    tpu.vector_store %arg11[%c1_96, %c0_97, %c0_98], %346 {strides = array<i32>} : memref<2x17x32xf32, #tpu.memory_space<vmem>>, vector<1x17x32xf32>,
    %c1_i32 = arith.constant 1 : i32
    %347 = arith.cmpi eq, %arg1, %c1_i32 : i32
    %348 = arith.extui %347 : i1 to i32
    %c0_i32_99 = arith.constant 0 : i32
    %349 = arith.cmpi ne, %348, %c0_i32_99 : i32
    scf.if %349 {
      %c0_100 = arith.constant 0 : index
      %c0_101 = arith.constant 0 : index
      %c0_102 = arith.constant 0 : index
      %350 = vector.load %arg11[%c0_100, %c0_101, %c0_102] : memref<2x17x32xf32, #tpu.memory_space<vmem>>, vector<2x17x32xf32>
      %351 = arith.truncf %350 : vector<2x17x32xf32> to vector<2x17x32xbf16>
      %c0_103 = arith.constant 0 : index
      %c0_104 = arith.constant 0 : index
      %c0_105 = arith.constant 0 : index
      %352 = vector.load %arg10[%c0_103, %c0_104, %c0_105] : memref<2x17x32xbf16, #tpu.memory_space<vmem>>, vector<2x17x32xbf16>
      tpu.vector_store %arg10[%c0_103, %c0_104, %c0_105], %351 {strides = array<i32>} : memref<2x17x32xbf16, #tpu.memory_space<vmem>>, vector<2x17x32xbf16>,
    } else {
    }
    return
  }
  func.func @transform_0(%arg0: i32, %arg1: i32) -> (i32, i32, i32) {
    %c0_i32 = arith.constant 0 : i32
    %c0_i32_0 = arith.constant 0 : i32
    %c0_i32_1 = arith.constant 0 : i32
    return %arg0, %c0_i32, %c0_i32_0 : i32, i32, i32
  }
  func.func @transform_1(%arg0: i32, %arg1: i32) -> (i32, i32, i32) {
    %c0_i32 = arith.constant 0 : i32
    %c0_i32_0 = arith.constant 0 : i32
    %c0_i32_1 = arith.constant 0 : i32
    return %arg1, %c0_i32, %c0_i32_0 : i32, i32, i32
  }
  func.func @transform_2(%arg0: i32, %arg1: i32) -> (i32, i32, i32) {
    %c0_i32 = arith.constant 0 : i32
    %c0_i32_0 = arith.constant 0 : i32
    %c0_i32_1 = arith.constant 0 : i32
    return %arg1, %c0_i32, %c0_i32_0 : i32, i32, i32
  }
  func.func @transform_3(%arg0: i32, %arg1: i32) -> (i32, i32, i32) {
    %c0_i32 = arith.constant 0 : i32
    %c0_i32_0 = arith.constant 0 : i32
    %c0_i32_1 = arith.constant 0 : i32
    return %arg1, %c0_i32, %c0_i32_0 : i32, i32, i32
  }
  func.func @transform_4(%arg0: i32, %arg1: i32) -> (i32, i32, i32) {
    %c0_i32 = arith.constant 0 : i32
    %c0_i32_0 = arith.constant 0 : i32
    %c0_i32_1 = arith.constant 0 : i32
    return %arg1, %c0_i32, %c0_i32_0 : i32, i32, i32
  }
  func.func @transform_5(%arg0: i32, %arg1: i32) -> (i32, i32, i32) {
    %c0_i32 = arith.constant 0 : i32
    %c0_i32_0 = arith.constant 0 : i32
    %c0_i32_1 = arith.constant 0 : i32
    return %arg1, %c0_i32, %c0_i32_0 : i32, i32, i32
  }
  func.func @transform_6(%arg0: i32, %arg1: i32) -> (i32, i32, i32) {
    %c0_i32 = arith.constant 0 : i32
    %c0_i32_0 = arith.constant 0 : i32
    %c0_i32_1 = arith.constant 0 : i32
    return %arg1, %c0_i32, %c0_i32_0 : i32, i32, i32
  }
  func.func @transform_7(%arg0: i32, %arg1: i32) -> (i32, i32, i32) {
    %c0_i32 = arith.constant 0 : i32
    %c0_i32_0 = arith.constant 0 : i32
    %c0_i32_1 = arith.constant 0 : i32
    return %arg1, %c0_i32, %c0_i32_0 : i32, i32, i32
  }
  func.func @transform_8(%arg0: i32, %arg1: i32) -> (i32, i32, i32) {
    %c0_i32 = arith.constant 0 : i32
    %c0_i32_0 = arith.constant 0 : i32
    %c0_i32_1 = arith.constant 0 : i32
    return %arg0, %c0_i32, %c0_i32_0 : i32, i32, i32
  }
}

module attributes {stable_mosaic.version = 11 : i64} {
  func.func @encoder_kernel(%arg0: i32, %arg1: i32, %arg2: memref<2x8x32xf32, #tpu.memory_space<vmem>>, %arg3: memref<1x8x32xf32, #tpu.memory_space<vmem>>, %arg4: memref<1x32x96xbf16, #tpu.memory_space<vmem>>, %arg5: memref<1x1x96xf32, #tpu.memory_space<vmem>>, %arg6: memref<1x32x32xbf16, #tpu.memory_space<vmem>>, %arg7: memref<1x32x64xbf16, #tpu.memory_space<vmem>>, %arg8: memref<1x1x64xf32, #tpu.memory_space<vmem>>, %arg9: memref<1x64x32xbf16, #tpu.memory_space<vmem>>, %arg10: memref<2x8x32xbf16, #tpu.memory_space<vmem>>, %arg11: memref<2x8x32xf32, #tpu.memory_space<vmem>>) attributes {dimension_semantics = [#tpu.dimension_semantics<parallel>, #tpu.dimension_semantics<arbitrary>], iteration_bounds = array<i64: 1, 1>, scalar_prefetch = 0 : i64, scratch_operands = 1 : i64, tpu.core_type = #tpu.core_type<tc>, window_params = [{transform_indices = @transform_0, window_bounds = array<i64: 2, 8, 32>}, {transform_indices = @transform_1, window_bounds = array<i64: 1, 8, 32>}, {transform_indices = @transform_2, window_bounds = array<i64: 1, 32, 96>}, {transform_indices = @transform_3, window_bounds = array<i64: 1, 1, 96>}, {transform_indices = @transform_4, window_bounds = array<i64: 1, 32, 32>}, {transform_indices = @transform_5, window_bounds = array<i64: 1, 32, 64>}, {transform_indices = @transform_6, window_bounds = array<i64: 1, 1, 64>}, {transform_indices = @transform_7, window_bounds = array<i64: 1, 64, 32>}, {transform_indices = @transform_8, window_bounds = array<i64: 2, 8, 32>}]} {
    %c0_i32 = arith.constant 0 : i32
    %0 = arith.cmpi eq, %arg1, %c0_i32 : i32
    %1 = arith.extui %0 : i1 to i32
    %c0_i32_0 = arith.constant 0 : i32
    %2 = arith.cmpi ne, %1, %c0_i32_0 : i32
    scf.if %2 {
      %c0_109 = arith.constant 0 : index
      %c0_110 = arith.constant 0 : index
      %c0_111 = arith.constant 0 : index
      %376 = vector.load %arg2[%c0_109, %c0_110, %c0_111] : memref<2x8x32xf32, #tpu.memory_space<vmem>>, vector<2x8x32xf32>
      %c0_112 = arith.constant 0 : index
      %c0_113 = arith.constant 0 : index
      %c0_114 = arith.constant 0 : index
      %377 = vector.load %arg11[%c0_112, %c0_113, %c0_114] : memref<2x8x32xf32, #tpu.memory_space<vmem>>, vector<2x8x32xf32>
      tpu.vector_store %arg11[%c0_112, %c0_113, %c0_114], %376 {strides = array<i32>} : memref<2x8x32xf32, #tpu.memory_space<vmem>>, vector<2x8x32xf32>,
    } else {
    }
    %c0 = arith.constant 0 : index
    %c0_1 = arith.constant 0 : index
    %c0_2 = arith.constant 0 : index
    %3 = vector.load %arg3[%c0, %c0_1, %c0_2] : memref<1x8x32xf32, #tpu.memory_space<vmem>>, vector<1x8x32xf32>
    %4 = vector.shape_cast %3 : vector<1x8x32xf32> to vector<8x32xf32>
    %5 = vector.extract_strided_slice %4 {offsets = [0, 0], sizes = [1, 32], strides = [1, 1]} : vector<8x32xf32> to vector<1x32xf32>
    %6 = vector.extract_strided_slice %4 {offsets = [1, 0], sizes = [1, 32], strides = [1, 1]} : vector<8x32xf32> to vector<1x32xf32>
    %7 = vector.extract_strided_slice %4 {offsets = [2, 0], sizes = [1, 32], strides = [1, 1]} : vector<8x32xf32> to vector<1x32xf32>
    %8 = vector.extract_strided_slice %4 {offsets = [3, 0], sizes = [1, 32], strides = [1, 1]} : vector<8x32xf32> to vector<1x32xf32>
    %9 = vector.extract_strided_slice %4 {offsets = [4, 0], sizes = [1, 32], strides = [1, 1]} : vector<8x32xf32> to vector<1x32xf32>
    %10 = vector.extract_strided_slice %4 {offsets = [5, 0], sizes = [1, 32], strides = [1, 1]} : vector<8x32xf32> to vector<1x32xf32>
    %11 = vector.extract_strided_slice %4 {offsets = [6, 0], sizes = [1, 32], strides = [1, 1]} : vector<8x32xf32> to vector<1x32xf32>
    %12 = vector.extract_strided_slice %4 {offsets = [7, 0], sizes = [1, 32], strides = [1, 1]} : vector<8x32xf32> to vector<1x32xf32>
    %c0_3 = arith.constant 0 : index
    %c0_4 = arith.constant 0 : index
    %c0_5 = arith.constant 0 : index
    %13 = vector.load %arg4[%c0_3, %c0_4, %c0_5] : memref<1x32x96xbf16, #tpu.memory_space<vmem>>, vector<1x32x96xbf16>
    %14 = vector.shape_cast %13 : vector<1x32x96xbf16> to vector<32x96xbf16>
    %c0_6 = arith.constant 0 : index
    %c0_7 = arith.constant 0 : index
    %c0_8 = arith.constant 0 : index
    %15 = vector.load %arg5[%c0_6, %c0_7, %c0_8] : memref<1x1x96xf32, #tpu.memory_space<vmem>>, vector<1x1x96xf32>
    %16 = vector.shape_cast %15 : vector<1x1x96xf32> to vector<1x96xf32>
    %c0_9 = arith.constant 0 : index
    %c0_10 = arith.constant 0 : index
    %c0_11 = arith.constant 0 : index
    %17 = vector.load %arg6[%c0_9, %c0_10, %c0_11] : memref<1x32x32xbf16, #tpu.memory_space<vmem>>, vector<1x32x32xbf16>
    %18 = vector.shape_cast %17 : vector<1x32x32xbf16> to vector<32x32xbf16>
    %c0_12 = arith.constant 0 : index
    %c0_13 = arith.constant 0 : index
    %c0_14 = arith.constant 0 : index
    %19 = vector.load %arg7[%c0_12, %c0_13, %c0_14] : memref<1x32x64xbf16, #tpu.memory_space<vmem>>, vector<1x32x64xbf16>
    %20 = vector.shape_cast %19 : vector<1x32x64xbf16> to vector<32x64xbf16>
    %c0_15 = arith.constant 0 : index
    %c0_16 = arith.constant 0 : index
    %c0_17 = arith.constant 0 : index
    %21 = vector.load %arg8[%c0_15, %c0_16, %c0_17] : memref<1x1x64xf32, #tpu.memory_space<vmem>>, vector<1x1x64xf32>
    %22 = vector.shape_cast %21 : vector<1x1x64xf32> to vector<1x64xf32>
    %c0_18 = arith.constant 0 : index
    %c0_19 = arith.constant 0 : index
    %c0_20 = arith.constant 0 : index
    %23 = vector.load %arg9[%c0_18, %c0_19, %c0_20] : memref<1x64x32xbf16, #tpu.memory_space<vmem>>, vector<1x64x32xbf16>
    %24 = vector.shape_cast %23 : vector<1x64x32xbf16> to vector<64x32xbf16>
    %25 = tpu.iota {dimensions = array<i32: 0>} : vector<8x8xi32>
    %26 = tpu.iota {dimensions = array<i32: 1>} : vector<8x8xi32>
    %c0_21 = arith.constant 0 : index
    %c0_22 = arith.constant 0 : index
    %c0_23 = arith.constant 0 : index
    %27 = vector.load %arg11[%c0_21, %c0_22, %c0_23] : memref<2x8x32xf32, #tpu.memory_space<vmem>>, vector<1x8x32xf32>
    %28 = vector.shape_cast %27 : vector<1x8x32xf32> to vector<8x32xf32>
    %cst = arith.constant dense<0.000000e+00> : vector<8xf32>
    %29 = vector.multi_reduction <add>, %28, %cst [1] : vector<8x32xf32> to vector<8xf32>
    %30 = vector.shape_cast %29 : vector<8xf32> to vector<8x1xf32>
    %cst_24 = arith.constant 3.200000e+01 : f32
    %31 = vector.broadcast %cst_24 : f32 to vector<8x1xf32>
    %32 = arith.divf %30, %31 : vector<8x1xf32>
    %33 = vector.broadcast %32 : vector<8x1xf32> to vector<8x32xf32>
    %34 = arith.subf %28, %33 : vector<8x32xf32>
    %35 = arith.mulf %34, %34 : vector<8x32xf32>
    %cst_25 = arith.constant dense<0.000000e+00> : vector<8xf32>
    %36 = vector.multi_reduction <add>, %35, %cst_25 [1] : vector<8x32xf32> to vector<8xf32>
    %37 = vector.shape_cast %36 : vector<8xf32> to vector<8x1xf32>
    %cst_26 = arith.constant 3.200000e+01 : f32
    %38 = vector.broadcast %cst_26 : f32 to vector<8x1xf32>
    %39 = arith.divf %37, %38 : vector<8x1xf32>
    %40 = vector.broadcast %32 : vector<8x1xf32> to vector<8x32xf32>
    %41 = arith.subf %28, %40 : vector<8x32xf32>
    %cst_27 = arith.constant 9.99999974E-6 : f32
    %42 = vector.broadcast %cst_27 : f32 to vector<8x1xf32>
    %43 = arith.addf %39, %42 : vector<8x1xf32>
    %44 = math.rsqrt %43 : vector<8x1xf32>
    %45 = vector.broadcast %44 : vector<8x1xf32> to vector<8x32xf32>
    %46 = arith.mulf %41, %45 : vector<8x32xf32>
    %47 = vector.broadcast %5 : vector<1x32xf32> to vector<8x32xf32>
    %48 = arith.mulf %46, %47 : vector<8x32xf32>
    %49 = vector.broadcast %6 : vector<1x32xf32> to vector<8x32xf32>
    %50 = arith.addf %48, %49 : vector<8x32xf32>
    %51 = arith.truncf %50 : vector<8x32xf32> to vector<8x32xbf16>
    %cst_28 = arith.constant dense<0.000000e+00> : vector<8x96xf32>
    %52 = tpu.matmul %51, %14, %cst_28 {dimension_numbers = #tpu.dot_dimension_numbers<[1], [0], [0], [1], [0, 0, 1, 1], [], []>} : vector<8x32xbf16>, vector<32x96xbf16>, vector<8x96xf32> -> vector<8x96xf32>
    %53 = vector.broadcast %16 : vector<1x96xf32> to vector<8x96xf32>
    %54 = arith.addf %52, %53 : vector<8x96xf32>
    %55 = vector.extract_strided_slice %54 {offsets = [0, 0], sizes = [8, 8], strides = [1, 1]} : vector<8x96xf32> to vector<8x8xf32>
    %56 = arith.truncf %55 : vector<8x8xf32> to vector<8x8xbf16>
    %57 = vector.extract_strided_slice %54 {offsets = [0, 32], sizes = [8, 8], strides = [1, 1]} : vector<8x96xf32> to vector<8x8xf32>
    %58 = arith.truncf %57 : vector<8x8xf32> to vector<8x8xbf16>
    %59 = vector.extract_strided_slice %54 {offsets = [0, 64], sizes = [8, 8], strides = [1, 1]} : vector<8x96xf32> to vector<8x8xf32>
    %60 = arith.truncf %59 : vector<8x8xf32> to vector<8x8xbf16>
    %cst_29 = arith.constant dense<0.000000e+00> : vector<8x8xf32>
    %61 = tpu.matmul %56, %58, %cst_29 {dimension_numbers = #tpu.dot_dimension_numbers<[1], [1], [0], [0], [0, 0, 1, 0], [], []>} : vector<8x8xbf16>, vector<8x8xbf16>, vector<8x8xf32> -> vector<8x8xf32>
    %62 = arith.cmpi sgt, %26, %25 : vector<8x8xi32>
    %cst_30 = arith.constant -1.000000e+30 : f32
    %63 = vector.broadcast %cst_30 : f32 to vector<8x8xf32>
    %64 = arith.select %62, %63, %61 : vector<8x8xi1>, vector<8x8xf32>
    %cst_31 = arith.constant dense<0xFF800000> : vector<8xf32>
    %65 = vector.multi_reduction <maximumf>, %64, %cst_31 [1] : vector<8x8xf32> to vector<8xf32>
    %66 = vector.shape_cast %65 : vector<8xf32> to vector<8x1xf32>
    %67 = vector.broadcast %66 : vector<8x1xf32> to vector<8x8xf32>
    %68 = arith.subf %64, %67 : vector<8x8xf32>
    %69 = math.exp %68 : vector<8x8xf32>
    %cst_32 = arith.constant dense<0.000000e+00> : vector<8xf32>
    %70 = vector.multi_reduction <add>, %69, %cst_32 [1] : vector<8x8xf32> to vector<8xf32>
    %71 = vector.shape_cast %70 : vector<8xf32> to vector<8x1xf32>
    %72 = tpu.reciprocal %71 {approx = true} : vector<8x1xf32> -> vector<8x1xf32>
    %73 = vector.broadcast %72 : vector<8x1xf32> to vector<8x8xf32>
    %74 = arith.mulf %69, %73 : vector<8x8xf32>
    %75 = arith.truncf %74 : vector<8x8xf32> to vector<8x8xbf16>
    %cst_33 = arith.constant dense<0.000000e+00> : vector<8x8xf32>
    %76 = tpu.matmul %75, %60, %cst_33 {dimension_numbers = #tpu.dot_dimension_numbers<[1], [0], [0], [1], [0, 0, 1, 1], [], []>} : vector<8x8xbf16>, vector<8x8xbf16>, vector<8x8xf32> -> vector<8x8xf32>
    %77 = vector.extract_strided_slice %54 {offsets = [0, 8], sizes = [8, 8], strides = [1, 1]} : vector<8x96xf32> to vector<8x8xf32>
    %78 = arith.truncf %77 : vector<8x8xf32> to vector<8x8xbf16>
    %79 = vector.extract_strided_slice %54 {offsets = [0, 40], sizes = [8, 8], strides = [1, 1]} : vector<8x96xf32> to vector<8x8xf32>
    %80 = arith.truncf %79 : vector<8x8xf32> to vector<8x8xbf16>
    %81 = vector.extract_strided_slice %54 {offsets = [0, 72], sizes = [8, 8], strides = [1, 1]} : vector<8x96xf32> to vector<8x8xf32>
    %82 = arith.truncf %81 : vector<8x8xf32> to vector<8x8xbf16>
    %cst_34 = arith.constant dense<0.000000e+00> : vector<8x8xf32>
    %83 = tpu.matmul %78, %80, %cst_34 {dimension_numbers = #tpu.dot_dimension_numbers<[1], [1], [0], [0], [0, 0, 1, 0], [], []>} : vector<8x8xbf16>, vector<8x8xbf16>, vector<8x8xf32> -> vector<8x8xf32>
    %84 = arith.cmpi sgt, %26, %25 : vector<8x8xi32>
    %cst_35 = arith.constant -1.000000e+30 : f32
    %85 = vector.broadcast %cst_35 : f32 to vector<8x8xf32>
    %86 = arith.select %84, %85, %83 : vector<8x8xi1>, vector<8x8xf32>
    %cst_36 = arith.constant dense<0xFF800000> : vector<8xf32>
    %87 = vector.multi_reduction <maximumf>, %86, %cst_36 [1] : vector<8x8xf32> to vector<8xf32>
    %88 = vector.shape_cast %87 : vector<8xf32> to vector<8x1xf32>
    %89 = vector.broadcast %88 : vector<8x1xf32> to vector<8x8xf32>
    %90 = arith.subf %86, %89 : vector<8x8xf32>
    %91 = math.exp %90 : vector<8x8xf32>
    %cst_37 = arith.constant dense<0.000000e+00> : vector<8xf32>
    %92 = vector.multi_reduction <add>, %91, %cst_37 [1] : vector<8x8xf32> to vector<8xf32>
    %93 = vector.shape_cast %92 : vector<8xf32> to vector<8x1xf32>
    %94 = tpu.reciprocal %93 {approx = true} : vector<8x1xf32> -> vector<8x1xf32>
    %95 = vector.broadcast %94 : vector<8x1xf32> to vector<8x8xf32>
    %96 = arith.mulf %91, %95 : vector<8x8xf32>
    %97 = arith.truncf %96 : vector<8x8xf32> to vector<8x8xbf16>
    %cst_38 = arith.constant dense<0.000000e+00> : vector<8x8xf32>
    %98 = tpu.matmul %97, %82, %cst_38 {dimension_numbers = #tpu.dot_dimension_numbers<[1], [0], [0], [1], [0, 0, 1, 1], [], []>} : vector<8x8xbf16>, vector<8x8xbf16>, vector<8x8xf32> -> vector<8x8xf32>
    %99 = vector.extract_strided_slice %54 {offsets = [0, 16], sizes = [8, 8], strides = [1, 1]} : vector<8x96xf32> to vector<8x8xf32>
    %100 = arith.truncf %99 : vector<8x8xf32> to vector<8x8xbf16>
    %101 = vector.extract_strided_slice %54 {offsets = [0, 48], sizes = [8, 8], strides = [1, 1]} : vector<8x96xf32> to vector<8x8xf32>
    %102 = arith.truncf %101 : vector<8x8xf32> to vector<8x8xbf16>
    %103 = vector.extract_strided_slice %54 {offsets = [0, 80], sizes = [8, 8], strides = [1, 1]} : vector<8x96xf32> to vector<8x8xf32>
    %104 = arith.truncf %103 : vector<8x8xf32> to vector<8x8xbf16>
    %cst_39 = arith.constant dense<0.000000e+00> : vector<8x8xf32>
    %105 = tpu.matmul %100, %102, %cst_39 {dimension_numbers = #tpu.dot_dimension_numbers<[1], [1], [0], [0], [0, 0, 1, 0], [], []>} : vector<8x8xbf16>, vector<8x8xbf16>, vector<8x8xf32> -> vector<8x8xf32>
    %106 = arith.cmpi sgt, %26, %25 : vector<8x8xi32>
    %cst_40 = arith.constant -1.000000e+30 : f32
    %107 = vector.broadcast %cst_40 : f32 to vector<8x8xf32>
    %108 = arith.select %106, %107, %105 : vector<8x8xi1>, vector<8x8xf32>
    %cst_41 = arith.constant dense<0xFF800000> : vector<8xf32>
    %109 = vector.multi_reduction <maximumf>, %108, %cst_41 [1] : vector<8x8xf32> to vector<8xf32>
    %110 = vector.shape_cast %109 : vector<8xf32> to vector<8x1xf32>
    %111 = vector.broadcast %110 : vector<8x1xf32> to vector<8x8xf32>
    %112 = arith.subf %108, %111 : vector<8x8xf32>
    %113 = math.exp %112 : vector<8x8xf32>
    %cst_42 = arith.constant dense<0.000000e+00> : vector<8xf32>
    %114 = vector.multi_reduction <add>, %113, %cst_42 [1] : vector<8x8xf32> to vector<8xf32>
    %115 = vector.shape_cast %114 : vector<8xf32> to vector<8x1xf32>
    %116 = tpu.reciprocal %115 {approx = true} : vector<8x1xf32> -> vector<8x1xf32>
    %117 = vector.broadcast %116 : vector<8x1xf32> to vector<8x8xf32>
    %118 = arith.mulf %113, %117 : vector<8x8xf32>
    %119 = arith.truncf %118 : vector<8x8xf32> to vector<8x8xbf16>
    %cst_43 = arith.constant dense<0.000000e+00> : vector<8x8xf32>
    %120 = tpu.matmul %119, %104, %cst_43 {dimension_numbers = #tpu.dot_dimension_numbers<[1], [0], [0], [1], [0, 0, 1, 1], [], []>} : vector<8x8xbf16>, vector<8x8xbf16>, vector<8x8xf32> -> vector<8x8xf32>
    %121 = vector.extract_strided_slice %54 {offsets = [0, 24], sizes = [8, 8], strides = [1, 1]} : vector<8x96xf32> to vector<8x8xf32>
    %122 = arith.truncf %121 : vector<8x8xf32> to vector<8x8xbf16>
    %123 = vector.extract_strided_slice %54 {offsets = [0, 56], sizes = [8, 8], strides = [1, 1]} : vector<8x96xf32> to vector<8x8xf32>
    %124 = arith.truncf %123 : vector<8x8xf32> to vector<8x8xbf16>
    %125 = vector.extract_strided_slice %54 {offsets = [0, 88], sizes = [8, 8], strides = [1, 1]} : vector<8x96xf32> to vector<8x8xf32>
    %126 = arith.truncf %125 : vector<8x8xf32> to vector<8x8xbf16>
    %cst_44 = arith.constant dense<0.000000e+00> : vector<8x8xf32>
    %127 = tpu.matmul %122, %124, %cst_44 {dimension_numbers = #tpu.dot_dimension_numbers<[1], [1], [0], [0], [0, 0, 1, 0], [], []>} : vector<8x8xbf16>, vector<8x8xbf16>, vector<8x8xf32> -> vector<8x8xf32>
    %128 = arith.cmpi sgt, %26, %25 : vector<8x8xi32>
    %cst_45 = arith.constant -1.000000e+30 : f32
    %129 = vector.broadcast %cst_45 : f32 to vector<8x8xf32>
    %130 = arith.select %128, %129, %127 : vector<8x8xi1>, vector<8x8xf32>
    %cst_46 = arith.constant dense<0xFF800000> : vector<8xf32>
    %131 = vector.multi_reduction <maximumf>, %130, %cst_46 [1] : vector<8x8xf32> to vector<8xf32>
    %132 = vector.shape_cast %131 : vector<8xf32> to vector<8x1xf32>
    %133 = vector.broadcast %132 : vector<8x1xf32> to vector<8x8xf32>
    %134 = arith.subf %130, %133 : vector<8x8xf32>
    %135 = math.exp %134 : vector<8x8xf32>
    %cst_47 = arith.constant dense<0.000000e+00> : vector<8xf32>
    %136 = vector.multi_reduction <add>, %135, %cst_47 [1] : vector<8x8xf32> to vector<8xf32>
    %137 = vector.shape_cast %136 : vector<8xf32> to vector<8x1xf32>
    %138 = tpu.reciprocal %137 {approx = true} : vector<8x1xf32> -> vector<8x1xf32>
    %139 = vector.broadcast %138 : vector<8x1xf32> to vector<8x8xf32>
    %140 = arith.mulf %135, %139 : vector<8x8xf32>
    %141 = arith.truncf %140 : vector<8x8xf32> to vector<8x8xbf16>
    %cst_48 = arith.constant dense<0.000000e+00> : vector<8x8xf32>
    %142 = tpu.matmul %141, %126, %cst_48 {dimension_numbers = #tpu.dot_dimension_numbers<[1], [0], [0], [1], [0, 0, 1, 1], [], []>} : vector<8x8xbf16>, vector<8x8xbf16>, vector<8x8xf32> -> vector<8x8xf32>
    %143 = tpu.concatenate %76, %98, %120, %142 in 1 : vector<8x8xf32>, vector<8x8xf32>, vector<8x8xf32>, vector<8x8xf32> -> vector<8x32xf32>
    %144 = arith.truncf %143 : vector<8x32xf32> to vector<8x32xbf16>
    %cst_49 = arith.constant dense<0.000000e+00> : vector<8x32xf32>
    %145 = tpu.matmul %144, %18, %cst_49 {dimension_numbers = #tpu.dot_dimension_numbers<[1], [0], [0], [1], [0, 0, 1, 1], [], []>} : vector<8x32xbf16>, vector<32x32xbf16>, vector<8x32xf32> -> vector<8x32xf32>
    %146 = vector.broadcast %7 : vector<1x32xf32> to vector<8x32xf32>
    %147 = arith.addf %145, %146 : vector<8x32xf32>
    %148 = vector.broadcast %8 : vector<1x32xf32> to vector<8x32xf32>
    %149 = arith.mulf %148, %147 : vector<8x32xf32>
    %150 = arith.addf %28, %149 : vector<8x32xf32>
    %cst_50 = arith.constant dense<0.000000e+00> : vector<8xf32>
    %151 = vector.multi_reduction <add>, %150, %cst_50 [1] : vector<8x32xf32> to vector<8xf32>
    %152 = vector.shape_cast %151 : vector<8xf32> to vector<8x1xf32>
    %cst_51 = arith.constant 3.200000e+01 : f32
    %153 = vector.broadcast %cst_51 : f32 to vector<8x1xf32>
    %154 = arith.divf %152, %153 : vector<8x1xf32>
    %155 = vector.broadcast %154 : vector<8x1xf32> to vector<8x32xf32>
    %156 = arith.subf %150, %155 : vector<8x32xf32>
    %157 = arith.mulf %156, %156 : vector<8x32xf32>
    %cst_52 = arith.constant dense<0.000000e+00> : vector<8xf32>
    %158 = vector.multi_reduction <add>, %157, %cst_52 [1] : vector<8x32xf32> to vector<8xf32>
    %159 = vector.shape_cast %158 : vector<8xf32> to vector<8x1xf32>
    %cst_53 = arith.constant 3.200000e+01 : f32
    %160 = vector.broadcast %cst_53 : f32 to vector<8x1xf32>
    %161 = arith.divf %159, %160 : vector<8x1xf32>
    %162 = vector.broadcast %154 : vector<8x1xf32> to vector<8x32xf32>
    %163 = arith.subf %150, %162 : vector<8x32xf32>
    %cst_54 = arith.constant 9.99999974E-6 : f32
    %164 = vector.broadcast %cst_54 : f32 to vector<8x1xf32>
    %165 = arith.addf %161, %164 : vector<8x1xf32>
    %166 = math.rsqrt %165 : vector<8x1xf32>
    %167 = vector.broadcast %166 : vector<8x1xf32> to vector<8x32xf32>
    %168 = arith.mulf %163, %167 : vector<8x32xf32>
    %169 = vector.broadcast %9 : vector<1x32xf32> to vector<8x32xf32>
    %170 = arith.mulf %168, %169 : vector<8x32xf32>
    %171 = vector.broadcast %10 : vector<1x32xf32> to vector<8x32xf32>
    %172 = arith.addf %170, %171 : vector<8x32xf32>
    %173 = arith.truncf %172 : vector<8x32xf32> to vector<8x32xbf16>
    %cst_55 = arith.constant dense<0.000000e+00> : vector<8x64xf32>
    %174 = tpu.matmul %173, %20, %cst_55 {dimension_numbers = #tpu.dot_dimension_numbers<[1], [0], [0], [1], [0, 0, 1, 1], [], []>} : vector<8x32xbf16>, vector<32x64xbf16>, vector<8x64xf32> -> vector<8x64xf32>
    %175 = vector.broadcast %22 : vector<1x64xf32> to vector<8x64xf32>
    %176 = arith.addf %174, %175 : vector<8x64xf32>
    %177 = arith.mulf %176, %176 : vector<8x64xf32>
    %178 = arith.mulf %176, %177 : vector<8x64xf32>
    %cst_56 = arith.constant 4.471500e-02 : f32
    %179 = vector.broadcast %cst_56 : f32 to vector<8x64xf32>
    %180 = arith.mulf %179, %178 : vector<8x64xf32>
    %181 = arith.addf %176, %180 : vector<8x64xf32>
    %cst_57 = arith.constant 0.797884583 : f32
    %182 = vector.broadcast %cst_57 : f32 to vector<8x64xf32>
    %183 = arith.mulf %182, %181 : vector<8x64xf32>
    %184 = math.tanh %183 : vector<8x64xf32>
    %cst_58 = arith.constant 1.000000e+00 : f32
    %185 = vector.broadcast %cst_58 : f32 to vector<8x64xf32>
    %186 = arith.addf %185, %184 : vector<8x64xf32>
    %cst_59 = arith.constant 5.000000e-01 : f32
    %187 = vector.broadcast %cst_59 : f32 to vector<8x64xf32>
    %188 = arith.mulf %187, %186 : vector<8x64xf32>
    %189 = arith.mulf %176, %188 : vector<8x64xf32>
    %190 = arith.truncf %189 : vector<8x64xf32> to vector<8x64xbf16>
    %cst_60 = arith.constant dense<0.000000e+00> : vector<8x32xf32>
    %191 = tpu.matmul %190, %24, %cst_60 {dimension_numbers = #tpu.dot_dimension_numbers<[1], [0], [0], [1], [0, 0, 1, 1], [], []>} : vector<8x64xbf16>, vector<64x32xbf16>, vector<8x32xf32> -> vector<8x32xf32>
    %192 = vector.broadcast %11 : vector<1x32xf32> to vector<8x32xf32>
    %193 = arith.addf %191, %192 : vector<8x32xf32>
    %194 = vector.broadcast %12 : vector<1x32xf32> to vector<8x32xf32>
    %195 = arith.mulf %194, %193 : vector<8x32xf32>
    %196 = arith.addf %150, %195 : vector<8x32xf32>
    %c0_61 = arith.constant 0 : index
    %c0_62 = arith.constant 0 : index
    %c0_63 = arith.constant 0 : index
    %197 = vector.load %arg11[%c0_61, %c0_62, %c0_63] : memref<2x8x32xf32, #tpu.memory_space<vmem>>, vector<1x8x32xf32>
    %198 = vector.shape_cast %197 : vector<1x8x32xf32> to vector<8x32xf32>
    %199 = vector.shape_cast %196 : vector<8x32xf32> to vector<1x8x32xf32>
    tpu.vector_store %arg11[%c0_61, %c0_62, %c0_63], %199 {strides = array<i32>} : memref<2x8x32xf32, #tpu.memory_space<vmem>>, vector<1x8x32xf32>,
    %c1 = arith.constant 1 : index
    %c0_64 = arith.constant 0 : index
    %c0_65 = arith.constant 0 : index
    %200 = vector.load %arg11[%c1, %c0_64, %c0_65] : memref<2x8x32xf32, #tpu.memory_space<vmem>>, vector<1x8x32xf32>
    %201 = vector.shape_cast %200 : vector<1x8x32xf32> to vector<8x32xf32>
    %cst_66 = arith.constant dense<0.000000e+00> : vector<8xf32>
    %202 = vector.multi_reduction <add>, %201, %cst_66 [1] : vector<8x32xf32> to vector<8xf32>
    %203 = vector.shape_cast %202 : vector<8xf32> to vector<8x1xf32>
    %cst_67 = arith.constant 3.200000e+01 : f32
    %204 = vector.broadcast %cst_67 : f32 to vector<8x1xf32>
    %205 = arith.divf %203, %204 : vector<8x1xf32>
    %206 = vector.broadcast %205 : vector<8x1xf32> to vector<8x32xf32>
    %207 = arith.subf %201, %206 : vector<8x32xf32>
    %208 = arith.mulf %207, %207 : vector<8x32xf32>
    %cst_68 = arith.constant dense<0.000000e+00> : vector<8xf32>
    %209 = vector.multi_reduction <add>, %208, %cst_68 [1] : vector<8x32xf32> to vector<8xf32>
    %210 = vector.shape_cast %209 : vector<8xf32> to vector<8x1xf32>
    %cst_69 = arith.constant 3.200000e+01 : f32
    %211 = vector.broadcast %cst_69 : f32 to vector<8x1xf32>
    %212 = arith.divf %210, %211 : vector<8x1xf32>
    %213 = vector.broadcast %205 : vector<8x1xf32> to vector<8x32xf32>
    %214 = arith.subf %201, %213 : vector<8x32xf32>
    %cst_70 = arith.constant 9.99999974E-6 : f32
    %215 = vector.broadcast %cst_70 : f32 to vector<8x1xf32>
    %216 = arith.addf %212, %215 : vector<8x1xf32>
    %217 = math.rsqrt %216 : vector<8x1xf32>
    %218 = vector.broadcast %217 : vector<8x1xf32> to vector<8x32xf32>
    %219 = arith.mulf %214, %218 : vector<8x32xf32>
    %220 = vector.broadcast %5 : vector<1x32xf32> to vector<8x32xf32>
    %221 = arith.mulf %219, %220 : vector<8x32xf32>
    %222 = vector.broadcast %6 : vector<1x32xf32> to vector<8x32xf32>
    %223 = arith.addf %221, %222 : vector<8x32xf32>
    %224 = arith.truncf %223 : vector<8x32xf32> to vector<8x32xbf16>
    %cst_71 = arith.constant dense<0.000000e+00> : vector<8x96xf32>
    %225 = tpu.matmul %224, %14, %cst_71 {dimension_numbers = #tpu.dot_dimension_numbers<[1], [0], [0], [1], [0, 0, 1, 1], [], []>} : vector<8x32xbf16>, vector<32x96xbf16>, vector<8x96xf32> -> vector<8x96xf32>
    %226 = vector.broadcast %16 : vector<1x96xf32> to vector<8x96xf32>
    %227 = arith.addf %225, %226 : vector<8x96xf32>
    %228 = vector.extract_strided_slice %227 {offsets = [0, 0], sizes = [8, 8], strides = [1, 1]} : vector<8x96xf32> to vector<8x8xf32>
    %229 = arith.truncf %228 : vector<8x8xf32> to vector<8x8xbf16>
    %230 = vector.extract_strided_slice %227 {offsets = [0, 32], sizes = [8, 8], strides = [1, 1]} : vector<8x96xf32> to vector<8x8xf32>
    %231 = arith.truncf %230 : vector<8x8xf32> to vector<8x8xbf16>
    %232 = vector.extract_strided_slice %227 {offsets = [0, 64], sizes = [8, 8], strides = [1, 1]} : vector<8x96xf32> to vector<8x8xf32>
    %233 = arith.truncf %232 : vector<8x8xf32> to vector<8x8xbf16>
    %cst_72 = arith.constant dense<0.000000e+00> : vector<8x8xf32>
    %234 = tpu.matmul %229, %231, %cst_72 {dimension_numbers = #tpu.dot_dimension_numbers<[1], [1], [0], [0], [0, 0, 1, 0], [], []>} : vector<8x8xbf16>, vector<8x8xbf16>, vector<8x8xf32> -> vector<8x8xf32>
    %235 = arith.cmpi sgt, %26, %25 : vector<8x8xi32>
    %cst_73 = arith.constant -1.000000e+30 : f32
    %236 = vector.broadcast %cst_73 : f32 to vector<8x8xf32>
    %237 = arith.select %235, %236, %234 : vector<8x8xi1>, vector<8x8xf32>
    %cst_74 = arith.constant dense<0xFF800000> : vector<8xf32>
    %238 = vector.multi_reduction <maximumf>, %237, %cst_74 [1] : vector<8x8xf32> to vector<8xf32>
    %239 = vector.shape_cast %238 : vector<8xf32> to vector<8x1xf32>
    %240 = vector.broadcast %239 : vector<8x1xf32> to vector<8x8xf32>
    %241 = arith.subf %237, %240 : vector<8x8xf32>
    %242 = math.exp %241 : vector<8x8xf32>
    %cst_75 = arith.constant dense<0.000000e+00> : vector<8xf32>
    %243 = vector.multi_reduction <add>, %242, %cst_75 [1] : vector<8x8xf32> to vector<8xf32>
    %244 = vector.shape_cast %243 : vector<8xf32> to vector<8x1xf32>
    %245 = tpu.reciprocal %244 {approx = true} : vector<8x1xf32> -> vector<8x1xf32>
    %246 = vector.broadcast %245 : vector<8x1xf32> to vector<8x8xf32>
    %247 = arith.mulf %242, %246 : vector<8x8xf32>
    %248 = arith.truncf %247 : vector<8x8xf32> to vector<8x8xbf16>
    %cst_76 = arith.constant dense<0.000000e+00> : vector<8x8xf32>
    %249 = tpu.matmul %248, %233, %cst_76 {dimension_numbers = #tpu.dot_dimension_numbers<[1], [0], [0], [1], [0, 0, 1, 1], [], []>} : vector<8x8xbf16>, vector<8x8xbf16>, vector<8x8xf32> -> vector<8x8xf32>
    %250 = vector.extract_strided_slice %227 {offsets = [0, 8], sizes = [8, 8], strides = [1, 1]} : vector<8x96xf32> to vector<8x8xf32>
    %251 = arith.truncf %250 : vector<8x8xf32> to vector<8x8xbf16>
    %252 = vector.extract_strided_slice %227 {offsets = [0, 40], sizes = [8, 8], strides = [1, 1]} : vector<8x96xf32> to vector<8x8xf32>
    %253 = arith.truncf %252 : vector<8x8xf32> to vector<8x8xbf16>
    %254 = vector.extract_strided_slice %227 {offsets = [0, 72], sizes = [8, 8], strides = [1, 1]} : vector<8x96xf32> to vector<8x8xf32>
    %255 = arith.truncf %254 : vector<8x8xf32> to vector<8x8xbf16>
    %cst_77 = arith.constant dense<0.000000e+00> : vector<8x8xf32>
    %256 = tpu.matmul %251, %253, %cst_77 {dimension_numbers = #tpu.dot_dimension_numbers<[1], [1], [0], [0], [0, 0, 1, 0], [], []>} : vector<8x8xbf16>, vector<8x8xbf16>, vector<8x8xf32> -> vector<8x8xf32>
    %257 = arith.cmpi sgt, %26, %25 : vector<8x8xi32>
    %cst_78 = arith.constant -1.000000e+30 : f32
    %258 = vector.broadcast %cst_78 : f32 to vector<8x8xf32>
    %259 = arith.select %257, %258, %256 : vector<8x8xi1>, vector<8x8xf32>
    %cst_79 = arith.constant dense<0xFF800000> : vector<8xf32>
    %260 = vector.multi_reduction <maximumf>, %259, %cst_79 [1] : vector<8x8xf32> to vector<8xf32>
    %261 = vector.shape_cast %260 : vector<8xf32> to vector<8x1xf32>
    %262 = vector.broadcast %261 : vector<8x1xf32> to vector<8x8xf32>
    %263 = arith.subf %259, %262 : vector<8x8xf32>
    %264 = math.exp %263 : vector<8x8xf32>
    %cst_80 = arith.constant dense<0.000000e+00> : vector<8xf32>
    %265 = vector.multi_reduction <add>, %264, %cst_80 [1] : vector<8x8xf32> to vector<8xf32>
    %266 = vector.shape_cast %265 : vector<8xf32> to vector<8x1xf32>
    %267 = tpu.reciprocal %266 {approx = true} : vector<8x1xf32> -> vector<8x1xf32>
    %268 = vector.broadcast %267 : vector<8x1xf32> to vector<8x8xf32>
    %269 = arith.mulf %264, %268 : vector<8x8xf32>
    %270 = arith.truncf %269 : vector<8x8xf32> to vector<8x8xbf16>
    %cst_81 = arith.constant dense<0.000000e+00> : vector<8x8xf32>
    %271 = tpu.matmul %270, %255, %cst_81 {dimension_numbers = #tpu.dot_dimension_numbers<[1], [0], [0], [1], [0, 0, 1, 1], [], []>} : vector<8x8xbf16>, vector<8x8xbf16>, vector<8x8xf32> -> vector<8x8xf32>
    %272 = vector.extract_strided_slice %227 {offsets = [0, 16], sizes = [8, 8], strides = [1, 1]} : vector<8x96xf32> to vector<8x8xf32>
    %273 = arith.truncf %272 : vector<8x8xf32> to vector<8x8xbf16>
    %274 = vector.extract_strided_slice %227 {offsets = [0, 48], sizes = [8, 8], strides = [1, 1]} : vector<8x96xf32> to vector<8x8xf32>
    %275 = arith.truncf %274 : vector<8x8xf32> to vector<8x8xbf16>
    %276 = vector.extract_strided_slice %227 {offsets = [0, 80], sizes = [8, 8], strides = [1, 1]} : vector<8x96xf32> to vector<8x8xf32>
    %277 = arith.truncf %276 : vector<8x8xf32> to vector<8x8xbf16>
    %cst_82 = arith.constant dense<0.000000e+00> : vector<8x8xf32>
    %278 = tpu.matmul %273, %275, %cst_82 {dimension_numbers = #tpu.dot_dimension_numbers<[1], [1], [0], [0], [0, 0, 1, 0], [], []>} : vector<8x8xbf16>, vector<8x8xbf16>, vector<8x8xf32> -> vector<8x8xf32>
    %279 = arith.cmpi sgt, %26, %25 : vector<8x8xi32>
    %cst_83 = arith.constant -1.000000e+30 : f32
    %280 = vector.broadcast %cst_83 : f32 to vector<8x8xf32>
    %281 = arith.select %279, %280, %278 : vector<8x8xi1>, vector<8x8xf32>
    %cst_84 = arith.constant dense<0xFF800000> : vector<8xf32>
    %282 = vector.multi_reduction <maximumf>, %281, %cst_84 [1] : vector<8x8xf32> to vector<8xf32>
    %283 = vector.shape_cast %282 : vector<8xf32> to vector<8x1xf32>
    %284 = vector.broadcast %283 : vector<8x1xf32> to vector<8x8xf32>
    %285 = arith.subf %281, %284 : vector<8x8xf32>
    %286 = math.exp %285 : vector<8x8xf32>
    %cst_85 = arith.constant dense<0.000000e+00> : vector<8xf32>
    %287 = vector.multi_reduction <add>, %286, %cst_85 [1] : vector<8x8xf32> to vector<8xf32>
    %288 = vector.shape_cast %287 : vector<8xf32> to vector<8x1xf32>
    %289 = tpu.reciprocal %288 {approx = true} : vector<8x1xf32> -> vector<8x1xf32>
    %290 = vector.broadcast %289 : vector<8x1xf32> to vector<8x8xf32>
    %291 = arith.mulf %286, %290 : vector<8x8xf32>
    %292 = arith.truncf %291 : vector<8x8xf32> to vector<8x8xbf16>
    %cst_86 = arith.constant dense<0.000000e+00> : vector<8x8xf32>
    %293 = tpu.matmul %292, %277, %cst_86 {dimension_numbers = #tpu.dot_dimension_numbers<[1], [0], [0], [1], [0, 0, 1, 1], [], []>} : vector<8x8xbf16>, vector<8x8xbf16>, vector<8x8xf32> -> vector<8x8xf32>
    %294 = vector.extract_strided_slice %227 {offsets = [0, 24], sizes = [8, 8], strides = [1, 1]} : vector<8x96xf32> to vector<8x8xf32>
    %295 = arith.truncf %294 : vector<8x8xf32> to vector<8x8xbf16>
    %296 = vector.extract_strided_slice %227 {offsets = [0, 56], sizes = [8, 8], strides = [1, 1]} : vector<8x96xf32> to vector<8x8xf32>
    %297 = arith.truncf %296 : vector<8x8xf32> to vector<8x8xbf16>
    %298 = vector.extract_strided_slice %227 {offsets = [0, 88], sizes = [8, 8], strides = [1, 1]} : vector<8x96xf32> to vector<8x8xf32>
    %299 = arith.truncf %298 : vector<8x8xf32> to vector<8x8xbf16>
    %cst_87 = arith.constant dense<0.000000e+00> : vector<8x8xf32>
    %300 = tpu.matmul %295, %297, %cst_87 {dimension_numbers = #tpu.dot_dimension_numbers<[1], [1], [0], [0], [0, 0, 1, 0], [], []>} : vector<8x8xbf16>, vector<8x8xbf16>, vector<8x8xf32> -> vector<8x8xf32>
    %301 = arith.cmpi sgt, %26, %25 : vector<8x8xi32>
    %cst_88 = arith.constant -1.000000e+30 : f32
    %302 = vector.broadcast %cst_88 : f32 to vector<8x8xf32>
    %303 = arith.select %301, %302, %300 : vector<8x8xi1>, vector<8x8xf32>
    %cst_89 = arith.constant dense<0xFF800000> : vector<8xf32>
    %304 = vector.multi_reduction <maximumf>, %303, %cst_89 [1] : vector<8x8xf32> to vector<8xf32>
    %305 = vector.shape_cast %304 : vector<8xf32> to vector<8x1xf32>
    %306 = vector.broadcast %305 : vector<8x1xf32> to vector<8x8xf32>
    %307 = arith.subf %303, %306 : vector<8x8xf32>
    %308 = math.exp %307 : vector<8x8xf32>
    %cst_90 = arith.constant dense<0.000000e+00> : vector<8xf32>
    %309 = vector.multi_reduction <add>, %308, %cst_90 [1] : vector<8x8xf32> to vector<8xf32>
    %310 = vector.shape_cast %309 : vector<8xf32> to vector<8x1xf32>
    %311 = tpu.reciprocal %310 {approx = true} : vector<8x1xf32> -> vector<8x1xf32>
    %312 = vector.broadcast %311 : vector<8x1xf32> to vector<8x8xf32>
    %313 = arith.mulf %308, %312 : vector<8x8xf32>
    %314 = arith.truncf %313 : vector<8x8xf32> to vector<8x8xbf16>
    %cst_91 = arith.constant dense<0.000000e+00> : vector<8x8xf32>
    %315 = tpu.matmul %314, %299, %cst_91 {dimension_numbers = #tpu.dot_dimension_numbers<[1], [0], [0], [1], [0, 0, 1, 1], [], []>} : vector<8x8xbf16>, vector<8x8xbf16>, vector<8x8xf32> -> vector<8x8xf32>
    %316 = tpu.concatenate %249, %271, %293, %315 in 1 : vector<8x8xf32>, vector<8x8xf32>, vector<8x8xf32>, vector<8x8xf32> -> vector<8x32xf32>
    %317 = arith.truncf %316 : vector<8x32xf32> to vector<8x32xbf16>
    %cst_92 = arith.constant dense<0.000000e+00> : vector<8x32xf32>
    %318 = tpu.matmul %317, %18, %cst_92 {dimension_numbers = #tpu.dot_dimension_numbers<[1], [0], [0], [1], [0, 0, 1, 1], [], []>} : vector<8x32xbf16>, vector<32x32xbf16>, vector<8x32xf32> -> vector<8x32xf32>
    %319 = vector.broadcast %7 : vector<1x32xf32> to vector<8x32xf32>
    %320 = arith.addf %318, %319 : vector<8x32xf32>
    %321 = vector.broadcast %8 : vector<1x32xf32> to vector<8x32xf32>
    %322 = arith.mulf %321, %320 : vector<8x32xf32>
    %323 = arith.addf %201, %322 : vector<8x32xf32>
    %cst_93 = arith.constant dense<0.000000e+00> : vector<8xf32>
    %324 = vector.multi_reduction <add>, %323, %cst_93 [1] : vector<8x32xf32> to vector<8xf32>
    %325 = vector.shape_cast %324 : vector<8xf32> to vector<8x1xf32>
    %cst_94 = arith.constant 3.200000e+01 : f32
    %326 = vector.broadcast %cst_94 : f32 to vector<8x1xf32>
    %327 = arith.divf %325, %326 : vector<8x1xf32>
    %328 = vector.broadcast %327 : vector<8x1xf32> to vector<8x32xf32>
    %329 = arith.subf %323, %328 : vector<8x32xf32>
    %330 = arith.mulf %329, %329 : vector<8x32xf32>
    %cst_95 = arith.constant dense<0.000000e+00> : vector<8xf32>
    %331 = vector.multi_reduction <add>, %330, %cst_95 [1] : vector<8x32xf32> to vector<8xf32>
    %332 = vector.shape_cast %331 : vector<8xf32> to vector<8x1xf32>
    %cst_96 = arith.constant 3.200000e+01 : f32
    %333 = vector.broadcast %cst_96 : f32 to vector<8x1xf32>
    %334 = arith.divf %332, %333 : vector<8x1xf32>
    %335 = vector.broadcast %327 : vector<8x1xf32> to vector<8x32xf32>
    %336 = arith.subf %323, %335 : vector<8x32xf32>
    %cst_97 = arith.constant 9.99999974E-6 : f32
    %337 = vector.broadcast %cst_97 : f32 to vector<8x1xf32>
    %338 = arith.addf %334, %337 : vector<8x1xf32>
    %339 = math.rsqrt %338 : vector<8x1xf32>
    %340 = vector.broadcast %339 : vector<8x1xf32> to vector<8x32xf32>
    %341 = arith.mulf %336, %340 : vector<8x32xf32>
    %342 = vector.broadcast %9 : vector<1x32xf32> to vector<8x32xf32>
    %343 = arith.mulf %341, %342 : vector<8x32xf32>
    %344 = vector.broadcast %10 : vector<1x32xf32> to vector<8x32xf32>
    %345 = arith.addf %343, %344 : vector<8x32xf32>
    %346 = arith.truncf %345 : vector<8x32xf32> to vector<8x32xbf16>
    %cst_98 = arith.constant dense<0.000000e+00> : vector<8x64xf32>
    %347 = tpu.matmul %346, %20, %cst_98 {dimension_numbers = #tpu.dot_dimension_numbers<[1], [0], [0], [1], [0, 0, 1, 1], [], []>} : vector<8x32xbf16>, vector<32x64xbf16>, vector<8x64xf32> -> vector<8x64xf32>
    %348 = vector.broadcast %22 : vector<1x64xf32> to vector<8x64xf32>
    %349 = arith.addf %347, %348 : vector<8x64xf32>
    %350 = arith.mulf %349, %349 : vector<8x64xf32>
    %351 = arith.mulf %349, %350 : vector<8x64xf32>
    %cst_99 = arith.constant 4.471500e-02 : f32
    %352 = vector.broadcast %cst_99 : f32 to vector<8x64xf32>
    %353 = arith.mulf %352, %351 : vector<8x64xf32>
    %354 = arith.addf %349, %353 : vector<8x64xf32>
    %cst_100 = arith.constant 0.797884583 : f32
    %355 = vector.broadcast %cst_100 : f32 to vector<8x64xf32>
    %356 = arith.mulf %355, %354 : vector<8x64xf32>
    %357 = math.tanh %356 : vector<8x64xf32>
    %cst_101 = arith.constant 1.000000e+00 : f32
    %358 = vector.broadcast %cst_101 : f32 to vector<8x64xf32>
    %359 = arith.addf %358, %357 : vector<8x64xf32>
    %cst_102 = arith.constant 5.000000e-01 : f32
    %360 = vector.broadcast %cst_102 : f32 to vector<8x64xf32>
    %361 = arith.mulf %360, %359 : vector<8x64xf32>
    %362 = arith.mulf %349, %361 : vector<8x64xf32>
    %363 = arith.truncf %362 : vector<8x64xf32> to vector<8x64xbf16>
    %cst_103 = arith.constant dense<0.000000e+00> : vector<8x32xf32>
    %364 = tpu.matmul %363, %24, %cst_103 {dimension_numbers = #tpu.dot_dimension_numbers<[1], [0], [0], [1], [0, 0, 1, 1], [], []>} : vector<8x64xbf16>, vector<64x32xbf16>, vector<8x32xf32> -> vector<8x32xf32>
    %365 = vector.broadcast %11 : vector<1x32xf32> to vector<8x32xf32>
    %366 = arith.addf %364, %365 : vector<8x32xf32>
    %367 = vector.broadcast %12 : vector<1x32xf32> to vector<8x32xf32>
    %368 = arith.mulf %367, %366 : vector<8x32xf32>
    %369 = arith.addf %323, %368 : vector<8x32xf32>
    %c1_104 = arith.constant 1 : index
    %c0_105 = arith.constant 0 : index
    %c0_106 = arith.constant 0 : index
    %370 = vector.load %arg11[%c1_104, %c0_105, %c0_106] : memref<2x8x32xf32, #tpu.memory_space<vmem>>, vector<1x8x32xf32>
    %371 = vector.shape_cast %370 : vector<1x8x32xf32> to vector<8x32xf32>
    %372 = vector.shape_cast %369 : vector<8x32xf32> to vector<1x8x32xf32>
    tpu.vector_store %arg11[%c1_104, %c0_105, %c0_106], %372 {strides = array<i32>} : memref<2x8x32xf32, #tpu.memory_space<vmem>>, vector<1x8x32xf32>,
    %c0_i32_107 = arith.constant 0 : i32
    %373 = arith.cmpi eq, %arg1, %c0_i32_107 : i32
    %374 = arith.extui %373 : i1 to i32
    %c0_i32_108 = arith.constant 0 : i32
    %375 = arith.cmpi ne, %374, %c0_i32_108 : i32
    scf.if %375 {
      %c0_109 = arith.constant 0 : index
      %c0_110 = arith.constant 0 : index
      %c0_111 = arith.constant 0 : index
      %376 = vector.load %arg11[%c0_109, %c0_110, %c0_111] : memref<2x8x32xf32, #tpu.memory_space<vmem>>, vector<2x8x32xf32>
      %377 = arith.truncf %376 : vector<2x8x32xf32> to vector<2x8x32xbf16>
      %c0_112 = arith.constant 0 : index
      %c0_113 = arith.constant 0 : index
      %c0_114 = arith.constant 0 : index
      %378 = vector.load %arg10[%c0_112, %c0_113, %c0_114] : memref<2x8x32xbf16, #tpu.memory_space<vmem>>, vector<2x8x32xbf16>
      tpu.vector_store %arg10[%c0_112, %c0_113, %c0_114], %377 {strides = array<i32>} : memref<2x8x32xbf16, #tpu.memory_space<vmem>>, vector<2x8x32xbf16>,
    } else {
    }
    return
  }
  func.func @transform_0(%arg0: i32, %arg1: i32) -> (i32, i32, i32) {
    %c0_i32 = arith.constant 0 : i32
    %c0_i32_0 = arith.constant 0 : i32
    %c0_i32_1 = arith.constant 0 : i32
    return %arg0, %c0_i32, %c0_i32_0 : i32, i32, i32
  }
  func.func @transform_1(%arg0: i32, %arg1: i32) -> (i32, i32, i32) {
    %c0_i32 = arith.constant 0 : i32
    %c0_i32_0 = arith.constant 0 : i32
    %c0_i32_1 = arith.constant 0 : i32
    return %arg1, %c0_i32, %c0_i32_0 : i32, i32, i32
  }
  func.func @transform_2(%arg0: i32, %arg1: i32) -> (i32, i32, i32) {
    %c0_i32 = arith.constant 0 : i32
    %c0_i32_0 = arith.constant 0 : i32
    %c0_i32_1 = arith.constant 0 : i32
    return %arg1, %c0_i32, %c0_i32_0 : i32, i32, i32
  }
  func.func @transform_3(%arg0: i32, %arg1: i32) -> (i32, i32, i32) {
    %c0_i32 = arith.constant 0 : i32
    %c0_i32_0 = arith.constant 0 : i32
    %c0_i32_1 = arith.constant 0 : i32
    return %arg1, %c0_i32, %c0_i32_0 : i32, i32, i32
  }
  func.func @transform_4(%arg0: i32, %arg1: i32) -> (i32, i32, i32) {
    %c0_i32 = arith.constant 0 : i32
    %c0_i32_0 = arith.constant 0 : i32
    %c0_i32_1 = arith.constant 0 : i32
    return %arg1, %c0_i32, %c0_i32_0 : i32, i32, i32
  }
  func.func @transform_5(%arg0: i32, %arg1: i32) -> (i32, i32, i32) {
    %c0_i32 = arith.constant 0 : i32
    %c0_i32_0 = arith.constant 0 : i32
    %c0_i32_1 = arith.constant 0 : i32
    return %arg1, %c0_i32, %c0_i32_0 : i32, i32, i32
  }
  func.func @transform_6(%arg0: i32, %arg1: i32) -> (i32, i32, i32) {
    %c0_i32 = arith.constant 0 : i32
    %c0_i32_0 = arith.constant 0 : i32
    %c0_i32_1 = arith.constant 0 : i32
    return %arg1, %c0_i32, %c0_i32_0 : i32, i32, i32
  }
  func.func @transform_7(%arg0: i32, %arg1: i32) -> (i32, i32, i32) {
    %c0_i32 = arith.constant 0 : i32
    %c0_i32_0 = arith.constant 0 : i32
    %c0_i32_1 = arith.constant 0 : i32
    return %arg1, %c0_i32, %c0_i32_0 : i32, i32, i32
  }
  func.func @transform_8(%arg0: i32, %arg1: i32) -> (i32, i32, i32) {
    %c0_i32 = arith.constant 0 : i32
    %c0_i32_0 = arith.constant 0 : i32
    %c0_i32_1 = arith.constant 0 : i32
    return %arg0, %c0_i32, %c0_i32_0 : i32, i32, i32
  }
}

module attributes {stable_mosaic.version = 11 : i64} {
  func.func @clip_logits_kernel(%arg0: memref<2x16xf32, #tpu.memory_space<vmem>>, %arg1: memref<2x16xf32, #tpu.memory_space<vmem>>, %arg2: memref<1x1xf32, #tpu.memory_space<vmem>>, %arg3: memref<2x2xf32, #tpu.memory_space<vmem>>) attributes {dimension_semantics = [], scalar_prefetch = 0 : i64, scratch_operands = 0 : i64, tpu.core_type = #tpu.core_type<tc>} {
    %c0 = arith.constant 0 : index
    %c0_0 = arith.constant 0 : index
    %0 = vector.load %arg0[%c0, %c0_0] : memref<2x16xf32, #tpu.memory_space<vmem>>, vector<2x16xf32>
    %c0_1 = arith.constant 0 : index
    %c0_2 = arith.constant 0 : index
    %1 = vector.load %arg1[%c0_1, %c0_2] : memref<2x16xf32, #tpu.memory_space<vmem>>, vector<2x16xf32>
    %2 = arith.mulf %0, %0 : vector<2x16xf32>
    %cst = arith.constant dense<0.000000e+00> : vector<2xf32>
    %3 = vector.multi_reduction <add>, %2, %cst [1] : vector<2x16xf32> to vector<2xf32>
    %4 = vector.shape_cast %3 : vector<2xf32> to vector<2x1xf32>
    %cst_3 = arith.constant 9.99999996E-13 : f32
    %5 = vector.broadcast %cst_3 : f32 to vector<2x1xf32>
    %6 = arith.addf %4, %5 : vector<2x1xf32>
    %7 = math.rsqrt %6 : vector<2x1xf32>
    %8 = vector.broadcast %7 : vector<2x1xf32> to vector<2x16xf32>
    %9 = arith.mulf %0, %8 : vector<2x16xf32>
    %10 = arith.mulf %1, %1 : vector<2x16xf32>
    %cst_4 = arith.constant dense<0.000000e+00> : vector<2xf32>
    %11 = vector.multi_reduction <add>, %10, %cst_4 [1] : vector<2x16xf32> to vector<2xf32>
    %12 = vector.shape_cast %11 : vector<2xf32> to vector<2x1xf32>
    %cst_5 = arith.constant 9.99999996E-13 : f32
    %13 = vector.broadcast %cst_5 : f32 to vector<2x1xf32>
    %14 = arith.addf %12, %13 : vector<2x1xf32>
    %15 = math.rsqrt %14 : vector<2x1xf32>
    %16 = vector.broadcast %15 : vector<2x1xf32> to vector<2x16xf32>
    %17 = arith.mulf %1, %16 : vector<2x16xf32>
    %c0_6 = arith.constant 0 : index
    %c0_7 = arith.constant 0 : index
    %18 = vector.load %arg2[%c0_6, %c0_7] : memref<1x1xf32, #tpu.memory_space<vmem>>, vector<1x1xf32>
    %19 = math.exp %18 : vector<1x1xf32>
    %cst_8 = arith.constant dense<0.000000e+00> : vector<2x2xf32>
    %20 = tpu.matmul %9, %17, %cst_8 {dimension_numbers = #tpu.dot_dimension_numbers<[1], [1], [0], [0], [0, 0, 1, 0], [], []>} : vector<2x16xf32>, vector<2x16xf32>, vector<2x2xf32> -> vector<2x2xf32>
    %21 = vector.broadcast %19 : vector<1x1xf32> to vector<2x2xf32>
    %22 = arith.mulf %20, %21 : vector<2x2xf32>
    %c0_9 = arith.constant 0 : index
    %c0_10 = arith.constant 0 : index
    %23 = vector.load %arg3[%c0_9, %c0_10] : memref<2x2xf32, #tpu.memory_space<vmem>>, vector<2x2xf32>
    tpu.vector_store %arg3[%c0_9, %c0_10], %22 {strides = array<i32>} : memref<2x2xf32, #tpu.memory_space<vmem>>, vector<2x2xf32>,
    return
  }
}

</mosaic_0001>

<bundles_post_ra>
// kernel: clip_forward.6
= control target key start
LH: loop header
LB: loop body
LE: loop exit
PB: predicated region body
PF: predicated region fallthrough
CT: control target
= control target key end

     0   :  { %v225_v0 = vmov 0.0   ;;  %vm226_vm0 = vmmov 0   ;;  %vm60_vm1 = vcmask 392192   ;;  %vm118_vm2 = vcmask 253952   ;;  %s315_s1 = inlined_call_operand.vmem [shape: bf16[48,32], index: 1, kind: input, shape index: {}]   ;;  %s316_s0 = inlined_call_operand.vmem [shape: f32[2,16,48], index: 0, kind: input, shape index: {}]   ;;  %s317_s3 = inlined_call_operand.vmem [shape: f32[1,32], index: 3, kind: input, shape index: {}]   ;;  %s318_s4 = inlined_call_operand.vmem [shape: f32[17,32], index: 4, kind: input, shape index: {}]   ;;  %s319_s5 = inlined_call_operand.vmem [shape: f32[2,17,32], index: 5, kind: output, shape index: {}]   ;;  %s320_s2 = inlined_call_operand.vmem [shape: f32[1,32], index: 2, kind: input, shape index: {}]  }
   0x1   :  { %200 = vmatprep.subr.bf16.mxu0 %v225_v0  ;;  %210 = vmatprep.subr.bf16.mxu1 %v225_v0  ;;  %v222_v1 = vld [vmem:[%s315_s1 + $0x10] sm:$0xff]   ;;  %v223_v2 = vld [vmem:[%s315_s1 + $0x8] sm:$0xff]   ;;  %v224_v3 = vld [vmem:[%s315_s1] sm:$0xff]   ;;  %vm108_vm3 = vcmask 1046528   ;;  %vm120_vm4 = vcmask 261120  }
   0x2   :  { %206 = vmatprep.mubr.msk.bf16.mxu0 %vm226_vm0, %v225_v0  ;;  %216 = vmatprep.mubr.msk.bf16.mxu1 %vm226_vm0, %v225_v0  ;;  %v33_v4 = vld [vmem:[%s316_s0] sm:$0xff]  ;;  %v34_v5 = vld [vmem:[%s316_s0 + $0x8] sm:$0xff]  ;;  %v186_v6 = vld [vmem:[%s316_s0 + $0x10] sm:$0xff] }
   0x3   :  { %201 = vmatpush3.bf16.msra.mxu0 %v222_v1  ;;  %211 = vmatpush3.bf16.msra.mxu1 %v222_v1  ;;  %v187_v7 = vld [vmem:[%s316_s0 + $0x18] sm:$0xff]  ;;  %v35_v8 = vpack.c.bf16 %v34_v5, %v33_v4  ;;  %v31_v10 = vld [vmem:[%s317_s3] sm:$0x1]  ;;  %v29_v13 = vld [vmem:[%s318_s4 + $0x8] sm:$0xff] }
   0x4   :  { %202 = vmatprep.subr.bf16.mxu0 %v225_v0  ;;  %212 = vmatprep.subr.bf16.mxu1 %v225_v0  ;;  %v126_v9 = vpack.c.bf16 %v187_v7, %v186_v6  ;;  %v28_v11 = vld [vmem:[%s318_s4] sm:$0xff]  ;;  %v110_v15 = vrot.slane %v29_v13, 1  ;;  %v30_v16 = vld [vmem:[%s318_s4 + $0x10] sm:$0x1] }
   0x5   :  { %v32_v12 = vadd.f32 %v31_v10, %v28_v11  ;;  %v109_v14 = vrot.slane %v28_v11, 1  ;;  %v181_v17 = vld [vmem:[%s320_s2] ss:$0 sm:$0xff]  ;;  %v112_v21 = vrot.slane %v30_v16, 1 }
   0x7   :  { %203 = vmatpush3.bf16.msra.mxu0 %v223_v2  ;;  %213 = vmatpush3.bf16.msra.mxu1 %v223_v2  ;;  %119 = vst.msk [vmem:[%s319_s5] sm:$0x1] %vm118_vm2, %v32_v12  ;;  %189 = vst.msk [vmem:[%s319_s5 + $0x18] sm:$0x1] %vm118_vm2, %v32_v12  ;;  %v111_v19 = vsel %vm108_vm3, %v109_v14, %v110_v15  ;;  %v113_v29 = vsel %vm108_vm3, %v110_v15, %v112_v21 }
   0x8   :  { %204 = vmatprep.subr.bf16.mxu0 %v225_v0  ;;  %214 = vmatprep.subr.bf16.mxu1 %v225_v0 }
   0xb   :  { %205 = vmatpush3.bf16.msra.mxu0 %v224_v3  ;;  %215 = vmatpush3.bf16.msra.mxu1 %v224_v3 }
   0xe   :  { %207 = vmatmul.mubr.msk.bf16.vlgmr.msra.gmra.mxu0 %vm60_vm1, %v35_v8  ;;  %217 = vmatmul.mubr.msk.bf16.vlgmr.msra.gmra.mxu1 %vm60_vm1, %v126_v9 }
  0xce   :  { %v98_v18 = vpop.f32.mrf.mxu0  ;;  %v164_v20 = vpop.f32.mrf.mxu1 }
  0xcf   :  { %v99_v22 = vadd.f32 %v181_v17, %v98_v18  ;;  %v165_v23 = vadd.f32 %v181_v17, %v164_v20 }
  0xd0   :  { %v208_v24 = vpop.f32.mrf.mxu0  ;;  %v218_v25 = vpop.f32.mrf.mxu1 }
  0xd1   :  { %v116_v26 = vadd.f32 %v111_v19, %v99_v22  ;;  %v171_v27 = vadd.f32 %v165_v23, %v111_v19 }
  0xd2   :  { %v101_v28 = vpop.f32.mrf.mxu0  ;;  %v167_v30 = vpop.f32.mrf.mxu1 }
  0xd3   :  { %121 = vst.msk [vmem:[%s319_s5 + $0x1] sm:$0xff] %vm120_vm4, %v116_v26  ;;  %190 = vst.msk [vmem:[%s319_s5 + $0x19] sm:$0xff] %vm120_vm4, %v171_v27  ;;  %v102_v31 = vadd.f32 %v181_v17, %v101_v28  ;;  %v168_v32 = vadd.f32 %v181_v17, %v167_v30 }
  0xd4   :  { %v209_v33 = vpop.f32.mrf.mxu0  ;;  %v219_v34 = vpop.f32.mrf.mxu1 }
  0xd5   :  { %v117_v35 = vadd.f32 %v113_v29, %v102_v31  ;;  %v172_v36 = vadd.f32 %v168_v32, %v113_v29 }
  0xd7   :  { %122 = vst.msk [vmem:[%s319_s5 + $0x9] sm:$0xff] %vm120_vm4, %v117_v35  ;;  %191 = vst.msk [vmem:[%s319_s5 + $0x21] sm:$0xff] %vm120_vm4, %v172_v36 }

// kernel: clip_forward.8
= control target key start
LH: loop header
LB: loop body
LE: loop exit
PB: predicated region body
PF: predicated region fallthrough
CT: control target
= control target key end

     0   :  { %vm22_vm0 = vcmask 254976   ;;  %v140_v8 = vmov 0.0   ;;  %vm141_vm1 = vmmov 0   ;;  %vm68_vm2 = vcmask 261120   ;;  %s185_s0 = inlined_call_operand.vmem [shape: bf16[2,32], index: 0, kind: input, shape index: {}]   ;;  %s186_s3 = inlined_call_operand.vmem [shape: bf16[32,16], index: 3, kind: input, shape index: {}]   ;;  %s187_s1 = inlined_call_operand.vmem [shape: f32[1,32], index: 1, kind: input, shape index: {}]   ;;  %s188_s2 = inlined_call_operand.vmem [shape: f32[1,32], index: 2, kind: input, shape index: {}]   ;;  %s189_s4 = inlined_call_operand.vmem [shape: f32[2,16], index: 4, kind: output, shape index: {}]  }
   0x1   :  { %v18_v0 = vld [vmem:[%s185_s0] sm:$0x1]  ;;  %126 = vmatprep.subr.bf16.mxu0 %v140_v8  ;;  %v136_v9 = vld [vmem:[%s186_s3 + $0x8] sm:$0xff]   ;;  %130 = vmatprep.mubr.msk.bf16.mxu0 %vm141_vm1, %v140_v8  ;;  %vm112_vm3 = vcmask 123904  }
   0x2   :  { %v19_v1 = vunpack.c.l.bf16 %v18_v0  ;;  %127 = vmatpush3.bf16.msra.mxu0 %v136_v9  ;;  %v137_v10 = vld [vmem:[%s186_s3] sm:$0xff]  }
   0x3   :  { %128 = vmatprep.subr.bf16.mxu0 %v140_v8  ;;  %v118_v15 = vld [vmem:[%s187_s1] ss:$0 sm:$0xff] }
   0x4   :  { %v23_v2 = vsel %vm22_vm0, %v19_v1, 0.0  ;;  %v119_v17 = vld [vmem:[%s188_s2] ss:$0 sm:$0xff] }
   0x5   :  { %24 = vadd.xlane.f32.xlu0 %v23_v2 }
   0x6   :  { %129 = vmatpush3.bf16.msra.mxu0 %v137_v10 }
  0x8e   :  { %v25_v3 = vpop.xlane.xlu0 %24 }
  0x8f   :  { %v27_v4 = vmul.f32 0.03125, %v25_v3 }
  0x91   :  { %v28_v5 = vsub.f32 %v19_v1, %v27_v4 }
  0x93   :  { %v29_v6 = vmul.f32 %v28_v5, %v28_v5 }
  0x95   :  { %v30_v7 = vsel %vm22_vm0, %v29_v6, 0.0 }
  0x96   :  { %31 = vadd.xlane.f32.xlu0 %v30_v7 }
 0x11f   :  { %v32_v11 = vpop.xlane.xlu0 %31 }
 0x120   :  { %v33_v12 = vmul.f32 0.03125, %v32_v11 }
 0x122   :  { %v34_v13 = vadd.f32 1e-05, %v33_v12 }
 0x124   :  { %138 = vrsqrt.f32 %v34_v13 }
 0x131   :  { %v139_v14 = vpop.eup %138 }
 0x132   :  { %v36_v16 = vmul.f32 %v139_v14, %v28_v5 }
 0x134   :  { %v43_v18 = vmul.f32 %v118_v15, %v36_v16 }
 0x136   :  { %v50_v19 = vadd.f32 %v119_v17, %v43_v18 }
 0x138   :  { %v51_v20 = vpack.c.bf16 %v50_v19, %v50_v19 }
 0x13a   :  { %131 = vmatmul.mubr.msk.bf16.vlgmr.msra.gmra.mxu0 %vm68_vm2, %v51_v20 }
 0x1fa   :  { %v106_v21 = vpop.f32.mrf.mxu0 }
 0x1fb   :  { %113 = vst.msk [vmem:[%s189_s4] sm:$0x3] %vm112_vm3, %v106_v21 }
 0x1fc   :  { %v132_v22 = vpop.f32.mrf.mxu0 }
 0x1fe   :  { %v109_v23 = vpop.f32.mrf.mxu0 }
 0x200   :  { %v133_v24 = vpop.f32.mrf.mxu0 }

// kernel: clip_forward.11
= control target key start
LH: loop header
LB: loop body
LE: loop exit
PB: predicated region body
PF: predicated region fallthrough
CT: control target
= control target key end

     0   :  { %vm19_vm0 = vcmask 123904   ;;  %v149_v6 = vmov 0.0   ;;  %vm150_vm1 = vmmov 0   ;;  %v151_v7 = vmov 0   ;;  %s184_s1 = inlined_call_operand.vmem [shape: f32[2,16], index: 1, kind: input, shape index: {}]   ;;  %s185_s0 = inlined_call_operand.vmem [shape: f32[2,16], index: 0, kind: input, shape index: {}]   ;;  %s186_s2 = inlined_call_operand.<no memory space> [shape: f32[1,1], index: 2, kind: input, shape index: {}]   ;;  %s187_s3 = inlined_call_operand.vmem [shape: f32[2,2], index: 3, kind: output, shape index: {}]  }
   0x1   :  { %v17_v0 = vld [vmem:[%s184_s1] sm:$0x3]  ;;  %133 = vmatprep.subr.mxu0 %v149_v6  ;;  %135 = vmatprep.mubr.msk.f32.mxu0 %vm150_vm1, %v149_v6  ;;  %v8_v8 = vstv %s186_s2  ;;  %v114_v11 = vlaneseq  ;;  %vm36_vm2 = vcmask 130048   ;;  %vm123_vm3 = vcmask 9216  }
   0x2   :  { %v16_v1 = vld [vmem:[%s185_s0] sm:$0x3]  ;;  %v26_v2 = vmul.f32 %v17_v0, %v17_v0  ;;  %141 = vset.pattern.permute.xlu1 %v151_v7  ;;  %142 = vset.pattern.permute.xlu0 %v151_v7  ;;  %9 = vst [vmem:[#allocation2] sm:$0x1] %v8_v8 }
   0x3   :  { %v18_v3 = vmul.f32 %v16_v1, %v16_v1  ;;  %v115_v12 = vshrl.u32 %v114_v11, 7 }
   0x4   :  { %v27_v4 = vsel %vm19_vm0, %v26_v2, 0.0 }
   0x5   :  { %28 = vadd.xlane.f32.xlu0 %v27_v4  ;;  %v20_v5 = vsel %vm19_vm0, %v18_v3, 0.0  ;;  %v116_v13 = vsub.s32 0, %v115_v12 }
   0x9   :  { %21 = vadd.xlane.f32.xlu0 %v20_v5  ;;  %v33_v9 = vld [vmem:[#allocation2] sm:$0x1] }
   0xa   :  { %v34_v10 = vmul.f32 1.442695, %v33_v9 }
   0xc   :  { %143 = vpow2.f32 %v34_v10 }
  0x19   :  { %v144_v14 = vpop.eup %143 }
  0x1a   :  { %v117_v15 = vrot.slane %v144_v14, %v116_v13 }
  0x1c   :  { %119 = vperm.xlu1 %141, %v117_v15  }
  0x8e   :  { %v29_v16 = vpop.xlane.xlu0 %28 }
  0x8f   :  { %v30_v17 = vadd.f32 1e-12, %v29_v16 }
  0x91   :  { %145 = vrsqrt.f32 %v30_v17 }
  0x92   :  { %v22_v18 = vpop.xlane.xlu0 %21 }
  0x93   :  { %v23_v19 = vadd.f32 1e-12, %v22_v18 }
  0x95   :  { %147 = vrsqrt.f32 %v23_v19 }
  0x97   :  { %v120_v24 = vpop.permute.xlu1 %119 }
  0x9e   :  { %v146_v20 = vpop.eup %145 }
  0x9f   :  { %v32_v21 = vmul.f32 %v146_v20, %v17_v0 }
  0xa1   :  { %134 = vmatpush3.xpose.msk.msra.mxu0 %vm36_vm2, %v32_v21 }
  0xa2   :  { %v148_v22 = vpop.eup %147 }
  0xa3   :  { %v25_v23 = vmul.f32 %v148_v22, %v16_v1 }
  0xa5   :  { %136 = vmatmul.mubr.msk.f32.vlgmr.msra.gmra.mxu0 %vm36_vm2, %v25_v23 }
 0x165   :  { %v109_v25 = vpop.f32.mrf.mxu0 }
 0x166   :  { %v122_v26 = vmul.f32 %v120_v24, %v109_v25 }
 0x167   :  { %v137_v27 = vpop.f32.mrf.mxu0 }
 0x168   :  { %124 = vst.msk [vmem:[%s187_s3] sm:$0x3] %vm123_vm3, %v122_v26 }

// kernel: clip_forward.7
= control target key start
LH: loop header
LB: loop body
LE: loop exit
PB: predicated region body
PF: predicated region fallthrough
CT: control target
= control target key end

     0   :  { %s3649_s27 = smov 0   ;;  %s3651_s28 = smov 0   ;;  %s4338_s0 = inlined_call_operand.vmem [shape: f32[2,17,32], index: 0, kind: input, shape index: {}]   ;;  %s4339_s1 = inlined_call_operand.vmem [shape: f32[2,8,32], index: 1, kind: input, shape index: {}]   ;;  %s4340_s2 = inlined_call_operand.vmem [shape: bf16[2,32,96], index: 2, kind: input, shape index: {}]   ;;  %s4341_s3 = inlined_call_operand.vmem [shape: f32[2,1,96], index: 3, kind: input, shape index: {}]   ;;  %s4342_s4 = inlined_call_operand.vmem [shape: bf16[2,32,32], index: 4, kind: input, shape index: {}]   ;;  %s4343_s5 = inlined_call_operand.vmem [shape: bf16[2,32,64], index: 5, kind: input, shape index: {}]   ;;  %s4344_s6 = inlined_call_operand.vmem [shape: f32[2,1,64], index: 6, kind: input, shape index: {}]   ;;  %s4345_s7 = inlined_call_operand.vmem [shape: bf16[2,64,32], index: 7, kind: input, shape index: {}]   ;;  %s4346_s8 = inlined_call_operand.vmem [shape: bf16[2,17,32], index: 8, kind: output, shape index: {}]  }
   0x1   :  { %4353 = sst [smem:[#allocation3_spill]] %s4339_s1  ;;  %s3653_s29 = smov 0  }
   0x2 LB: > { %s27_s30 = sadd.s32 1, %s3583_s28  ;;  %p2937_p0 = scmp.ge.s32.totalorder %s3587_s29, 1  ;;  %s3587_s29 = sphi %s3653_s29, %s18_s29   ;;  %s3583_s28 = sphi %s3651_s28, %s4359_s28   ;;  %s3579_s27 = sphi %s3649_s27, %s4358_s27  }
   0x3   : > { %p28_p1 = scmp.ge.s32.totalorder %s27_s30, 2  ;;  %p341_p2 = scmp.lt.s32.totalorder %s3587_s29, 3 }
   0x5   : > { %s4361_s30 = smov (%p28_p1, %s27_s30), 0  ;;  %p342_p3 = pnand %p2937_p0, %p341_p2 }
   0x6   : > { %p414_p4 = scmp.lt.s32.totalorder (!%p342_p3), %s3579_s27, 1  ;;  %s4354_s1 = sld [smem:[#allocation3_spill]] (!%p342_p3) }
   0x7   : > { %345 = sbr.rel (%p342_p3) target bundleno = 7370 (0x1cca), region = 52  ;;  %p2947_p5 = scmp.ne.s32.totalorder (!%p342_p3), %s3579_s27, 0 }
   0xc   : > { %s3671_s9 = scalar_select %p414_p4, %s3579_s27, 1 }
   0xe   : > { %s2938_s10 = sshll.u32 %s3671_s9, 3  ;;  %s3019_s11 = sshll.u32 %s3671_s9, 4 }
   0xf   : > { %s3678_s14 = scalar_lea.vmem %s4354_s1, %s2938_s10  ;;  %s3683_s17 = scalar_lea.vmem %s4340_s2, %s3019_s11 }
  0x10   : > { %s3689_s20 = scalar_lea.vmem %s4341_s3, %s3671_s9  ;;  %s3694_s23 = scalar_lea.vmem %s4342_s4, %s3019_s11 }
  0x11   : > { %s3699_s26 = scalar_lea.vmem %s4343_s5, %s3019_s11  ;;  %s438_s13 = scalar_lea.vmem %s4344_s6, %s3671_s9 }
  0x12   : > { %s3022_s15 = sshll.u32 %s3671_s9, 5  ;;  %455 = sbr.rel (%p2947_p5) target bundleno = 28 (0x1c), region = 56 }
  0x13   : > { %s3709_s18 = scalar_lea.vmem %s4345_s7, %s3022_s15 }
  0x17   : > { %v456_v0 = vld [vmem:[%s4338_s0] sm:$0xff]  ;;  %vm462_vm0 = vcmask 261120   ;;  %v457_v1 = vld [vmem:[%s4338_s0 + $0x8] sm:$0xff]  ;;  %v458_v2 = vld [vmem:[%s4338_s0 + $0x10] sm:$0x1]  ;;  %vm465_vm1 = vcmask 253952  }
  0x18   : > { %463 = vst.msk [vmem:[#allocation2] sm:$0xff] %vm462_vm0, %v456_v0  ;;  %464 = vst.msk [vmem:[#allocation2 + $0x8] sm:$0xff] %vm462_vm0, %v457_v1  ;;  %v459_v3 = vld [vmem:[%s4338_s0 + $0x18] sm:$0xff]  ;;  %v460_v4 = vld [vmem:[%s4338_s0 + $0x20] sm:$0xff] }
  0x19   : > { %466 = vst.msk [vmem:[#allocation2 + $0x10] sm:$0x1] %vm465_vm1, %v458_v2  ;;  %v461_v5 = vld [vmem:[%s4338_s0 + $0x28] sm:$0x1] }
  0x1a   : > { %467 = vst.msk [vmem:[#allocation2 + $0x18] sm:$0xff] %vm462_vm0, %v459_v3  ;;  %468 = vst.msk [vmem:[#allocation2 + $0x20] sm:$0xff] %vm462_vm0, %v460_v4 }
  0x1b   : > { %469 = vst.msk [vmem:[#allocation2 + $0x28] sm:$0x1] %vm465_vm1, %v461_v5 }
  0x1c PF: > { %vm496_vm2 = vcmask 261120   ;;  %vm503_vm3 = vcmask 253952   ;;  %v3749_v27 = vld [vmem:[%s3683_s17 + $0x8] sm:$0xff]   ;;  %v3415_v28 = vld [vmem:[%s3683_s17] sm:$0xff]   ;;  %v538_v38 = vlaneseq  ;;  %s3589_s21 = smov 96   ;;  %vm634_vm4 = vcmask 64512  }
  0x1d   : > { %3129 = vmatprep.subr.bf16.mxu1 %v3749_v27  ;;  %v3758_v41 = vld [vmem:[%s3678_s14] sm:$0xff]  ;;  %vm695_vm5 = vcmask 138240   ;;  %vm702_vm6 = vcmask 131072   ;;  %s3590_s11 = smov 64   ;;  %s3591_s22 = smov 120   ;;  %vm743_vm7 = vcmask 1040384  }
  0x1e   : > { %3130 = vmatpush3.bf16.msra.mxu1 %v3749_v27  ;;  %v3754_v39 = vshrl.u32 %v538_v38, 7  ;;  %v2948_v59 = vld [vmem:[%s3689_s20] ss:$0 sm:$0xff]  ;;  %s3592_s24 = smov 88   ;;  %s3594_s25 = smov 56   ;;  %vm1331_vm8 = vcmask 130048  }
  0x1f   : > { %v3730_v6 = vld [vmem:[#allocation2] sm:$0xff]  ;;  %v3734_v8 = vld [vmem:[#allocation2 + $0x8] sm:$0xff]  ;;  %3131 = vmatprep.subr.bf16.mxu1 %v3415_v28  ;;  %s3595_s1 = smov 80   ;;  %s3596_s10 = smov 112   ;;  %vm1335_vm9 = vcmask 195584   ;;  %vm1605_vm10 = vcmask 523264  }
  0x20   : > { %v3732_v7 = vld [vmem:[#allocation2 + $0x10] sm:$0x1]  ;;  %v497_v9 = vsel %vm496_vm2, %v3730_v6, 0.0  ;;  %v500_v11 = vsel %vm496_vm2, %v3734_v8, 0.0  ;;  %v540_v40 = vsub.s32 0, %v3754_v39  ;;  %v547_v45 = vsub.s32 1, %v3754_v39 }
  0x21   : > { %v504_v10 = vsel %vm503_vm3, %v3732_v7, 0.0  ;;  %498 = vadd.xlane.f32.xlu0 %v497_v9  ;;  %s3597_s12 = smov 48   ;;  %s4349_s15 = smov 72  }
  0x22   : > { %505 = vadd.xlane.f32.xlu1 %v504_v10  ;;  %3132 = vmatpush3.bf16.msra.mxu1 %v3415_v28  ;;  %v3761_v44 = vrot.slane %v3758_v41, %v540_v40  ;;  %v3766_v51 = vrot.slane %v3758_v41, %v547_v45  ;;  %s4347_s16 = smov 104   ;;  %s3600_s19 = smov 40  }
  0x23   : > { %s4355_s9 = smov 72   ;;  %p3008_p6 = scmp.ne.s32.totalorder %s3579_s27, 1 }
  0x25   : > { %501 = vadd.xlane.f32.xlu0 %v500_v11 }
  0xaa   : > { %v499_v12 = vpop.xlane.xlu0 %498 }
  0xab   : > { %v506_v13 = vpop.xlane.xlu1 %505  ;;  %v508_v14 = vmul.f32 0.03125, %v499_v12 }
  0xac   : > { %v510_v15 = vmul.f32 0.03125, %v506_v13 }
  0xad   : > { %v511_v16 = vsub.f32 %v3730_v6, %v508_v14 }
  0xae   : > { %v513_v17 = vsub.f32 %v3732_v7, %v510_v15  ;;  %v502_v18 = vpop.xlane.xlu0 %501 }
  0xaf   : > { %v509_v19 = vmul.f32 0.03125, %v502_v18  ;;  %v514_v20 = vmul.f32 %v511_v16, %v511_v16 }
  0xb0   : > { %v516_v21 = vmul.f32 %v513_v17, %v513_v17 }
  0xb1   : > { %v512_v22 = vsub.f32 %v3734_v8, %v509_v19  ;;  %v517_v23 = vsel %vm496_vm2, %v514_v20, 0.0 }
  0xb2   : > { %518 = vadd.xlane.f32.xlu1 %v517_v23  ;;  %v523_v24 = vsel %vm503_vm3, %v516_v21, 0.0 }
  0xb3   : > { %v515_v25 = vmul.f32 %v512_v22, %v512_v22 }
  0xb5   : > { %v520_v26 = vsel %vm496_vm2, %v515_v25, 0.0 }
  0xb6   : > { %524 = vadd.xlane.f32.xlu1 %v523_v24  ;;  %521 = vadd.xlane.f32.xlu0 %v520_v26 }
 0x13b   : > { %v519_v29 = vpop.xlane.xlu1 %518 }
 0x13c   : > { %v526_v30 = vmul.f32 0.03125, %v519_v29 }
 0x13e   : > { %v529_v31 = vadd.f32 1e-05, %v526_v30 }
 0x13f   : > { %v525_v32 = vpop.xlane.xlu1 %524  ;;  %v522_v33 = vpop.xlane.xlu0 %521 }
 0x140   : > { %3424 = vrsqrt.f32 %v529_v31  ;;  %v528_v34 = vmul.f32 0.03125, %v525_v32  ;;  %v527_v35 = vmul.f32 0.03125, %v522_v33 }
 0x142   : > { %v531_v36 = vadd.f32 1e-05, %v528_v34  ;;  %v530_v37 = vadd.f32 1e-05, %v527_v35 }
 0x144   : > { %3426 = vrsqrt.f32 %v531_v36  ;;  %v3593_v36 = vmov 0  }
 0x145   : > { %3428 = vrsqrt.f32 %v530_v37  ;;  %v3810_v37 = vsel %vm743_vm7, 65535, %v3593_v36 }
 0x14d   : > { %v3425_v42 = vpop.eup %3424 }
 0x14e   : > { %v535_v43 = vmul.f32 %v3425_v42, %v511_v16 }
 0x150   : > { %v542_v50 = vmul.f32 %v3761_v44, %v535_v43 }
 0x151   : > { %v3427_v46 = vpop.eup %3426 }
 0x152   : > { %v3429_v47 = vpop.eup %3428  ;;  %v537_v48 = vmul.f32 %v3427_v46, %v513_v17  ;;  %v549_v55 = vadd.f32 %v3766_v51, %v542_v50 }
 0x153   : > { %v536_v49 = vmul.f32 %v3429_v47, %v512_v22 }
 0x154   : > { %v544_v52 = vmul.f32 %v3761_v44, %v537_v48 }
 0x155   : > { %v543_v53 = vmul.f32 %v3761_v44, %v536_v49 }
 0x156   : > { %v551_v54 = vadd.f32 %v3766_v51, %v544_v52 }
 0x157   : > { %v550_v56 = vadd.f32 %v3766_v51, %v543_v53 }
 0x158   : > { %v553_v57 = vpack.c.bf16 %v551_v54, %v551_v54 }
 0x159   : > { %v552_v58 = vpack.c.bf16 %v550_v56, %v549_v55 }
 0x15b   : > { %3133 = vmatprep.mubr.msk.bf16.mxu1 %vm496_vm2, %v552_v58 }
 0x15c   : > { %3134 = vmatmul.mubr.msk.bf16.vlgmr.msra.gmra.mxu1 %vm496_vm2, %v553_v57 }
 0x21c   : > { %v3135_v60 = vpop.f32.mrf.mxu1 }
 0x21d   : > { %v621_v61 = vadd.f32 %v3135_v60, %v2948_v59 }
 0x21e   : > { %v612_v62 = vpop.f32.mrf.mxu1 }
 0x21f   : > { %v3776_v63 = vpack.c.bf16 %v621_v61, %v621_v61  ;;  %v613_v2 = vadd.f32 %v2948_v59, %v612_v62 }
 0x220   : > { %v3136_v0 = vpop.f32.mrf.mxu1 }
 0x221   : > { %632 = vrot.lane.b32.xlu0 %v3776_v63, %s3589_s21 }
 0x222   : > { %v615_v1 = vpop.f32.mrf.mxu1 }
 0x223   : > { %v616_v3 = vadd.f32 %v2948_v59, %v615_v1 }
 0x225   : > { %v3780_v4 = vpack.c.bf16 %v616_v3, %v613_v2 }
 0x227   : > { %630 = vrot.lane.b32.xlu1 %v3780_v4, %s3589_s21  ;;  %3141 = vmatprep.mubr.msk.bf16.mxu1 %vm634_vm4, %v3780_v4 }
 0x293   : > { %v633_v5 = vpop.permute.xlu0 %632 }
 0x294   : > { %3329 = vmatprep.subr.msk.bf16.mxu1 %vm634_vm4, %v633_v5  ;;  %v645_v9 = vsel %vm634_vm4, %v633_v5, 0 }
 0x295   : > { %3138 = vmatpush3.bf16.xpose.msra.mxu1 %v645_v9 }
 0x299   : > { %v631_v10 = vpop.permute.xlu1 %630 }
 0x29a   : > { %3330 = vmatprep.subr.msk.bf16.mxu1 %vm634_vm4, %v631_v10  ;;  %v642_v11 = vsel %vm634_vm4, %v631_v10, 0 }
 0x29d   : > { %3140 = vmatpush3.bf16.xpose.msra.mxu1 %v642_v11 }
 0x2a4   : > { %3142 = vmatmul.mubr.msk.bf16.vlgmr.msra.gmra.mxu1 %vm634_vm4, %v3776_v63 }
 0x364   : > { %v3143_v12 = vpop.f32.mrf.mxu1 }
 0x365   : > { %v703_v18 = vsel %vm702_vm6, %v3143_v12, -inf }
 0x366   : > { %v681_v13 = vpop.f32.mrf.mxu1 }
 0x367   : > { %v696_v14 = vsel %vm695_vm5, %v681_v13, -inf }
 0x368   : > { %697 = vmax.xlane.f32.xlu1 %v696_v14  ;;  %v3144_v15 = vpop.f32.mrf.mxu1 }
 0x36a   : > { %v684_v16 = vpop.f32.mrf.mxu1 }
 0x36b   : > { %v699_v17 = vsel %vm695_vm5, %v684_v16, -inf }
 0x36c   : > { %700 = vmax.xlane.f32.xlu0 %v699_v17 }
 0x370   : > { %704 = vmax.xlane.f32.xlu0 %v703_v18 }
 0x3f1   : > { %v698_v19 = vpop.xlane.xlu1 %697 }
 0x3f2   : > { %v706_v22 = vsub.f32 %v681_v13, %v698_v19 }
 0x3f4   : > { %v709_v26 = vmul.f32 1.442695, %v706_v22 }
 0x3f5   : > { %v701_v20 = vpop.xlane.xlu0 %700 }
 0x3f6   : > { %v707_v21 = vsub.f32 %v684_v16, %v701_v20 }
 0x3f8   : > { %v711_v23 = vmul.f32 1.442695, %v707_v21 }
 0x3f9   : > { %v705_v24 = vpop.xlane.xlu0 %704 }
 0x3fa   : > { %3430 = vpow2.f32 %v711_v23  ;;  %v708_v25 = vsub.f32 %v3143_v12, %v705_v24 }
 0x3fc   : > { %v713_v28 = vmul.f32 1.442695, %v708_v25 }
 0x3fe   : > { %3432 = vpow2.f32 %v713_v28 }
 0x3ff   : > { %3434 = vpow2.f32 %v709_v26 }
 0x407   : > { %v3431_v29 = vpop.eup %3430 }
 0x408   : > { %v718_v30 = vsel %vm695_vm5, %v3431_v29, 0.0 }
 0x409   : > { %719 = vadd.xlane.f32.xlu0 %v718_v30 }
 0x40b   : > { %v3433_v31 = vpop.eup %3432 }
 0x40c   : > { %v721_v32 = vsel %vm702_vm6, %v3433_v31, 0.0  ;;  %v3435_v33 = vpop.eup %3434 }
 0x40d   : > { %722 = vadd.xlane.f32.xlu1 %v721_v32  ;;  %v715_v34 = vsel %vm695_vm5, %v3435_v33, 0.0 }
 0x411   : > { %716 = vadd.xlane.f32.xlu1 %v715_v34 }
 0x41f   : > { %734 = vrot.lane.b32.xlu0 %v3776_v63, %s3590_s11 }
 0x422   : > { %732 = vrot.lane.b32.xlu1 %v3780_v4, %s3590_s11 }
 0x423   : > { %797 = vrot.lane.b32.xlu0 %v3780_v4, %s3591_s22 }
 0x426   : > { %803 = vrot.lane.b32.xlu1 %v3776_v63, %s3592_s24 }
 0x42a   : > { %801 = vrot.lane.b32.xlu1 %v3780_v4, %s3592_s24 }
 0x42e   : > { %799 = vrot.lane.b32.xlu1 %v3776_v63, %s3591_s22 }
 0x492   : > { %v720_v35 = vpop.xlane.xlu0 %719 }
 0x496   : > { %v723_v38 = vpop.xlane.xlu1 %722  ;;  %v735_v40 = vpop.permute.xlu0 %734 }
 0x497   : > { %v747_v42 = vand.u32 %v3810_v37, %v735_v40  ;;  %3436 = vrcp.f32 %v723_v38 }
 0x498   : > { %3438 = vrcp.f32 %v720_v35 }
 0x499   : > { %3145 = vmatprep.subr.bf16.mxu0 %v747_v42 }
 0x49a   : > { %v717_v43 = vpop.xlane.xlu1 %716  ;;  %3146 = vmatpush3.bf16.msra.mxu0 %v747_v42  ;;  %v798_v56 = vpop.permute.xlu0 %797 }
 0x49b   : > { %3440 = vrcp.f32 %v717_v43 }
 0x49e   : > { %v733_v45 = vpop.permute.xlu1 %732 }
 0x49f   : > { %3147 = vmatprep.subr.bf16.mxu0 %v733_v45 }
 0x4a0   : > { %3148 = vmatpush3.bf16.msra.mxu0 %v733_v45 }
 0x4a2   : > { %v804_v46 = vpop.permute.xlu1 %803 }
 0x4a3   : > { %3331 = vmatprep.subr.msk.bf16.mxu0 %vm634_vm4, %v804_v46  ;;  %v815_v57 = vsel %vm634_vm4, %v804_v46, 0 }
 0x4a4   : > { %v3437_v47 = vpop.eup %3436 }
 0x4a5   : > { %v3439_v48 = vpop.eup %3438  ;;  %v729_v50 = vmul.f32 %v3437_v47, %v3433_v31 }
 0x4a6   : > { %v728_v53 = vmul.f32 %v3439_v48, %v3431_v29  ;;  %v802_v58 = vpop.permute.xlu1 %801 }
 0x4a7   : > { %v731_v55 = vpack.c.bf16 %v729_v50, %v729_v50  ;;  %v812_v59 = vsel %vm634_vm4, %v802_v58, 0 }
 0x4a8   : > { %v3441_v49 = vpop.eup %3440 }
 0x4a9   : > { %v727_v52 = vmul.f32 %v3441_v49, %v3435_v33 }
 0x4aa   : > { %v800_v60 = vpop.permute.xlu1 %799 }
 0x4ab   : > { %v730_v54 = vpack.c.bf16 %v728_v53, %v727_v52 }
 0x4ad   : > { %3149 = vmatprep.mubr.msk.bf16.mxu0 %vm695_vm5, %v730_v54 }
 0x4ae   : > { %3150 = vmatmul.mubr.msk.bf16.vlgmr.msra.gmra.mxu0 %vm695_vm5, %v731_v55 }
 0x4af   : > { %3154 = vmatpush3.bf16.xpose.msra.mxu0 %v815_v57  ;;  %3157 = vmatprep.mubr.msk.bf16.mxu0 %vm634_vm4, %v798_v56 }
 0x4b0   : > { %3332 = vmatprep.subr.msk.bf16.mxu0 %vm634_vm4, %v802_v58 }
 0x4b7   : > { %3156 = vmatpush3.bf16.xpose.msra.mxu0 %v812_v59 }
 0x4be   : > { %3158 = vmatmul.mubr.msk.bf16.vlgmr.msra.gmra.mxu0 %vm634_vm4, %v800_v60 }
 0x56e   : > { %v3821_v61 = vpop.f32.mrf.mxu0 }
 0x570   : > { %v3823_v62 = vpop.f32.mrf.mxu0 }
 0x572   : > { %v3152_v0 = vpop.f32.mrf.mxu0 }
 0x574   : > { %v3825_v1 = vpop.f32.mrf.mxu0 }
 0x57e   : > { %v3159_v2 = vpop.f32.mrf.mxu0 }
 0x57f   : > { %v871_v11 = vsel %vm702_vm6, %v3159_v2, -inf }
 0x580   : > { %v851_v3 = vpop.f32.mrf.mxu0 }
 0x581   : > { %v865_v5 = vsel %vm695_vm5, %v851_v3, -inf }
 0x582   : > { %866 = vmax.xlane.f32.xlu0 %v865_v5  ;;  %v3160_v9 = vpop.f32.mrf.mxu0 }
 0x584   : > { %v854_v10 = vpop.f32.mrf.mxu0 }
 0x585   : > { %v868_v12 = vsel %vm695_vm5, %v854_v10, -inf }
 0x586   : > { %872 = vmax.xlane.f32.xlu0 %v871_v11  ;;  %869 = vmax.xlane.f32.xlu1 %v868_v12 }
 0x60b   : > { %v867_v13 = vpop.xlane.xlu0 %866 }
 0x60c   : > { %v874_v14 = vsub.f32 %v851_v3, %v867_v13 }
 0x60e   : > { %v877_v15 = vmul.f32 1.442695, %v874_v14 }
 0x60f   : > { %v873_v16 = vpop.xlane.xlu0 %872  ;;  %v870_v17 = vpop.xlane.xlu1 %869 }
 0x610   : > { %3442 = vpow2.f32 %v877_v15  ;;  %v876_v18 = vsub.f32 %v3159_v2, %v873_v16  ;;  %v875_v19 = vsub.f32 %v854_v10, %v870_v17 }
 0x612   : > { %v881_v20 = vmul.f32 1.442695, %v876_v18  ;;  %v879_v21 = vmul.f32 1.442695, %v875_v19 }
 0x614   : > { %3444 = vpow2.f32 %v881_v20 }
 0x615   : > { %3446 = vpow2.f32 %v879_v21 }
 0x61d   : > { %v3443_v22 = vpop.eup %3442 }
 0x61e   : > { %v883_v23 = vsel %vm695_vm5, %v3443_v22, 0.0 }
 0x61f   : > { %884 = vadd.xlane.f32.xlu0 %v883_v23 }
 0x621   : > { %v3445_v24 = vpop.eup %3444 }
 0x622   : > { %v3447_v25 = vpop.eup %3446  ;;  %v889_v26 = vsel %vm702_vm6, %v3445_v24, 0.0 }
 0x623   : > { %890 = vadd.xlane.f32.xlu1 %v889_v26  ;;  %v886_v28 = vsel %vm695_vm5, %v3447_v25, 0.0 }
 0x624   : > { %887 = vadd.xlane.f32.xlu0 %v886_v28 }
 0x634   : > { %900 = vrot.lane.b32.xlu1 %v3780_v4, %s3594_s25 }
 0x638   : > { %968 = vrot.lane.b32.xlu1 %v3776_v63, %s3595_s1 }
 0x63a   : > { %902 = vrot.lane.b32.xlu0 %v3776_v63, %s3594_s25 }
 0x63c   : > { %966 = vrot.lane.b32.xlu1 %v3780_v4, %s3595_s1 }
 0x63e   : > { %962 = vrot.lane.b32.xlu0 %v3780_v4, %s3596_s10 }
 0x640   : > { %964 = vrot.lane.b32.xlu1 %v3776_v63, %s3596_s10 }
 0x6a8   : > { %v885_v29 = vpop.xlane.xlu0 %884 }
 0x6a9   : > { %3448 = vrcp.f32 %v885_v29 }
 0x6ac   : > { %v891_v30 = vpop.xlane.xlu1 %890 }
 0x6ad   : > { %v888_v31 = vpop.xlane.xlu0 %887  ;;  %3450 = vrcp.f32 %v891_v30 }
 0x6ae   : > { %3452 = vrcp.f32 %v888_v31 }
 0x6b0   : > { %v901_v34 = vpop.permute.xlu1 %900 }
 0x6b1   : > { %v903_v32 = vpop.permute.xlu0 %902 }
 0x6b2   : > { %v912_v33 = vand.u32 %v903_v32, %v3810_v37 }
 0x6b4   : > { %3161 = vmatprep.subr.bf16.mxu1 %v912_v33  ;;  %v969_v36 = vpop.permute.xlu1 %968 }
 0x6b5   : > { %3162 = vmatpush3.bf16.msra.mxu1 %v912_v33  ;;  %v963_v48 = vpop.permute.xlu0 %962  ;;  %v980_v49 = vsel %vm634_vm4, %v969_v36, 0 }
 0x6b6   : > { %3163 = vmatprep.subr.bf16.mxu1 %v901_v34  ;;  %v3449_v35 = vpop.eup %3448 }
 0x6b7   : > { %v895_v43 = vmul.f32 %v3449_v35, %v3443_v22 }
 0x6b8   : > { %v967_v50 = vpop.permute.xlu1 %966 }
 0x6b9   : > { %3164 = vmatpush3.bf16.msra.mxu1 %v901_v34  ;;  %v977_v52 = vsel %vm634_vm4, %v967_v50, 0 }
 0x6ba   : > { %v3451_v38 = vpop.eup %3450  ;;  %3333 = vmatprep.subr.msk.bf16.mxu1 %vm634_vm4, %v969_v36 }
 0x6bb   : > { %v3453_v40 = vpop.eup %3452  ;;  %v897_v42 = vmul.f32 %v3451_v38, %v3445_v24 }
 0x6bc   : > { %v896_v45 = vmul.f32 %v3453_v40, %v3447_v25  ;;  %v965_v53 = vpop.permute.xlu1 %964 }
 0x6bd   : > { %v899_v46 = vpack.c.bf16 %v897_v42, %v897_v42 }
 0x6be   : > { %v898_v47 = vpack.c.bf16 %v896_v45, %v895_v43 }
 0x6c0   : > { %3165 = vmatprep.mubr.msk.bf16.mxu1 %vm695_vm5, %v898_v47 }
 0x6c1   : > { %3166 = vmatmul.mubr.msk.bf16.vlgmr.msra.gmra.mxu1 %vm695_vm5, %v899_v46 }
 0x6c2   : > { %3170 = vmatpush3.bf16.xpose.msra.mxu1 %v980_v49  ;;  %3173 = vmatprep.mubr.msk.bf16.mxu1 %vm634_vm4, %v963_v48 }
 0x6c3   : > { %3334 = vmatprep.subr.msk.bf16.mxu1 %vm634_vm4, %v967_v50 }
 0x6ca   : > { %3172 = vmatpush3.bf16.xpose.msra.mxu1 %v977_v52 }
 0x6d1   : > { %3174 = vmatmul.mubr.msk.bf16.vlgmr.msra.gmra.mxu1 %vm634_vm4, %v965_v53 }
 0x781   : > { %v3854_v54 = vpop.f32.mrf.mxu1 }
 0x783   : > { %v3856_v55 = vpop.f32.mrf.mxu1 }
 0x785   : > { %v3168_v56 = vpop.f32.mrf.mxu1 }
 0x787   : > { %v3858_v57 = vpop.f32.mrf.mxu1 }
 0x788   : > { %v3384_v58 = vpack.i.bf16 %v3858_v57, %v3856_v55 }
 0x791   : > { %v3175_v59 = vpop.f32.mrf.mxu1 }
 0x792   : > { %v1036_v5 = vsel %vm702_vm6, %v3175_v59, -inf }
 0x793   : > { %v1016_v60 = vpop.f32.mrf.mxu1 }
 0x794   : > { %v1030_v0 = vsel %vm695_vm5, %v1016_v60, -inf }
 0x795   : > { %1031 = vmax.xlane.f32.xlu0 %v1030_v0  ;;  %v3176_v2 = vpop.f32.mrf.mxu1 }
 0x797   : > { %v1019_v3 = vpop.f32.mrf.mxu1 }
 0x798   : > { %v1033_v9 = vsel %vm695_vm5, %v1019_v3, -inf }
 0x799   : > { %1037 = vmax.xlane.f32.xlu0 %v1036_v5  ;;  %1034 = vmax.xlane.f32.xlu1 %v1033_v9 }
 0x81e   : > { %v1032_v10 = vpop.xlane.xlu0 %1031 }
 0x81f   : > { %v1039_v11 = vsub.f32 %v1016_v60, %v1032_v10 }
 0x821   : > { %v1042_v12 = vmul.f32 1.442695, %v1039_v11 }
 0x822   : > { %v1038_v13 = vpop.xlane.xlu0 %1037  ;;  %v1035_v14 = vpop.xlane.xlu1 %1034 }
 0x823   : > { %3454 = vpow2.f32 %v1042_v12  ;;  %v1041_v15 = vsub.f32 %v3175_v59, %v1038_v13  ;;  %v1040_v16 = vsub.f32 %v1019_v3, %v1035_v14 }
 0x825   : > { %v1046_v17 = vmul.f32 1.442695, %v1041_v15  ;;  %v1044_v18 = vmul.f32 1.442695, %v1040_v16 }
 0x827   : > { %3456 = vpow2.f32 %v1046_v17 }
 0x828   : > { %3458 = vpow2.f32 %v1044_v18 }
 0x830   : > { %v3455_v19 = vpop.eup %3454 }
 0x831   : > { %v1048_v20 = vsel %vm695_vm5, %v3455_v19, 0.0 }
 0x832   : > { %1049 = vadd.xlane.f32.xlu0 %v1048_v20 }
 0x834   : > { %v3457_v21 = vpop.eup %3456 }
 0x835   : > { %v3459_v22 = vpop.eup %3458  ;;  %v1054_v23 = vsel %vm702_vm6, %v3457_v21, 0.0 }
 0x836   : > { %1055 = vadd.xlane.f32.xlu1 %v1054_v23  ;;  %v1051_v24 = vsel %vm695_vm5, %v3459_v22, 0.0 }
 0x837   : > { %1052 = vadd.xlane.f32.xlu0 %v1051_v24 }
 0x847   : > { %1065 = vrot.lane.b32.xlu1 %v3780_v4, %s3597_s12 }
 0x84b   : > { %1133 = vrot.lane.b32.xlu1 %v3776_v63, %s4349_s15 }
 0x84d   : > { %1067 = vrot.lane.b32.xlu0 %v3776_v63, %s3597_s12 }
 0x84f   : > { %1131 = vrot.lane.b32.xlu1 %v3780_v4, %s4349_s15  ;;  %s4351_s15 = smov 16  }
 0x851   : > { %1127 = vrot.lane.b32.xlu0 %v3780_v4, %s4347_s16 }
 0x853   : > { %1129 = vrot.lane.b32.xlu1 %v3776_v63, %s4347_s16  ;;  %s3601_s16 = smov 8  }
 0x8bb   : > { %v1050_v25 = vpop.xlane.xlu0 %1049 }
 0x8bc   : > { %3460 = vrcp.f32 %v1050_v25 }
 0x8bf   : > { %v1056_v26 = vpop.xlane.xlu1 %1055 }
 0x8c0   : > { %v1053_v28 = vpop.xlane.xlu0 %1052  ;;  %3462 = vrcp.f32 %v1056_v26 }
 0x8c1   : > { %3464 = vrcp.f32 %v1053_v28 }
 0x8c3   : > { %v1066_v31 = vpop.permute.xlu1 %1065 }
 0x8c4   : > { %v1068_v29 = vpop.permute.xlu0 %1067 }
 0x8c5   : > { %v1077_v30 = vand.u32 %v1068_v29, %v3810_v37 }
 0x8c7   : > { %3177 = vmatprep.subr.bf16.mxu0 %v1077_v30  ;;  %v1134_v33 = vpop.permute.xlu1 %1133 }
 0x8c8   : > { %3178 = vmatpush3.bf16.msra.mxu0 %v1077_v30  ;;  %v1128_v45 = vpop.permute.xlu0 %1127  ;;  %v1145_v46 = vsel %vm634_vm4, %v1134_v33, 0 }
 0x8c9   : > { %3179 = vmatprep.subr.bf16.mxu0 %v1066_v31  ;;  %v3461_v32 = vpop.eup %3460 }
 0x8ca   : > { %v1060_v38 = vmul.f32 %v3461_v32, %v3455_v19 }
 0x8cb   : > { %v1132_v47 = vpop.permute.xlu1 %1131 }
 0x8cc   : > { %3180 = vmatpush3.bf16.msra.mxu0 %v1066_v31  ;;  %v1142_v48 = vsel %vm634_vm4, %v1132_v47, 0 }
 0x8cd   : > { %v3463_v34 = vpop.eup %3462  ;;  %3335 = vmatprep.subr.msk.bf16.mxu0 %vm634_vm4, %v1134_v33 }
 0x8ce   : > { %v3465_v35 = vpop.eup %3464  ;;  %v1062_v36 = vmul.f32 %v3463_v34, %v3457_v21 }
 0x8cf   : > { %v1061_v40 = vmul.f32 %v3465_v35, %v3459_v22  ;;  %v1130_v49 = vpop.permute.xlu1 %1129  ;;  %v3416_v35 = vld [vmem:[%s3694_s23 + $0x8] sm:$0xff]  }
 0x8d0   : > { %v1064_v42 = vpack.c.bf16 %v1062_v36, %v1062_v36  ;;  %v3417_v36 = vld [vmem:[%s3694_s23] sm:$0xff]  }
 0x8d1   : > { %v1063_v43 = vpack.c.bf16 %v1061_v40, %v1060_v38 }
 0x8d3   : > { %3181 = vmatprep.mubr.msk.bf16.mxu0 %vm695_vm5, %v1063_v43 }
 0x8d4   : > { %3182 = vmatmul.mubr.msk.bf16.vlgmr.msra.gmra.mxu0 %vm695_vm5, %v1064_v42 }
 0x8d5   : > { %3186 = vmatpush3.bf16.xpose.msra.mxu0 %v1145_v46  ;;  %3189 = vmatprep.mubr.msk.bf16.mxu0 %vm634_vm4, %v1128_v45 }
 0x8d6   : > { %3336 = vmatprep.subr.msk.bf16.mxu0 %vm634_vm4, %v1132_v47 }
 0x8dd   : > { %3188 = vmatpush3.bf16.xpose.msra.mxu0 %v1142_v48 }
 0x8e4   : > { %3190 = vmatmul.mubr.msk.bf16.vlgmr.msra.gmra.mxu0 %vm634_vm4, %v1130_v49 }
 0x994   : > { %v3183_v50 = vpop.f32.mrf.mxu0 }
 0x996   : > { %v1113_v52 = vpop.f32.mrf.mxu0 }
 0x998   : > { %v3184_v53 = vpop.f32.mrf.mxu0 }
 0x99a   : > { %v1116_v56 = vpop.f32.mrf.mxu0 }
 0x99b   : > { %v3389_v59 = vpack.i.bf16 %v1116_v56, %v1113_v52 }
 0x9a4   : > { %v3191_v60 = vpop.f32.mrf.mxu0 }
 0x9a5   : > { %v1201_v9 = vsel %vm702_vm6, %v3191_v60, -inf }
 0x9a6   : > { %v1181_v0 = vpop.f32.mrf.mxu0 }
 0x9a7   : > { %v1195_v2 = vsel %vm695_vm5, %v1181_v0, -inf }
 0x9a8   : > { %1196 = vmax.xlane.f32.xlu0 %v1195_v2  ;;  %v3192_v3 = vpop.f32.mrf.mxu0 }
 0x9aa   : > { %v1184_v5 = vpop.f32.mrf.mxu0 }
 0x9ab   : > { %v1198_v10 = vsel %vm695_vm5, %v1184_v5, -inf }
 0x9ac   : > { %1202 = vmax.xlane.f32.xlu0 %v1201_v9  ;;  %1199 = vmax.xlane.f32.xlu1 %v1198_v10 }
 0xa31   : > { %v1197_v11 = vpop.xlane.xlu0 %1196 }
 0xa32   : > { %v1204_v12 = vsub.f32 %v1181_v0, %v1197_v11 }
 0xa34   : > { %v1207_v13 = vmul.f32 1.442695, %v1204_v12 }
 0xa35   : > { %v1203_v14 = vpop.xlane.xlu0 %1202  ;;  %v1200_v15 = vpop.xlane.xlu1 %1199 }
 0xa36   : > { %3466 = vpow2.f32 %v1207_v13  ;;  %v1206_v16 = vsub.f32 %v3191_v60, %v1203_v14  ;;  %v1205_v17 = vsub.f32 %v1184_v5, %v1200_v15 }
 0xa38   : > { %v1211_v18 = vmul.f32 1.442695, %v1206_v16  ;;  %v1209_v19 = vmul.f32 1.442695, %v1205_v17  ;;  %v1413_v17 = vsub.s32 3, %v3754_v39 }
 0xa3a   : > { %3468 = vpow2.f32 %v1211_v18 }
 0xa3b   : > { %3470 = vpow2.f32 %v1209_v19 }
 0xa43   : > { %v3467_v20 = vpop.eup %3466 }
 0xa44   : > { %v1213_v21 = vsel %vm695_vm5, %v3467_v20, 0.0 }
 0xa45   : > { %1214 = vadd.xlane.f32.xlu0 %v1213_v21 }
 0xa47   : > { %v3469_v22 = vpop.eup %3468 }
 0xa48   : > { %v3471_v23 = vpop.eup %3470  ;;  %v1219_v24 = vsel %vm702_vm6, %v3469_v22, 0.0 }
 0xa49   : > { %1220 = vadd.xlane.f32.xlu1 %v1219_v24  ;;  %v1216_v25 = vsel %vm695_vm5, %v3471_v23, 0.0 }
 0xa4a   : > { %1217 = vadd.xlane.f32.xlu0 %v1216_v25 }
 0xa5a   : > { %1230 = vrot.lane.b32.xlu1 %v3780_v4, %s3600_s19 }
 0xa5e   : > { %3385 = vrot.lane.b32.xlu1 %v3384_v58, %s3601_s16 }
 0xa60   : > { %1232 = vrot.lane.b32.xlu0 %v3776_v63, %s3600_s19 }
 0xa62   : > { %1299 = vrot.lane.b32.xlu1 %v3854_v54, %s3601_s16 }
 0xa64   : > { %3390 = vrot.lane.b32.xlu0 %v3389_v59, %s4351_s15 }
 0xa66   : > { %1311 = vrot.lane.b32.xlu1 %v3183_v50, %s4351_s15  ;;  %s3603_s15 = smov 24  }
 0xace   : > { %v1215_v26 = vpop.xlane.xlu0 %1214 }
 0xacf   : > { %3472 = vrcp.f32 %v1215_v26 }
 0xad2   : > { %v1221_v4 = vpop.xlane.xlu1 %1220 }
 0xad3   : > { %v1218_v28 = vpop.xlane.xlu0 %1217  ;;  %3474 = vrcp.f32 %v1221_v4 }
 0xad4   : > { %3476 = vrcp.f32 %v1218_v28 }
 0xad6   : > { %v1231_v63 = vpop.permute.xlu1 %1230 }
 0xad7   : > { %v1233_v29 = vpop.permute.xlu0 %1232 }
 0xad8   : > { %v1242_v55 = vand.u32 %v1233_v29, %v3810_v37 }
 0xada   : > { %3193 = vmatprep.subr.bf16.mxu1 %v1242_v55  ;;  %v3386_v46 = vpop.permute.xlu1 %3385 }
 0xadb   : > { %3194 = vmatpush3.bf16.msra.mxu1 %v1242_v55  ;;  %v3391_v48 = vpop.permute.xlu0 %3390  ;;  %v3388_v49 = vunpack.i.h.bf16 %v3386_v46  ;;  %v3387_v50 = vunpack.i.l.bf16 %v3386_v46 }
 0xadc   : > { %3195 = vmatprep.subr.bf16.mxu1 %v1231_v63  ;;  %v3473_v54 = vpop.eup %3472  ;;  %v3393_v53 = vunpack.i.h.bf16 %v3391_v48  ;;  %v3392_v56 = vunpack.i.l.bf16 %v3391_v48 }
 0xadd   : > { %v1225_v31 = vmul.f32 %v3473_v54, %v3467_v20  ;;  %v1329_v59 = vsel %vm634_vm4, %v3825_v1, %v3388_v49  ;;  %v1328_v60 = vsel %vm634_vm4, %v3823_v62, %v3387_v50  ;;  %v3935_v20 = vrot.slane %v3758_v41, %v1413_v17 }
 0xade   : > { %v1300_v47 = vpop.permute.xlu1 %1299  ;;  %v1332_v12 = vsel %vm1331_vm8, %v1328_v60, %v3392_v56  ;;  %v1333_v1 = vsel %vm1331_vm8, %v1329_v59, %v3393_v53 }
 0xadf   : > { %3196 = vmatpush3.bf16.msra.mxu1 %v1231_v63  ;;  %v1330_v2 = vsel %vm634_vm4, %v3821_v61, %v1300_v47  ;;  %v1343_v61 = vsub.s32 2, %v3754_v39 }
 0xae0   : > { %v3475_v57 = vpop.eup %3474  ;;  %3201 = vmatprep.subr.bf16.mxu1 %v3416_v35 }
 0xae1   : > { %v3477_v58 = vpop.eup %3476  ;;  %v1227_v30 = vmul.f32 %v3475_v57, %v3469_v22  ;;  %v3930_v16 = vrot.slane %v3758_v41, %v1343_v61  ;;  %v1674_v57 = vld [vmem:[#allocation2 + $0x18] sm:$0xff] }
 0xae2   : > { %v1226_v32 = vmul.f32 %v3477_v58, %v3471_v23  ;;  %v1312_v52 = vpop.permute.xlu1 %1311  ;;  %v1676_v58 = vld [vmem:[#allocation2 + $0x28] sm:$0x1] }
 0xae3   : > { %v1229_v33 = vpack.c.bf16 %v1227_v30, %v1227_v30  ;;  %v1334_v5 = vsel %vm1331_vm8, %v1330_v2, %v1312_v52 }
 0xae4   : > { %v1228_v34 = vpack.c.bf16 %v1226_v32, %v1225_v31  ;;  %v1683_v31 = vsel %vm503_vm3, %v1676_v58, 0.0  ;;  %v1675_v32 = vld [vmem:[#allocation2 + $0x20] sm:$0xff] }
 0xae6   : > { %3197 = vmatprep.mubr.msk.bf16.mxu1 %vm695_vm5, %v1228_v34 }
 0xae7   : > { %3198 = vmatmul.mubr.msk.bf16.vlgmr.msra.gmra.mxu1 %vm695_vm5, %v1229_v33 }
 0xae8   : > { %3202 = vmatpush3.bf16.msra.mxu1 %v3416_v35 }
 0xae9   : > { %3203 = vmatprep.subr.bf16.mxu1 %v3417_v36 }
 0xaec   : > { %3204 = vmatpush3.bf16.msra.mxu1 %v3417_v36 }
 0xba7   : > { %v3199_v38 = vpop.f32.mrf.mxu1 }
 0xba8   : > { %1323 = vrot.lane.b32.xlu1 %v3199_v38, %s3603_s15 }
 0xba9   : > { %v1278_v40 = vpop.f32.mrf.mxu1 }
 0xbab   : > { %v3200_v42 = vpop.f32.mrf.mxu1 }
 0xbad   : > { %v1281_v43 = vpop.f32.mrf.mxu1 }
 0xbae   : > { %v3394_v45 = vpack.i.bf16 %v1281_v43, %v1278_v40 }
 0xbb0   : > { %3395 = vrot.lane.b32.xlu0 %v3394_v45, %s3603_s15 }
 0xc1a   : > { %v1324_v0 = vpop.permute.xlu1 %1323 }
 0xc1b   : > { %v1338_v11 = vsel %vm1335_vm9, %v1334_v5, %v1324_v0 }
 0xc1c   : > { %v1340_v15 = vpack.c.bf16 %v1338_v11, %v1338_v11 }
 0xc22   : > { %v3396_v3 = vpop.permute.xlu0 %3395 }
 0xc23   : > { %v3398_v9 = vunpack.i.h.bf16 %v3396_v3  ;;  %v3397_v10 = vunpack.i.l.bf16 %v3396_v3 }
 0xc25   : > { %v1336_v13 = vsel %vm1335_vm9, %v1332_v12, %v3397_v10  ;;  %v1337_v62 = vsel %vm1335_vm9, %v1333_v1, %v3398_v9 }
 0xc26   : > { %v1339_v14 = vpack.c.bf16 %v1337_v62, %v1336_v13 }
 0xc28   : > { %3205 = vmatprep.mubr.msk.bf16.mxu1 %vm496_vm2, %v1339_v14  ;;  %v3994_v14 = vld [vmem:[%s3699_s26 + $0x8] sm:$0xff]  }
 0xc29   : > { %3206 = vmatmul.mubr.msk.bf16.vlgmr.msra.gmra.mxu1 %vm496_vm2, %v1340_v15  ;;  %3209 = vmatprep.subr.bf16.mxu0 %v3994_v14  ;;  %v3999_v15 = vld [vmem:[%s3699_s26] sm:$0xff]  }
 0xc2a   : > { %3210 = vmatpush3.bf16.msra.mxu0 %v3994_v14 }
 0xc2b   : > { %3211 = vmatprep.subr.bf16.mxu0 %v3999_v15 }
 0xc2e   : > { %3212 = vmatpush3.bf16.msra.mxu0 %v3999_v15 }
 0xc2f   : > { %3229 = vmatprep.subr.bf16.mxu0 %v3749_v27 }
 0xce9   : > { %v3207_v18 = vpop.f32.mrf.mxu1 }
 0xcea   : > { %v1406_v19 = vadd.f32 %v3207_v18, %v3930_v16 }
 0xceb   : > { %v1397_v21 = vpop.f32.mrf.mxu1 }
 0xcec   : > { %v1398_v22 = vadd.f32 %v1397_v21, %v3930_v16  ;;  %v1417_v24 = vmul.f32 %v3935_v20, %v1406_v19 }
 0xced   : > { %v3208_v23 = vpop.f32.mrf.mxu1 }
 0xcee   : > { %v1415_v25 = vmul.f32 %v3935_v20, %v1398_v22  ;;  %v3945_v29 = vadd.f32 %v1417_v24, %v3732_v7  ;;  %v1677_v7 = vsel %vm496_vm2, %v1674_v57, 0.0 }
 0xcef   : > { %v1400_v26 = vpop.f32.mrf.mxu1 }
 0xcf0   : > { %v3941_v4 = vadd.f32 %v1415_v25, %v3730_v6  ;;  %v1401_v28 = vadd.f32 %v1400_v26, %v3930_v16  ;;  %v1427_v30 = vsel %vm503_vm3, %v3945_v29, 0.0 }
 0xcf2   : > { %v1416_v55 = vmul.f32 %v3935_v20, %v1401_v28  ;;  %v1421_v63 = vsel %vm496_vm2, %v3941_v4, 0.0 }
 0xcf3   : > { %1422 = vadd.xlane.f32.xlu0 %v1421_v63 }
 0xcf4   : > { %v3951_v54 = vadd.f32 %v1416_v55, %v3734_v8  ;;  %v1680_v8 = vsel %vm496_vm2, %v1675_v32, 0.0 }
 0xcf6   : > { %v1424_v6 = vsel %vm496_vm2, %v3951_v54, 0.0 }
 0xcf7   : > { %1425 = vadd.xlane.f32.xlu1 %v1424_v6  ;;  %1428 = vadd.xlane.f32.xlu0 %v1427_v30 }
 0xcfb   : > { %1678 = vadd.xlane.f32.xlu0 %v1677_v7  ;;  %1684 = vadd.xlane.f32.xlu1 %v1683_v31  ;;  %v1462_v7 = vsub.s32 4, %v3754_v39 }
 0xcff   : > { %1681 = vadd.xlane.f32.xlu0 %v1680_v8  ;;  %v4007_v8 = vrot.slane %v3758_v41, %v1462_v7  ;;  %v3558_v7 = vld [vmem:[%s3689_s20] ss:$0 sm:$0xff]  ;;  %s4357_s20 = smov 16  }
 0xd7c   : > { %v1423_v33 = vpop.xlane.xlu0 %1422 }
 0xd7d   : > { %v1430_v34 = vmul.f32 0.03125, %v1423_v33  ;;  %v1469_v33 = vsub.s32 5, %v3754_v39 }
 0xd7f   : > { %v3961_v35 = vsub.f32 %v3941_v4, %v1430_v34 }
 0xd80   : > { %v1426_v36 = vpop.xlane.xlu1 %1425  ;;  %v1429_v38 = vpop.xlane.xlu0 %1428 }
 0xd81   : > { %v1431_v40 = vmul.f32 0.03125, %v1426_v36  ;;  %v1432_v42 = vmul.f32 0.03125, %v1429_v38  ;;  %v1436_v43 = vmul.f32 %v3961_v35, %v3961_v35 }
 0xd83   : > { %v3966_v45 = vsub.f32 %v3951_v54, %v1431_v40  ;;  %v3969_v46 = vsub.f32 %v3945_v29, %v1432_v42  ;;  %v1439_v47 = vsel %vm496_vm2, %v1436_v43, 0.0  ;;  %v4013_v42 = vrot.slane %v3758_v41, %v1469_v33 }
 0xd84   : > { %1440 = vadd.xlane.f32.xlu0 %v1439_v47  ;;  %v1679_v48 = vpop.xlane.xlu0 %1678  ;;  %v1685_v49 = vpop.xlane.xlu1 %1684 }
 0xd85   : > { %v1686_v50 = vmul.f32 0.03125, %v1679_v48  ;;  %v1437_v52 = vmul.f32 %v3966_v45, %v3966_v45  ;;  %v1688_v53 = vmul.f32 0.03125, %v1685_v49  ;;  %v1438_v56 = vmul.f32 %v3969_v46, %v3969_v46 }
 0xd87   : > { %v3976_v59 = vsub.f32 %v1674_v57, %v1686_v50  ;;  %v1442_v60 = vsel %vm496_vm2, %v1437_v52, 0.0  ;;  %v3979_v0 = vsub.f32 %v1676_v58, %v1688_v53  ;;  %v1445_v2 = vsel %vm503_vm3, %v1438_v56, 0.0 }
 0xd88   : > { %1443 = vadd.xlane.f32.xlu1 %v1442_v60  ;;  %1446 = vadd.xlane.f32.xlu0 %v1445_v2  ;;  %v1682_v3 = vpop.xlane.xlu0 %1681 }
 0xd89   : > { %v1687_v5 = vmul.f32 0.03125, %v1682_v3  ;;  %v1692_v9 = vmul.f32 %v3976_v59, %v3976_v59  ;;  %v1694_v10 = vmul.f32 %v3979_v0, %v3979_v0 }
 0xd8b   : > { %v3986_v11 = vsub.f32 %v1675_v32, %v1687_v5  ;;  %v1695_v12 = vsel %vm496_vm2, %v1692_v9, 0.0  ;;  %v1701_v1 = vsel %vm503_vm3, %v1694_v10, 0.0  ;;  %v3556_v5 = vld [vmem:[%s3683_s17 + $0x8] sm:$0xff]   ;;  %v3557_v9 = vld [vmem:[%s3683_s17] sm:$0xff]  }
 0xd8c   : > { %1696 = vadd.xlane.f32.xlu1 %v1695_v12 }
 0xd8d   : > { %v1693_v13 = vmul.f32 %v3986_v11, %v3986_v11 }
 0xd8f   : > { %v1698_v62 = vsel %vm496_vm2, %v1693_v13, 0.0 }
 0xd90   : > { %1702 = vadd.xlane.f32.xlu1 %v1701_v1  ;;  %1699 = vadd.xlane.f32.xlu0 %v1698_v62  ;;  %v4037_v62 = vld [vmem:[%s3709_s18 + $0x18] sm:$0xff]  }
 0xd91   : > { %3217 = vmatprep.subr.bf16.mxu1 %v4037_v62 }
 0xd92   : > { %3218 = vmatpush3.bf16.msra.mxu1 %v4037_v62 }
 0xe0d   : > { %v1441_v61 = vpop.xlane.xlu0 %1440 }
 0xe0e   : > { %v1448_v17 = vmul.f32 0.03125, %v1441_v61  ;;  %v4052_v61 = vld [vmem:[%s3709_s18] sm:$0xff]  }
 0xe10   : > { %v1451_v18 = vadd.f32 1e-05, %v1448_v17  ;;  %v4061_v17 = vld [vmem:[%s438_s13] ss:$0 sm:$0xff] }
 0xe11   : > { %v1444_v19 = vpop.xlane.xlu1 %1443  ;;  %v1447_v21 = vpop.xlane.xlu0 %1446 }
 0xe12   : > { %3478 = vrsqrt.f32 %v1451_v18  ;;  %v1449_v22 = vmul.f32 0.03125, %v1444_v19  ;;  %v1450_v23 = vmul.f32 0.03125, %v1447_v21 }
 0xe14   : > { %v1452_v24 = vadd.f32 1e-05, %v1449_v22  ;;  %v1453_v25 = vadd.f32 1e-05, %v1450_v23 }
 0xe15   : > { %v1697_v26 = vpop.xlane.xlu1 %1696 }
 0xe16   : > { %3480 = vrsqrt.f32 %v1452_v24  ;;  %v1704_v28 = vmul.f32 0.03125, %v1697_v26 }
 0xe17   : > { %3482 = vrsqrt.f32 %v1453_v25 }
 0xe18   : > { %v1707_v55 = vadd.f32 1e-05, %v1704_v28 }
 0xe19   : > { %v1703_v63 = vpop.xlane.xlu1 %1702  ;;  %v1700_v57 = vpop.xlane.xlu0 %1699 }
 0xe1a   : > { %3484 = vrsqrt.f32 %v1707_v55  ;;  %v1706_v58 = vmul.f32 0.03125, %v1703_v63  ;;  %v1705_v27 = vmul.f32 0.03125, %v1700_v57 }
 0xe1c   : > { %v1709_v6 = vadd.f32 1e-05, %v1706_v58  ;;  %v1708_v30 = vadd.f32 1e-05, %v1705_v27 }
 0xe1e   : > { %3486 = vrsqrt.f32 %v1709_v6 }
 0xe1f   : > { %v3479_v31 = vpop.eup %3478  ;;  %3488 = vrsqrt.f32 %v1708_v30 }
 0xe20   : > { %v1457_v32 = vmul.f32 %v3479_v31, %v3961_v35 }
 0xe22   : > { %v1464_v40 = vmul.f32 %v4007_v8, %v1457_v32 }
 0xe23   : > { %v3481_v34 = vpop.eup %3480 }
 0xe24   : > { %v3483_v36 = vpop.eup %3482  ;;  %v1458_v38 = vmul.f32 %v3481_v34, %v3966_v45  ;;  %v1471_v49 = vadd.f32 %v4013_v42, %v1464_v40 }
 0xe25   : > { %v1459_v43 = vmul.f32 %v3483_v36, %v3969_v46 }
 0xe26   : > { %v1465_v47 = vmul.f32 %v4007_v8, %v1458_v38 }
 0xe27   : > { %v3485_v35 = vpop.eup %3484  ;;  %v1466_v48 = vmul.f32 %v4007_v8, %v1459_v43 }
 0xe28   : > { %v1472_v50 = vadd.f32 %v4013_v42, %v1465_v47  ;;  %v1713_v52 = vmul.f32 %v3485_v35, %v3976_v59 }
 0xe29   : > { %v1473_v45 = vadd.f32 %v4013_v42, %v1466_v48 }
 0xe2a   : > { %v1474_v53 = vpack.c.bf16 %v1472_v50, %v1471_v49  ;;  %v1716_v3 = vmul.f32 %v1713_v52, %v3761_v44 }
 0xe2b   : > { %v3487_v41 = vpop.eup %3486  ;;  %v1475_v56 = vpack.c.bf16 %v1473_v45, %v1473_v45 }
 0xe2c   : > { %v3489_v60 = vpop.eup %3488  ;;  %v1715_v46 = vmul.f32 %v3487_v41, %v3979_v0  ;;  %3213 = vmatprep.mubr.msk.bf16.mxu0 %vm496_vm2, %v1474_v53  ;;  %v1719_v12 = vadd.f32 %v1716_v3, %v3766_v51 }
 0xe2d   : > { %3214 = vmatmul.mubr.msk.bf16.vlgmr.msra.gmra.mxu0 %vm496_vm2, %v1475_v56  ;;  %v1714_v2 = vmul.f32 %v3489_v60, %v3986_v11 }
 0xe2e   : > { %3230 = vmatpush3.bf16.msra.mxu0 %v3556_v5  ;;  %v1718_v59 = vmul.f32 %v1715_v46, %v3761_v44 }
 0xe2f   : > { %3231 = vmatprep.subr.bf16.mxu0 %v3557_v9  ;;  %v1717_v10 = vmul.f32 %v1714_v2, %v3761_v44  ;;  %v4042_v44 = vld [vmem:[%s3709_s18 + $0x10] sm:$0xff]  }
 0xe30   : > { %v1721_v0 = vadd.f32 %v1718_v59, %v3766_v51  ;;  %3219 = vmatprep.subr.bf16.mxu1 %v4042_v44 }
 0xe31   : > { %v1720_v11 = vadd.f32 %v1717_v10, %v3766_v51  ;;  %3220 = vmatpush3.bf16.msra.mxu1 %v4042_v44  ;;  %v4047_v51 = vld [vmem:[%s3709_s18 + $0x8] sm:$0xff]  }
 0xe32   : > { %3232 = vmatpush3.bf16.msra.mxu0 %v3557_v9  ;;  %v1723_v1 = vpack.c.bf16 %v1721_v0, %v1721_v0  ;;  %3221 = vmatprep.subr.bf16.mxu1 %v4047_v51 }
 0xe33   : > { %v1722_v13 = vpack.c.bf16 %v1720_v11, %v1719_v12 }
 0xe35   : > { %3233 = vmatprep.mubr.msk.bf16.mxu0 %vm496_vm2, %v1722_v13  ;;  %3222 = vmatpush3.bf16.msra.mxu1 %v4047_v51 }
 0xe36   : > { %3234 = vmatmul.mubr.msk.bf16.vlgmr.msra.gmra.mxu0 %vm496_vm2, %v1723_v1  ;;  %3223 = vmatprep.subr.bf16.mxu1 %v4052_v61 }
 0xe39   : > { %3224 = vmatpush3.bf16.msra.mxu1 %v4052_v61 }
 0xeed   : > { %v3215_v18 = vpop.f32.mrf.mxu0 }
 0xeee   : > { %v1543_v19 = vadd.f32 %v3215_v18, %v4061_v17 }
 0xeef   : > { %v1534_v21 = vpop.f32.mrf.mxu0 }
 0xef0   : > { %v1550_v22 = vmul.f32 %v1543_v19, %v1543_v19  ;;  %v1535_v23 = vadd.f32 %v4061_v17, %v1534_v21  ;;  %v1579_v21 = vsub.s32 6, %v3754_v39 }
 0xef1   : > { %v3216_v24 = vpop.f32.mrf.mxu0 }
 0xef2   : > { %v1553_v25 = vmul.f32 %v1550_v22, %v1543_v19  ;;  %v1548_v26 = vmul.f32 %v1535_v23, %v1535_v23  ;;  %v1662_v22 = vsub.s32 7, %v3754_v39 }
 0xef3   : > { %v1537_v28 = vpop.f32.mrf.mxu0 }
 0xef4   : > { %v1556_v55 = vmul.f32 0.044715, %v1553_v25  ;;  %v1551_v63 = vmul.f32 %v1548_v26, %v1535_v23  ;;  %v1538_v57 = vadd.f32 %v4061_v17, %v1537_v28 }
 0xef6   : > { %v1559_v58 = vadd.f32 %v1556_v55, %v1543_v19  ;;  %v1554_v27 = vmul.f32 0.044715, %v1551_v63  ;;  %v1549_v6 = vmul.f32 %v1538_v57, %v1538_v57  ;;  %v3235_v30 = vpop.f32.mrf.mxu0 }
 0xef7   : > { %v1773_v31 = vadd.f32 %v3558_v7, %v3235_v30 }
 0xef8   : > { %v1562_v32 = vmul.f32 0.7978846, %v1559_v58  ;;  %v1557_v33 = vadd.f32 %v1554_v27, %v1535_v23  ;;  %v1552_v34 = vmul.f32 %v1549_v6, %v1538_v57  ;;  %v1764_v36 = vpop.f32.mrf.mxu0 }
 0xef9   : > { %v4067_v38 = vpack.c.bf16 %v1773_v31, %v1773_v31  ;;  %v1765_v49 = vadd.f32 %v3558_v7, %v1764_v36 }
 0xefa   : > { %3490 = vtanh.f32 %v1562_v32  ;;  %v1560_v40 = vmul.f32 0.7978846, %v1557_v33  ;;  %v1555_v43 = vmul.f32 0.044715, %v1552_v34  ;;  %v3236_v47 = vpop.f32.mrf.mxu0 }
 0xefb   : > { %1784 = vrot.lane.b32.xlu0 %v4067_v38, %s3589_s21 }
 0xefc   : > { %3492 = vtanh.f32 %v1560_v40  ;;  %v1558_v35 = vadd.f32 %v1555_v43, %v1538_v57  ;;  %v1767_v48 = vpop.f32.mrf.mxu0 }
 0xefd   : > { %v1768_v50 = vadd.f32 %v3558_v7, %v1767_v48 }
 0xefe   : > { %v1561_v45 = vmul.f32 0.7978846, %v1558_v35 }
 0xeff   : > { %v4071_v52 = vpack.c.bf16 %v1768_v50, %v1765_v49 }
 0xf00   : > { %3494 = vtanh.f32 %v1561_v45 }
 0xf01   : > { %1782 = vrot.lane.b32.xlu1 %v4071_v52, %s3589_s21  ;;  %3241 = vmatprep.mubr.msk.bf16.mxu0 %vm634_vm4, %v4071_v52 }
 0xf07   : > { %v3491_v53 = vpop.eup %3490 }
 0xf08   : > { %v1568_v56 = vadd.f32 1.0, %v3491_v53 }
 0xf09   : > { %v3493_v41 = vpop.eup %3492 }
 0xf0a   : > { %v1566_v60 = vadd.f32 1.0, %v3493_v41  ;;  %v1571_v2 = vmul.f32 0.5, %v1568_v56 }
 0xf0c   : > { %v1569_v3 = vmul.f32 0.5, %v1566_v60  ;;  %v1574_v9 = vmul.f32 %v1571_v2, %v1543_v19 }
 0xf0d   : > { %v3495_v46 = vpop.eup %3494 }
 0xf0e   : > { %v1567_v5 = vadd.f32 1.0, %v3495_v46  ;;  %v1572_v10 = vmul.f32 %v1569_v3, %v1535_v23  ;;  %v1576_v11 = vpack.c.bf16 %v1574_v9, %v1574_v9  ;;  %v3559_v23 = vld [vmem:[%s3678_s14] sm:$0xff]  ;;  %s4356_s14 = smov 104  }
 0xf0f   : > { %v4088_v24 = vrot.slane %v3559_v23, %v1579_v21  ;;  %v4090_v25 = vrot.slane %v3559_v23, %v1662_v22 }
 0xf10   : > { %v1570_v59 = vmul.f32 0.5, %v1567_v5 }
 0xf12   : > { %v1573_v0 = vmul.f32 %v1570_v59, %v1538_v57 }
 0xf14   : > { %v1575_v12 = vpack.c.bf16 %v1573_v0, %v1572_v10 }
 0xf16   : > { %3225 = vmatprep.mubr.msk.bf16.mxu1 %vm1605_vm10, %v1575_v12 }
 0xf17   : > { %3226 = vmatmul.mubr.msk.bf16.vlgmr.msra.gmra.mxu1 %vm1605_vm10, %v1576_v11 }
 0xf6d   : > { %v1785_v1 = vpop.permute.xlu0 %1784 }
 0xf6e   : > { %v1796_v13 = vsel %vm634_vm4, %v1785_v1, 0  ;;  %3337 = vmatprep.subr.msk.bf16.mxu0 %vm634_vm4, %v1785_v1 }
 0xf6f   : > { %3238 = vmatpush3.bf16.xpose.msra.mxu0 %v1796_v13 }
 0xf73   : > { %v1783_v18 = vpop.permute.xlu1 %1782 }
 0xf74   : > { %3338 = vmatprep.subr.msk.bf16.mxu0 %vm634_vm4, %v1783_v18  ;;  %v1793_v19 = vsel %vm634_vm4, %v1783_v18, 0 }
 0xf77   : > { %3240 = vmatpush3.bf16.xpose.msra.mxu0 %v1793_v19 }
 0xf7e   : > { %3242 = vmatmul.mubr.msk.bf16.vlgmr.msra.gmra.mxu0 %vm634_vm4, %v4067_v38 }
 0xfd7   : > { %v3227_v26 = vpop.f32.mrf.mxu1 }
 0xfd8   : > { %v1655_v28 = vadd.f32 %v3227_v26, %v4088_v24 }
 0xfd9   : > { %v1646_v55 = vpop.f32.mrf.mxu1 }
 0xfda   : > { %v1666_v63 = vmul.f32 %v4090_v25, %v1655_v28  ;;  %v1647_v57 = vadd.f32 %v1646_v55, %v4088_v24 }
 0xfdb   : > { %v3228_v58 = vpop.f32.mrf.mxu1 }
 0xfdc   : > { %v1669_v27 = vadd.f32 %v1666_v63, %v3945_v29  ;;  %v1664_v6 = vmul.f32 %v4090_v25, %v1647_v57 }
 0xfdd   : > { %v1649_v30 = vpop.f32.mrf.mxu1 }
 0xfde   : > { %1672 = vst.msk [vmem:[#allocation2 + $0x10] sm:$0x1] %vm503_vm3, %v1669_v27  ;;  %v1667_v39 = vadd.f32 %v1664_v6, %v3941_v4  ;;  %v1650_v7 = vadd.f32 %v1649_v30, %v4088_v24 }
 0xfe0   : > { %1670 = vst.msk [vmem:[#allocation2] sm:$0xff] %vm496_vm2, %v1667_v39  ;;  %v1665_v31 = vmul.f32 %v4090_v25, %v1650_v7 }
 0xfe2   : > { %v1668_v32 = vadd.f32 %v1665_v31, %v3951_v54 }
 0xfe4   : > { %1671 = vst.msk [vmem:[#allocation2 + $0x8] sm:$0xff] %vm496_vm2, %v1668_v32 }
0x103e   : > { %v3243_v33 = vpop.f32.mrf.mxu0 }
0x103f   : > { %v1852_v4 = vsel %vm702_vm6, %v3243_v33, -inf }
0x1040   : > { %v1832_v34 = vpop.f32.mrf.mxu0 }
0x1041   : > { %v1846_v29 = vsel %vm695_vm5, %v1832_v34, -inf }
0x1042   : > { %1847 = vmax.xlane.f32.xlu1 %v1846_v29  ;;  %v3244_v36 = vpop.f32.mrf.mxu0 }
0x1044   : > { %v1835_v40 = vpop.f32.mrf.mxu0 }
0x1045   : > { %v1849_v43 = vsel %vm695_vm5, %v1835_v40, -inf }
0x1046   : > { %1850 = vmax.xlane.f32.xlu0 %v1849_v43 }
0x104a   : > { %1853 = vmax.xlane.f32.xlu0 %v1852_v4 }
0x10cb   : > { %v1848_v47 = vpop.xlane.xlu1 %1847 }
0x10cc   : > { %v1855_v49 = vsub.f32 %v1832_v34, %v1848_v47 }
0x10ce   : > { %v1858_v53 = vmul.f32 1.442695, %v1855_v49 }
0x10cf   : > { %v1851_v35 = vpop.xlane.xlu0 %1850 }
0x10d0   : > { %v1856_v48 = vsub.f32 %v1835_v40, %v1851_v35 }
0x10d2   : > { %v1860_v54 = vmul.f32 1.442695, %v1856_v48 }
0x10d3   : > { %v1854_v50 = vpop.xlane.xlu0 %1853 }
0x10d4   : > { %3496 = vpow2.f32 %v1860_v54  ;;  %v1857_v45 = vsub.f32 %v3243_v33, %v1854_v50 }
0x10d6   : > { %v1862_v41 = vmul.f32 1.442695, %v1857_v45 }
0x10d8   : > { %3498 = vpow2.f32 %v1862_v41 }
0x10d9   : > { %3500 = vpow2.f32 %v1858_v53 }
0x10e1   : > { %v3497_v56 = vpop.eup %3496 }
0x10e2   : > { %v1867_v60 = vsel %vm695_vm5, %v3497_v56, 0.0 }
0x10e3   : > { %1868 = vadd.xlane.f32.xlu0 %v1867_v60 }
0x10e5   : > { %v3499_v46 = vpop.eup %3498 }
0x10e6   : > { %v1870_v2 = vsel %vm702_vm6, %v3499_v46, 0.0  ;;  %v3501_v3 = vpop.eup %3500 }
0x10e7   : > { %1871 = vadd.xlane.f32.xlu1 %v1870_v2  ;;  %v1864_v5 = vsel %vm695_vm5, %v3501_v3, 0.0 }
0x10eb   : > { %1865 = vadd.xlane.f32.xlu1 %v1864_v5 }
0x10f9   : > { %1883 = vrot.lane.b32.xlu0 %v4067_v38, %s3590_s11 }
0x10fc   : > { %1881 = vrot.lane.b32.xlu1 %v4071_v52, %s3590_s11 }
0x10fd   : > { %1943 = vrot.lane.b32.xlu0 %v4071_v52, %s3591_s22 }
0x1100   : > { %1949 = vrot.lane.b32.xlu1 %v4067_v38, %s3592_s24 }
0x1104   : > { %1947 = vrot.lane.b32.xlu1 %v4071_v52, %s3592_s24 }
0x1108   : > { %1945 = vrot.lane.b32.xlu1 %v4067_v38, %s3591_s22 }
0x116c   : > { %v1869_v59 = vpop.xlane.xlu0 %1868 }
0x1170   : > { %v1872_v9 = vpop.xlane.xlu1 %1871  ;;  %v1884_v10 = vpop.permute.xlu0 %1883 }
0x1171   : > { %v1893_v0 = vand.u32 %v1884_v10, %v3810_v37  ;;  %3502 = vrcp.f32 %v1872_v9 }
0x1172   : > { %3504 = vrcp.f32 %v1869_v59 }
0x1173   : > { %3245 = vmatprep.subr.bf16.mxu1 %v1893_v0 }
0x1174   : > { %v1866_v12 = vpop.xlane.xlu1 %1865  ;;  %3246 = vmatpush3.bf16.msra.mxu1 %v1893_v0  ;;  %v1944_v55 = vpop.permute.xlu0 %1943 }
0x1175   : > { %3506 = vrcp.f32 %v1866_v12 }
0x1178   : > { %v1882_v11 = vpop.permute.xlu1 %1881 }
0x1179   : > { %3247 = vmatprep.subr.bf16.mxu1 %v1882_v11 }
0x117a   : > { %3248 = vmatpush3.bf16.msra.mxu1 %v1882_v11 }
0x117c   : > { %v1950_v1 = vpop.permute.xlu1 %1949 }
0x117d   : > { %3339 = vmatprep.subr.msk.bf16.mxu1 %vm634_vm4, %v1950_v1  ;;  %v1961_v63 = vsel %vm634_vm4, %v1950_v1, 0 }
0x117e   : > { %v3503_v13 = vpop.eup %3502 }
0x117f   : > { %v3505_v18 = vpop.eup %3504  ;;  %v1878_v21 = vmul.f32 %v3503_v13, %v3499_v46 }
0x1180   : > { %v1877_v23 = vmul.f32 %v3505_v18, %v3497_v56  ;;  %v1948_v57 = vpop.permute.xlu1 %1947 }
0x1181   : > { %v1880_v28 = vpack.c.bf16 %v1878_v21, %v1878_v21  ;;  %v1958_v58 = vsel %vm634_vm4, %v1948_v57, 0 }
0x1182   : > { %v3507_v19 = vpop.eup %3506 }
0x1183   : > { %v1876_v22 = vmul.f32 %v3507_v19, %v3501_v3 }
0x1184   : > { %v1946_v27 = vpop.permute.xlu1 %1945 }
0x1185   : > { %v1879_v26 = vpack.c.bf16 %v1877_v23, %v1876_v22 }
0x1187   : > { %3249 = vmatprep.mubr.msk.bf16.mxu1 %vm695_vm5, %v1879_v26 }
0x1188   : > { %3250 = vmatmul.mubr.msk.bf16.vlgmr.msra.gmra.mxu1 %vm695_vm5, %v1880_v28 }
0x1189   : > { %3254 = vmatpush3.bf16.xpose.msra.mxu1 %v1961_v63  ;;  %3257 = vmatprep.mubr.msk.bf16.mxu1 %vm634_vm4, %v1944_v55 }
0x118a   : > { %3340 = vmatprep.subr.msk.bf16.mxu1 %vm634_vm4, %v1948_v57 }
0x1191   : > { %3256 = vmatpush3.bf16.xpose.msra.mxu1 %v1958_v58 }
0x1198   : > { %3258 = vmatmul.mubr.msk.bf16.vlgmr.msra.gmra.mxu1 %vm634_vm4, %v1946_v27 }
0x1248   : > { %v4131_v6 = vpop.f32.mrf.mxu1 }
0x124a   : > { %v4133_v30 = vpop.f32.mrf.mxu1 }
0x124c   : > { %v3252_v39 = vpop.f32.mrf.mxu1 }
0x124e   : > { %v4135_v7 = vpop.f32.mrf.mxu1 }
0x1258   : > { %v3259_v31 = vpop.f32.mrf.mxu1 }
0x1259   : > { %v2017_v36 = vsel %vm702_vm6, %v3259_v31, -inf }
0x125a   : > { %v1997_v32 = vpop.f32.mrf.mxu1 }
0x125b   : > { %v2011_v33 = vsel %vm695_vm5, %v1997_v32, -inf }
0x125c   : > { %2012 = vmax.xlane.f32.xlu0 %v2011_v33  ;;  %v3260_v34 = vpop.f32.mrf.mxu1 }
0x125e   : > { %v2000_v29 = vpop.f32.mrf.mxu1 }
0x125f   : > { %v2014_v40 = vsel %vm695_vm5, %v2000_v29, -inf }
0x1260   : > { %2018 = vmax.xlane.f32.xlu0 %v2017_v36  ;;  %2015 = vmax.xlane.f32.xlu1 %v2014_v40 }
0x12e5   : > { %v2013_v43 = vpop.xlane.xlu0 %2012 }
0x12e6   : > { %v2020_v4 = vsub.f32 %v1997_v32, %v2013_v43 }
0x12e8   : > { %v2023_v47 = vmul.f32 1.442695, %v2020_v4 }
0x12e9   : > { %v2019_v35 = vpop.xlane.xlu0 %2018  ;;  %v2016_v48 = vpop.xlane.xlu1 %2015 }
0x12ea   : > { %3508 = vpow2.f32 %v2023_v47  ;;  %v2022_v49 = vsub.f32 %v3259_v31, %v2019_v35  ;;  %v2021_v54 = vsub.f32 %v2000_v29, %v2016_v48 }
0x12ec   : > { %v2027_v50 = vmul.f32 1.442695, %v2022_v49  ;;  %v2025_v45 = vmul.f32 1.442695, %v2021_v54 }
0x12ee   : > { %3510 = vpow2.f32 %v2027_v50 }
0x12ef   : > { %3512 = vpow2.f32 %v2025_v45 }
0x12f7   : > { %v3509_v53 = vpop.eup %3508 }
0x12f8   : > { %v2029_v41 = vsel %vm695_vm5, %v3509_v53, 0.0 }
0x12f9   : > { %2030 = vadd.xlane.f32.xlu0 %v2029_v41 }
0x12fb   : > { %v3511_v56 = vpop.eup %3510 }
0x12fc   : > { %v3513_v60 = vpop.eup %3512  ;;  %v2035_v46 = vsel %vm702_vm6, %v3511_v56, 0.0 }
0x12fd   : > { %2036 = vadd.xlane.f32.xlu1 %v2035_v46  ;;  %v2032_v2 = vsel %vm695_vm5, %v3513_v60, 0.0 }
0x12fe   : > { %2033 = vadd.xlane.f32.xlu0 %v2032_v2 }
0x130e   : > { %2046 = vrot.lane.b32.xlu1 %v4071_v52, %s3594_s25 }
0x1312   : > { %2114 = vrot.lane.b32.xlu1 %v4067_v38, %s3595_s1 }
0x1314   : > { %2048 = vrot.lane.b32.xlu0 %v4067_v38, %s3594_s25 }
0x1316   : > { %2112 = vrot.lane.b32.xlu1 %v4071_v52, %s3595_s1 }
0x1318   : > { %2108 = vrot.lane.b32.xlu0 %v4071_v52, %s3596_s10 }
0x131a   : > { %2110 = vrot.lane.b32.xlu1 %v4067_v38, %s3596_s10 }
0x1382   : > { %v2031_v3 = vpop.xlane.xlu0 %2030 }
0x1383   : > { %3514 = vrcp.f32 %v2031_v3 }
0x1386   : > { %v2037_v5 = vpop.xlane.xlu1 %2036 }
0x1387   : > { %v2034_v59 = vpop.xlane.xlu0 %2033  ;;  %3516 = vrcp.f32 %v2037_v5 }
0x1388   : > { %3518 = vrcp.f32 %v2034_v59 }
0x138a   : > { %v2047_v0 = vpop.permute.xlu1 %2046 }
0x138b   : > { %v2049_v9 = vpop.permute.xlu0 %2048 }
0x138c   : > { %v2058_v10 = vand.u32 %v2049_v9, %v3810_v37 }
0x138e   : > { %3261 = vmatprep.subr.bf16.mxu0 %v2058_v10  ;;  %v2115_v11 = vpop.permute.xlu1 %2114 }
0x138f   : > { %3262 = vmatpush3.bf16.msra.mxu0 %v2058_v10  ;;  %v2109_v26 = vpop.permute.xlu0 %2108  ;;  %v2126_v28 = vsel %vm634_vm4, %v2115_v11, 0 }
0x1390   : > { %3263 = vmatprep.subr.bf16.mxu0 %v2047_v0  ;;  %v3515_v12 = vpop.eup %3514 }
0x1391   : > { %v2041_v19 = vmul.f32 %v3515_v12, %v3509_v53 }
0x1392   : > { %v2113_v55 = vpop.permute.xlu1 %2112 }
0x1393   : > { %3264 = vmatpush3.bf16.msra.mxu0 %v2047_v0  ;;  %v2123_v63 = vsel %vm634_vm4, %v2113_v55, 0 }
0x1394   : > { %v3517_v1 = vpop.eup %3516  ;;  %3341 = vmatprep.subr.msk.bf16.mxu0 %vm634_vm4, %v2115_v11 }
0x1395   : > { %v3519_v13 = vpop.eup %3518  ;;  %v2043_v18 = vmul.f32 %v3517_v1, %v3511_v56 }
0x1396   : > { %v2042_v21 = vmul.f32 %v3519_v13, %v3513_v60  ;;  %v2111_v57 = vpop.permute.xlu1 %2110 }
0x1397   : > { %v2045_v22 = vpack.c.bf16 %v2043_v18, %v2043_v18 }
0x1398   : > { %v2044_v23 = vpack.c.bf16 %v2042_v21, %v2041_v19 }
0x139a   : > { %3265 = vmatprep.mubr.msk.bf16.mxu0 %vm695_vm5, %v2044_v23 }
0x139b   : > { %3266 = vmatmul.mubr.msk.bf16.vlgmr.msra.gmra.mxu0 %vm695_vm5, %v2045_v22 }
0x139c   : > { %3270 = vmatpush3.bf16.xpose.msra.mxu0 %v2126_v28  ;;  %3273 = vmatprep.mubr.msk.bf16.mxu0 %vm634_vm4, %v2109_v26 }
0x139d   : > { %3342 = vmatprep.subr.msk.bf16.mxu0 %vm634_vm4, %v2113_v55 }
0x13a4   : > { %3272 = vmatpush3.bf16.xpose.msra.mxu0 %v2123_v63 }
0x13ab   : > { %3274 = vmatmul.mubr.msk.bf16.vlgmr.msra.gmra.mxu0 %vm634_vm4, %v2111_v57 }
0x145b   : > { %v4164_v58 = vpop.f32.mrf.mxu0 }
0x145d   : > { %v4166_v27 = vpop.f32.mrf.mxu0 }
0x145f   : > { %v3268_v39 = vpop.f32.mrf.mxu0 }
0x1461   : > { %v4168_v31 = vpop.f32.mrf.mxu0 }
0x1462   : > { %v3399_v32 = vpack.i.bf16 %v4168_v31, %v4166_v27 }
0x146b   : > { %v3275_v33 = vpop.f32.mrf.mxu0 }
0x146c   : > { %v2182_v43 = vsel %vm702_vm6, %v3275_v33, -inf }
0x146d   : > { %v2162_v34 = vpop.f32.mrf.mxu0 }
0x146e   : > { %v2176_v29 = vsel %vm695_vm5, %v2162_v34, -inf }
0x146f   : > { %2177 = vmax.xlane.f32.xlu0 %v2176_v29  ;;  %v3276_v36 = vpop.f32.mrf.mxu0 }
0x1471   : > { %v2165_v40 = vpop.f32.mrf.mxu0 }
0x1472   : > { %v2179_v4 = vsel %vm695_vm5, %v2165_v40, -inf }
0x1473   : > { %2183 = vmax.xlane.f32.xlu0 %v2182_v43  ;;  %2180 = vmax.xlane.f32.xlu1 %v2179_v4 }
0x14f8   : > { %v2178_v47 = vpop.xlane.xlu0 %2177 }
0x14f9   : > { %v2185_v35 = vsub.f32 %v2162_v34, %v2178_v47 }
0x14fb   : > { %v2188_v48 = vmul.f32 1.442695, %v2185_v35 }
0x14fc   : > { %v2184_v49 = vpop.xlane.xlu0 %2183  ;;  %v2181_v54 = vpop.xlane.xlu1 %2180 }
0x14fd   : > { %3520 = vpow2.f32 %v2188_v48  ;;  %v2187_v50 = vsub.f32 %v3275_v33, %v2184_v49  ;;  %v2186_v45 = vsub.f32 %v2165_v40, %v2181_v54 }
0x14ff   : > { %v2192_v53 = vmul.f32 1.442695, %v2187_v50  ;;  %v2190_v41 = vmul.f32 1.442695, %v2186_v45 }
0x1501   : > { %3522 = vpow2.f32 %v2192_v53 }
0x1502   : > { %3524 = vpow2.f32 %v2190_v41 }
0x150a   : > { %v3521_v56 = vpop.eup %3520 }
0x150b   : > { %v2194_v60 = vsel %vm695_vm5, %v3521_v56, 0.0 }
0x150c   : > { %2195 = vadd.xlane.f32.xlu0 %v2194_v60 }
0x150e   : > { %v3523_v46 = vpop.eup %3522 }
0x150f   : > { %v3525_v2 = vpop.eup %3524  ;;  %v2200_v3 = vsel %vm702_vm6, %v3523_v46, 0.0 }
0x1510   : > { %2201 = vadd.xlane.f32.xlu1 %v2200_v3  ;;  %v2197_v5 = vsel %vm695_vm5, %v3525_v2, 0.0 }
0x1511   : > { %2198 = vadd.xlane.f32.xlu0 %v2197_v5 }
0x1521   : > { %2211 = vrot.lane.b32.xlu1 %v4071_v52, %s3597_s12 }
0x1525   : > { %2279 = vrot.lane.b32.xlu1 %v4067_v38, %s4355_s9 }
0x1527   : > { %2213 = vrot.lane.b32.xlu0 %v4067_v38, %s3597_s12 }
0x1529   : > { %2277 = vrot.lane.b32.xlu1 %v4071_v52, %s4355_s9 }
0x152b   : > { %2273 = vrot.lane.b32.xlu0 %v4071_v52, %s4356_s14 }
0x152d   : > { %2275 = vrot.lane.b32.xlu1 %v4067_v38, %s4356_s14 }
0x1595   : > { %v2196_v59 = vpop.xlane.xlu0 %2195 }
0x1596   : > { %3526 = vrcp.f32 %v2196_v59 }
0x1599   : > { %v2202_v9 = vpop.xlane.xlu1 %2201 }
0x159a   : > { %v2199_v10 = vpop.xlane.xlu0 %2198  ;;  %3528 = vrcp.f32 %v2202_v9 }
0x159b   : > { %3530 = vrcp.f32 %v2199_v10 }
0x159d   : > { %v2212_v11 = vpop.permute.xlu1 %2211 }
0x159e   : > { %v2214_v0 = vpop.permute.xlu0 %2213 }
0x159f   : > { %v2223_v12 = vand.u32 %v2214_v0, %v3810_v37 }
0x15a1   : > { %3277 = vmatprep.subr.bf16.mxu1 %v2223_v12  ;;  %v2280_v13 = vpop.permute.xlu1 %2279 }
0x15a2   : > { %3278 = vmatpush3.bf16.msra.mxu1 %v2223_v12  ;;  %v2274_v55 = vpop.permute.xlu0 %2273  ;;  %v2291_v63 = vsel %vm634_vm4, %v2280_v13, 0 }
0x15a3   : > { %3279 = vmatprep.subr.bf16.mxu1 %v2212_v11  ;;  %v3527_v1 = vpop.eup %3526 }
0x15a4   : > { %v2206_v22 = vmul.f32 %v3527_v1, %v3521_v56 }
0x15a5   : > { %v2278_v57 = vpop.permute.xlu1 %2277 }
0x15a6   : > { %3280 = vmatpush3.bf16.msra.mxu1 %v2212_v11  ;;  %v2288_v39 = vsel %vm634_vm4, %v2278_v57, 0 }
0x15a7   : > { %v3529_v18 = vpop.eup %3528  ;;  %3343 = vmatprep.subr.msk.bf16.mxu1 %vm634_vm4, %v2280_v13 }
0x15a8   : > { %v3531_v19 = vpop.eup %3530  ;;  %v2208_v21 = vmul.f32 %v3529_v18, %v3523_v46 }
0x15a9   : > { %v2207_v23 = vmul.f32 %v3531_v19, %v3525_v2  ;;  %v2276_v33 = vpop.permute.xlu1 %2275 }
0x15aa   : > { %v2210_v26 = vpack.c.bf16 %v2208_v21, %v2208_v21 }
0x15ab   : > { %v2209_v28 = vpack.c.bf16 %v2207_v23, %v2206_v22 }
0x15ad   : > { %3281 = vmatprep.mubr.msk.bf16.mxu1 %vm695_vm5, %v2209_v28 }
0x15ae   : > { %3282 = vmatmul.mubr.msk.bf16.vlgmr.msra.gmra.mxu1 %vm695_vm5, %v2210_v26 }
0x15af   : > { %3286 = vmatpush3.bf16.xpose.msra.mxu1 %v2291_v63  ;;  %3289 = vmatprep.mubr.msk.bf16.mxu1 %vm634_vm4, %v2274_v55 }
0x15b0   : > { %3344 = vmatprep.subr.msk.bf16.mxu1 %vm634_vm4, %v2278_v57 }
0x15b7   : > { %3288 = vmatpush3.bf16.xpose.msra.mxu1 %v2288_v39 }
0x15b8   : > { %3309 = vmatprep.subr.bf16.mxu1 %v3994_v14 }
0x15be   : > { %3290 = vmatmul.mubr.msk.bf16.vlgmr.msra.gmra.mxu1 %vm634_vm4, %v2276_v33 }
0x15bf   : > { %3310 = vmatpush3.bf16.msra.mxu1 %v3994_v14 }
0x15c0   : > { %3311 = vmatprep.subr.bf16.mxu1 %v3999_v15 }
0x15c3   : > { %3312 = vmatpush3.bf16.msra.mxu1 %v3999_v15 }
0x166e   : > { %v3283_v34 = vpop.f32.mrf.mxu1 }
0x1670   : > { %v2259_v29 = vpop.f32.mrf.mxu1 }
0x1672   : > { %v3284_v36 = vpop.f32.mrf.mxu1 }
0x1674   : > { %v2262_v40 = vpop.f32.mrf.mxu1 }
0x1675   : > { %v3404_v43 = vpack.i.bf16 %v2262_v40, %v2259_v29 }
0x167e   : > { %v3291_v4 = vpop.f32.mrf.mxu1 }
0x167f   : > { %v2347_v54 = vsel %vm702_vm6, %v3291_v4, -inf }
0x1680   : > { %v2327_v47 = vpop.f32.mrf.mxu1 }
0x1681   : > { %v2341_v35 = vsel %vm695_vm5, %v2327_v47, -inf }
0x1682   : > { %2342 = vmax.xlane.f32.xlu0 %v2341_v35  ;;  %v3292_v48 = vpop.f32.mrf.mxu1 }
0x1684   : > { %v2330_v49 = vpop.f32.mrf.mxu1 }
0x1685   : > { %v2344_v14 = vsel %vm695_vm5, %v2330_v49, -inf }
0x1686   : > { %2348 = vmax.xlane.f32.xlu0 %v2347_v54  ;;  %2345 = vmax.xlane.f32.xlu1 %v2344_v14 }
0x170b   : > { %v2343_v50 = vpop.xlane.xlu0 %2342 }
0x170c   : > { %v2350_v15 = vsub.f32 %v2327_v47, %v2343_v50 }
0x170e   : > { %v2353_v45 = vmul.f32 1.442695, %v2350_v15 }
0x170f   : > { %v2349_v53 = vpop.xlane.xlu0 %2348  ;;  %v2346_v41 = vpop.xlane.xlu1 %2345 }
0x1710   : > { %3532 = vpow2.f32 %v2353_v45  ;;  %v2352_v56 = vsub.f32 %v3291_v4, %v2349_v53  ;;  %v2351_v60 = vsub.f32 %v2330_v49, %v2346_v41 }
0x1712   : > { %v2357_v46 = vmul.f32 1.442695, %v2352_v56  ;;  %v2355_v2 = vmul.f32 1.442695, %v2351_v60 }
0x1714   : > { %3534 = vpow2.f32 %v2357_v46 }
0x1715   : > { %3536 = vpow2.f32 %v2355_v2 }
0x171d   : > { %v3533_v3 = vpop.eup %3532 }
0x171e   : > { %v2359_v5 = vsel %vm695_vm5, %v3533_v3, 0.0 }
0x171f   : > { %2360 = vadd.xlane.f32.xlu0 %v2359_v5 }
0x1721   : > { %v3535_v59 = vpop.eup %3534 }
0x1722   : > { %v3537_v9 = vpop.eup %3536  ;;  %v2365_v10 = vsel %vm702_vm6, %v3535_v59, 0.0 }
0x1723   : > { %2366 = vadd.xlane.f32.xlu1 %v2365_v10  ;;  %v2362_v0 = vsel %vm695_vm5, %v3537_v9, 0.0 }
0x1724   : > { %2363 = vadd.xlane.f32.xlu0 %v2362_v0  ;;  %v3563_v0 = vld [vmem:[#allocation2 + $0x28] sm:$0x1] }
0x1734   : > { %2376 = vrot.lane.b32.xlu1 %v4071_v52, %s3600_s19 }
0x1738   : > { %3400 = vrot.lane.b32.xlu1 %v3399_v32, %s3601_s16  ;;  %v3560_v32 = vld [vmem:[%s3694_s23 + $0x8] sm:$0xff]  }
0x173a   : > { %2378 = vrot.lane.b32.xlu0 %v4067_v38, %s3600_s19 }
0x173c   : > { %2445 = vrot.lane.b32.xlu1 %v4164_v58, %s3601_s16 }
0x173e   : > { %3405 = vrot.lane.b32.xlu0 %v3404_v43, %s4357_s20 }
0x1740   : > { %2457 = vrot.lane.b32.xlu1 %v3283_v34, %s4357_s20 }
0x17a8   : > { %v2361_v12 = vpop.xlane.xlu0 %2360 }
0x17a9   : > { %3538 = vrcp.f32 %v2361_v12 }
0x17ac   : > { %v2367_v11 = vpop.xlane.xlu1 %2366 }
0x17ad   : > { %v2364_v52 = vpop.xlane.xlu0 %2363  ;;  %3540 = vrcp.f32 %v2367_v11 }
0x17ae   : > { %3542 = vrcp.f32 %v2364_v52  ;;  %v3564_v52 = vld [vmem:[#allocation2 + $0x20] sm:$0xff] }
0x17b0   : > { %v2377_v31 = vpop.permute.xlu1 %2376 }
0x17b1   : > { %v2379_v1 = vpop.permute.xlu0 %2378 }
0x17b2   : > { %v2388_v27 = vand.u32 %v2379_v1, %v3810_v37  ;;  %v3561_v37 = vld [vmem:[%s3694_s23] sm:$0xff]  }
0x17b4   : > { %3293 = vmatprep.subr.bf16.mxu0 %v2388_v27  ;;  %v3401_v39 = vpop.permute.xlu1 %3400 }
0x17b5   : > { %3294 = vmatpush3.bf16.msra.mxu0 %v2388_v27  ;;  %v3406_v34 = vpop.permute.xlu0 %3405  ;;  %v3403_v29 = vunpack.i.h.bf16 %v3401_v39  ;;  %v3402_v36 = vunpack.i.l.bf16 %v3401_v39 }
0x17b6   : > { %3295 = vmatprep.subr.bf16.mxu0 %v2377_v31  ;;  %v3539_v38 = vpop.eup %3538  ;;  %v3408_v43 = vunpack.i.h.bf16 %v3406_v34  ;;  %v3407_v4 = vunpack.i.l.bf16 %v3406_v34 }
0x17b7   : > { %v2371_v19 = vmul.f32 %v3539_v38, %v3533_v3  ;;  %v2475_v47 = vsel %vm634_vm4, %v4135_v7, %v3403_v29  ;;  %v2474_v35 = vsel %vm634_vm4, %v4133_v30, %v3402_v36 }
0x17b8   : > { %v2446_v33 = vpop.permute.xlu1 %2445  ;;  %v2477_v53 = vsel %vm1331_vm8, %v2474_v35, %v3407_v4  ;;  %v2478_v41 = vsel %vm1331_vm8, %v2475_v47, %v3408_v43 }
0x17b9   : > { %3296 = vmatpush3.bf16.msra.mxu0 %v2377_v31  ;;  %v2476_v49 = vsel %vm634_vm4, %v4131_v6, %v2446_v33 }
0x17ba   : > { %v3541_v58 = vpop.eup %3540  ;;  %3301 = vmatprep.subr.bf16.mxu0 %v3560_v32 }
0x17bb   : > { %v3543_v13 = vpop.eup %3542  ;;  %v2373_v18 = vmul.f32 %v3541_v58, %v3535_v59 }
0x17bc   : > { %v2372_v21 = vmul.f32 %v3543_v13, %v3537_v9  ;;  %v2458_v40 = vpop.permute.xlu1 %2457  ;;  %v3562_v9 = vld [vmem:[#allocation2 + $0x18] sm:$0xff] }
0x17bd   : > { %v2375_v22 = vpack.c.bf16 %v2373_v18, %v2373_v18  ;;  %v2479_v14 = vsel %vm1331_vm8, %v2476_v49, %v2458_v40 }
0x17be   : > { %v2374_v23 = vpack.c.bf16 %v2372_v21, %v2371_v19 }
0x17c0   : > { %3297 = vmatprep.mubr.msk.bf16.mxu0 %vm695_vm5, %v2374_v23 }
0x17c1   : > { %3298 = vmatmul.mubr.msk.bf16.vlgmr.msra.gmra.mxu0 %vm695_vm5, %v2375_v22 }
0x17c2   : > { %3302 = vmatpush3.bf16.msra.mxu0 %v3560_v32 }
0x17c3   : > { %3303 = vmatprep.subr.bf16.mxu0 %v3561_v37 }
0x17c6   : > { %3304 = vmatpush3.bf16.msra.mxu0 %v3561_v37 }
0x17c7   : > { %3317 = vmatprep.subr.bf16.mxu0 %v4037_v62 }
0x1881   : > { %v3299_v26 = vpop.f32.mrf.mxu0 }
0x1882   : > { %2469 = vrot.lane.b32.xlu1 %v3299_v26, %s3603_s15 }
0x1883   : > { %v2424_v28 = vpop.f32.mrf.mxu0 }
0x1885   : > { %v3300_v55 = vpop.f32.mrf.mxu0 }
0x1887   : > { %v2427_v63 = vpop.f32.mrf.mxu0 }
0x1888   : > { %v3409_v57 = vpack.i.bf16 %v2427_v63, %v2424_v28 }
0x188a   : > { %3410 = vrot.lane.b32.xlu0 %v3409_v57, %s3603_s15 }
0x18f4   : > { %v2470_v48 = vpop.permute.xlu1 %2469 }
0x18f5   : > { %v2482_v45 = vsel %vm1335_vm9, %v2479_v14, %v2470_v48 }
0x18f6   : > { %v2484_v60 = vpack.c.bf16 %v2482_v45, %v2482_v45 }
0x18fc   : > { %v3411_v54 = vpop.permute.xlu0 %3410 }
0x18fd   : > { %v3413_v50 = vunpack.i.h.bf16 %v3411_v54  ;;  %v3412_v15 = vunpack.i.l.bf16 %v3411_v54 }
0x18ff   : > { %v2480_v7 = vsel %vm1335_vm9, %v2477_v53, %v3412_v15  ;;  %v2481_v56 = vsel %vm1335_vm9, %v2478_v41, %v3413_v50 }
0x1900   : > { %v2483_v30 = vpack.c.bf16 %v2481_v56, %v2480_v7 }
0x1902   : > { %3305 = vmatprep.mubr.msk.bf16.mxu0 %vm496_vm2, %v2483_v30 }
0x1903   : > { %3306 = vmatmul.mubr.msk.bf16.vlgmr.msra.gmra.mxu0 %vm496_vm2, %v2484_v60 }
0x1904   : > { %3318 = vmatpush3.bf16.msra.mxu0 %v4037_v62 }
0x1905   : > { %3319 = vmatprep.subr.bf16.mxu0 %v4042_v44 }
0x1908   : > { %3320 = vmatpush3.bf16.msra.mxu0 %v4042_v44 }
0x1909   : > { %3321 = vmatprep.subr.bf16.mxu0 %v4047_v51 }
0x190c   : > { %3322 = vmatpush3.bf16.msra.mxu0 %v4047_v51 }
0x190d   : > { %3323 = vmatprep.subr.bf16.mxu0 %v4052_v61 }
0x1910   : > { %3324 = vmatpush3.bf16.msra.mxu0 %v4052_v61 }
0x19c3   : > { %v3307_v6 = vpop.f32.mrf.mxu0 }
0x19c4   : > { %v2534_v46 = vadd.f32 %v3307_v6, %v3930_v16 }
0x19c5   : > { %v2525_v2 = vpop.f32.mrf.mxu0 }
0x19c6   : > { %v2526_v3 = vadd.f32 %v2525_v2, %v3930_v16  ;;  %v2541_v62 = vmul.f32 %v2534_v46, %v3935_v20 }
0x19c7   : > { %v3308_v5 = vpop.f32.mrf.mxu0 }
0x19c8   : > { %v2539_v59 = vmul.f32 %v2526_v3, %v3935_v20  ;;  %v4257_v12 = vadd.f32 %v3563_v0, %v2541_v62 }
0x19c9   : > { %v2528_v44 = vpop.f32.mrf.mxu0 }
0x19ca   : > { %v4254_v10 = vadd.f32 %v3562_v9, %v2539_v59  ;;  %v2529_v51 = vadd.f32 %v2528_v44, %v3930_v16  ;;  %v2551_v31 = vsel %vm503_vm3, %v4257_v12, 0.0 }
0x19cc   : > { %v2540_v61 = vmul.f32 %v2529_v51, %v3935_v20  ;;  %v2545_v11 = vsel %vm496_vm2, %v4254_v10, 0.0 }
0x19cd   : > { %2546 = vadd.xlane.f32.xlu0 %v2545_v11 }
0x19ce   : > { %v4262_v1 = vadd.f32 %v3564_v52, %v2540_v61 }
0x19d0   : > { %v2548_v27 = vsel %vm496_vm2, %v4262_v1, 0.0 }
0x19d1   : > { %2549 = vadd.xlane.f32.xlu1 %v2548_v27  ;;  %2552 = vadd.xlane.f32.xlu0 %v2551_v31 }
0x1a56   : > { %v2547_v16 = vpop.xlane.xlu0 %2546 }
0x1a57   : > { %v2554_v38 = vmul.f32 0.03125, %v2547_v16 }
0x1a59   : > { %v2557_v58 = vsub.f32 %v4254_v10, %v2554_v38 }
0x1a5a   : > { %v2550_v20 = vpop.xlane.xlu1 %2549  ;;  %v2553_v32 = vpop.xlane.xlu0 %2552 }
0x1a5b   : > { %v2555_v13 = vmul.f32 0.03125, %v2550_v20  ;;  %v2556_v18 = vmul.f32 0.03125, %v2553_v32  ;;  %v2560_v19 = vmul.f32 %v2557_v58, %v2557_v58 }
0x1a5d   : > { %v2558_v21 = vsub.f32 %v4262_v1, %v2555_v13  ;;  %v2559_v22 = vsub.f32 %v4257_v12, %v2556_v18  ;;  %v2563_v23 = vsel %vm496_vm2, %v2560_v19, 0.0 }
0x1a5e   : > { %2564 = vadd.xlane.f32.xlu0 %v2563_v23 }
0x1a5f   : > { %v2561_v37 = vmul.f32 %v2558_v21, %v2558_v21  ;;  %v2562_v26 = vmul.f32 %v2559_v22, %v2559_v22 }
0x1a61   : > { %v2566_v28 = vsel %vm496_vm2, %v2561_v37, 0.0  ;;  %v2569_v55 = vsel %vm503_vm3, %v2562_v26, 0.0 }
0x1a62   : > { %2567 = vadd.xlane.f32.xlu0 %v2566_v28  ;;  %2570 = vadd.xlane.f32.xlu1 %v2569_v55 }
0x1ae7   : > { %v2565_v63 = vpop.xlane.xlu0 %2564 }
0x1ae8   : > { %v2572_v57 = vmul.f32 0.03125, %v2565_v63 }
0x1aea   : > { %v2575_v39 = vadd.f32 1e-05, %v2572_v57 }
0x1aeb   : > { %v2571_v33 = vpop.xlane.xlu1 %2570  ;;  %v2568_v34 = vpop.xlane.xlu0 %2567 }
0x1aec   : > { %3544 = vrsqrt.f32 %v2575_v39  ;;  %v2574_v29 = vmul.f32 0.03125, %v2571_v33  ;;  %v2573_v36 = vmul.f32 0.03125, %v2568_v34 }
0x1aee   : > { %v2577_v40 = vadd.f32 1e-05, %v2574_v29  ;;  %v2576_v43 = vadd.f32 1e-05, %v2573_v36 }
0x1af0   : > { %3546 = vrsqrt.f32 %v2577_v40 }
0x1af1   : > { %3548 = vrsqrt.f32 %v2576_v43 }
0x1af9   : > { %v3545_v4 = vpop.eup %3544 }
0x1afa   : > { %v2581_v47 = vmul.f32 %v3545_v4, %v2557_v58 }
0x1afc   : > { %v2584_v14 = vmul.f32 %v2581_v47, %v4007_v8 }
0x1afd   : > { %v3547_v35 = vpop.eup %3546 }
0x1afe   : > { %v3549_v48 = vpop.eup %3548  ;;  %v2583_v49 = vmul.f32 %v3547_v35, %v2559_v22  ;;  %v2587_v53 = vadd.f32 %v2584_v14, %v4013_v42 }
0x1aff   : > { %v2582_v54 = vmul.f32 %v3549_v48, %v2558_v21 }
0x1b00   : > { %v2586_v50 = vmul.f32 %v2583_v49, %v4007_v8 }
0x1b01   : > { %v2585_v15 = vmul.f32 %v2582_v54, %v4007_v8 }
0x1b02   : > { %v2589_v45 = vadd.f32 %v2586_v50, %v4013_v42 }
0x1b03   : > { %v2588_v41 = vadd.f32 %v2585_v15, %v4013_v42 }
0x1b04   : > { %v2591_v7 = vpack.c.bf16 %v2589_v45, %v2589_v45 }
0x1b05   : > { %v2590_v56 = vpack.c.bf16 %v2588_v41, %v2587_v53 }
0x1b07   : > { %3313 = vmatprep.mubr.msk.bf16.mxu1 %vm496_vm2, %v2590_v56 }
0x1b08   : > { %3314 = vmatmul.mubr.msk.bf16.vlgmr.msra.gmra.mxu1 %vm496_vm2, %v2591_v7 }
0x1bc8   : > { %v3315_v30 = vpop.f32.mrf.mxu1 }
0x1bc9   : > { %v2641_v60 = vadd.f32 %v3315_v30, %v4061_v17 }
0x1bca   : > { %v2632_v6 = vpop.f32.mrf.mxu1 }
0x1bcb   : > { %v2648_v46 = vmul.f32 %v2641_v60, %v2641_v60  ;;  %v2633_v2 = vadd.f32 %v4061_v17, %v2632_v6 }
0x1bcc   : > { %v3316_v8 = vpop.f32.mrf.mxu1 }
0x1bcd   : > { %v2651_v3 = vmul.f32 %v2648_v46, %v2641_v60  ;;  %v2646_v5 = vmul.f32 %v2633_v2, %v2633_v2 }
0x1bce   : > { %v2635_v62 = vpop.f32.mrf.mxu1 }
0x1bcf   : > { %v2654_v59 = vmul.f32 0.044715, %v2651_v3  ;;  %v2649_v44 = vmul.f32 %v2646_v5, %v2633_v2  ;;  %v2636_v42 = vadd.f32 %v4061_v17, %v2635_v62 }
0x1bd1   : > { %v2657_v9 = vadd.f32 %v2654_v59, %v2641_v60  ;;  %v2652_v51 = vmul.f32 0.044715, %v2649_v44  ;;  %v2647_v0 = vmul.f32 %v2636_v42, %v2636_v42 }
0x1bd3   : > { %v2660_v61 = vmul.f32 0.7978846, %v2657_v9  ;;  %v2655_v11 = vadd.f32 %v2652_v51, %v2633_v2  ;;  %v2650_v52 = vmul.f32 %v2647_v0, %v2636_v42 }
0x1bd5   : > { %3550 = vtanh.f32 %v2660_v61  ;;  %v2658_v27 = vmul.f32 0.7978846, %v2655_v11  ;;  %v2653_v31 = vmul.f32 0.044715, %v2650_v52 }
0x1bd7   : > { %3552 = vtanh.f32 %v2658_v27  ;;  %v2656_v16 = vadd.f32 %v2653_v31, %v2636_v42 }
0x1bd9   : > { %v2659_v38 = vmul.f32 0.7978846, %v2656_v16 }
0x1bdb   : > { %3554 = vtanh.f32 %v2659_v38 }
0x1be2   : > { %v3551_v58 = vpop.eup %3550 }
0x1be3   : > { %v2666_v32 = vadd.f32 1.0, %v3551_v58 }
0x1be4   : > { %v3553_v20 = vpop.eup %3552 }
0x1be5   : > { %v2664_v13 = vadd.f32 1.0, %v3553_v20  ;;  %v2669_v19 = vmul.f32 0.5, %v2666_v32 }
0x1be7   : > { %v2667_v17 = vmul.f32 0.5, %v2664_v13  ;;  %v2672_v23 = vmul.f32 %v2669_v19, %v2641_v60 }
0x1be8   : > { %v3555_v18 = vpop.eup %3554 }
0x1be9   : > { %v2665_v21 = vadd.f32 1.0, %v3555_v18  ;;  %v2670_v37 = vmul.f32 %v2667_v17, %v2633_v2  ;;  %v2674_v55 = vpack.c.bf16 %v2672_v23, %v2672_v23 }
0x1beb   : > { %v2668_v22 = vmul.f32 0.5, %v2665_v21 }
0x1bed   : > { %v2671_v26 = vmul.f32 %v2668_v22, %v2636_v42 }
0x1bef   : > { %v2673_v28 = vpack.c.bf16 %v2671_v26, %v2670_v37 }
0x1bf1   : > { %3325 = vmatprep.mubr.msk.bf16.mxu0 %vm1605_vm10, %v2673_v28 }
0x1bf2   : > { %3326 = vmatmul.mubr.msk.bf16.vlgmr.msra.gmra.mxu0 %vm1605_vm10, %v2674_v55 }
0x1cb2   : > { %v3327_v63 = vpop.f32.mrf.mxu0 }
0x1cb3   : > { %v2724_v57 = vadd.f32 %v3327_v63, %v4088_v24 }
0x1cb4   : > { %v2715_v39 = vpop.f32.mrf.mxu0 }
0x1cb5   : > { %v2731_v33 = vmul.f32 %v2724_v57, %v4090_v25  ;;  %v2716_v34 = vadd.f32 %v2715_v39, %v4088_v24 }
0x1cb6   : > { %v3328_v29 = vpop.f32.mrf.mxu0 }
0x1cb7   : > { %v2734_v36 = vadd.f32 %v2731_v33, %v4257_v12  ;;  %v2729_v40 = vmul.f32 %v2716_v34, %v4090_v25 }
0x1cb8   : > { %v2718_v43 = vpop.f32.mrf.mxu0 }
0x1cb9   : > { %2737 = vst.msk [vmem:[#allocation2 + $0x28] sm:$0x1] %vm503_vm3, %v2734_v36  ;;  %v2732_v4 = vadd.f32 %v2729_v40, %v4254_v10  ;;  %v2719_v47 = vadd.f32 %v2718_v43, %v4088_v24 }
0x1cbb   : > { %2735 = vst.msk [vmem:[#allocation2 + $0x18] sm:$0xff] %vm496_vm2, %v2732_v4  ;;  %v2730_v35 = vmul.f32 %v2719_v47, %v4090_v25  ;;  %2741 = sbr.rel (%p3008_p6) target bundleno = 7370 (0x1cca), region = 60 }
0x1cbd   : > { %v2733_v48 = vadd.f32 %v2730_v35, %v4262_v1 }
0x1cbf   : > { %2736 = vst.msk [vmem:[#allocation2 + $0x20] sm:$0xff] %vm496_vm2, %v2733_v48 }
0x1cc0   : > { %v2742_v12 = vld [vmem:[#allocation2] sm:$0xff]  ;;  %vm2774_vm11 = vcmask 257024   ;;  %v2743_v49 = vld [vmem:[#allocation2 + $0x8] sm:$0xff]  ;;  %v2744_v54 = vld [vmem:[#allocation2 + $0x10] sm:$0x1] }
0x1cc1   : > { %v3023_v14 = vpack.c.bf16 %v2742_v12, %v2742_v12  ;;  %v3024_v50 = vpack.c.bf16 %v2743_v49, %v2743_v49  ;;  %v3025_v10 = vpack.c.bf16 %v2744_v54, %v2744_v54  ;;  %vm2778_vm12 = vsmask.f32 256  ;;  %v2780_v24 = vld [vmem:[%s4346_s8 + $0x8] sm:$0x1]  ;;  %v2785_v41 = vld [vmem:[%s4346_s8 + $0x14] sm:$0x1] }
0x1cc2   : > { %v2745_v25 = vld [vmem:[#allocation2 + $0x18] sm:$0xff]  ;;  %vm2779_vm13 = vmand %vm503_vm3, %vm2778_vm12  ;;  %v2747_v53 = vld [vmem:[#allocation2 + $0x28] sm:$0x1] }
0x1cc3   : > { %v3026_v1 = vpack.c.bf16 %v2745_v25, %v2745_v25  ;;  %2775 = vst.msk [vmem:[%s4346_s8] sm:$0xf] %vm2774_vm11, %v3023_v14  ;;  %2776 = vst.msk [vmem:[%s4346_s8 + $0x4] sm:$0xf] %vm2774_vm11, %v3024_v50  ;;  %v2781_v7 = vsel %vm2779_vm13, %v3025_v10, %v2780_v24  ;;  %v3028_v56 = vpack.c.bf16 %v2747_v53, %v2747_v53 }
0x1cc4   : > { %2782 = vst [vmem:[%s4346_s8 + $0x8] sm:$0x1] %v2781_v7 }
0x1cc5   : > { %2783 = vst.msk [vmem:[%s4346_s8 + $0xc] sm:$0xf] %vm2774_vm11, %v3026_v1  ;;  %v2786_v30 = vsel %vm2779_vm13, %v3028_v56, %v2785_v41 }
0x1cc6   : > { %v2746_v15 = vld [vmem:[#allocation2 + $0x20] sm:$0xff]  ;;  %2787 = vst [vmem:[%s4346_s8 + $0x14] sm:$0x1] %v2786_v30 }
0x1cc7   : > { %v3027_v45 = vpack.c.bf16 %v2746_v15, %v2746_v15 }
0x1cc9   : > { %2784 = vst.msk [vmem:[%s4346_s8 + $0x10] sm:$0xf] %vm2774_vm11, %v3027_v45 }
0x1cca PF: > { %s18_s29 = sadd.s32 1, %s3587_s29   ;;  %s4358_s27 = smov %s3583_s28 }
0x1ccb   : > { %p15_p7 = scmp.ge.s32.totalorder %s18_s29, 4   ;;  %s4359_s28 = smov %s4361_s30 }
0x1ccd   :  { %17 = sbr.rel (!%p15_p7) target bundleno = 2 (0x2), region = 112 }

// kernel: clip_forward.9
= control target key start
LH: loop header
LB: loop body
LE: loop exit
PB: predicated region body
PF: predicated region fallthrough
CT: control target
= control target key end

     0   :  { %vm36_vm0 = vcmask 261120   ;;  %v1887_v8 = vmov 0.0   ;;  %vm1888_vm1 = vmmov 0   ;;  %v62_v14 = vlaneseq  ;;  %s1889_s13 = smov 120   ;;  %s1890_s14 = smov 96   ;;  %s2353_s0 = inlined_call_operand.vmem [shape: f32[2,8,32], index: 0, kind: input, shape index: {}]   ;;  %s2354_s2 = inlined_call_operand.vmem [shape: bf16[1,32,96], index: 2, kind: input, shape index: {}]   ;;  %s2355_s1 = inlined_call_operand.vmem [shape: f32[1,8,32], index: 1, kind: input, shape index: {}]   ;;  %s2356_s3 = inlined_call_operand.vmem [shape: f32[1,1,96], index: 3, kind: input, shape index: {}]   ;;  %s2357_s4 = inlined_call_operand.vmem [shape: bf16[1,32,32], index: 4, kind: input, shape index: {}]   ;;  %s2358_s5 = inlined_call_operand.vmem [shape: bf16[1,32,64], index: 5, kind: input, shape index: {}]   ;;  %s2359_s7 = inlined_call_operand.vmem [shape: bf16[1,64,32], index: 7, kind: input, shape index: {}]   ;;  %s2360_s6 = inlined_call_operand.vmem [shape: f32[1,1,64], index: 6, kind: input, shape index: {}]   ;;  %s2361_s8 = inlined_call_operand.vmem [shape: bf16[2,8,32], index: 8, kind: output, shape index: {}]  }
   0x1   :  { %v34_v0 = vld [vmem:[%s2353_s0] sm:$0xff]  ;;  %1649 = vmatprep.subr.bf16.mxu1 %v1887_v8  ;;  %v1962_v9 = vld [vmem:[%s2354_s2 + $0x8] sm:$0xff]   ;;  %1653 = vmatprep.mubr.msk.bf16.mxu1 %vm1888_vm1, %v1887_v8  ;;  %s1891_s15 = smov 88   ;;  %s1893_s16 = smov 112   ;;  %vm158_vm2 = vcmask 64512   ;;  %vm224_vm4 = vcmask 1043456  }
   0x2   :  { %37 = vst.msk [vmem:[#allocation2] sm:$0xff] %vm36_vm0, %v34_v0  ;;  %1663 = vmatprep.subr.bf16.mxu0 %v1887_v8  ;;  %1665 = vmatprep.mubr.msk.bf16.mxu0 %vm1888_vm1, %v1887_v8  ;;  %v1973_v10 = vld [vmem:[%s2354_s2] sm:$0xff]   ;;  %v1979_v15 = vshrl.u32 %v62_v14, 7  ;;  %s1894_s17 = smov 72   ;;  %s1895_s18 = smov 104   ;;  %v65_v44 = vand.u32 127, %v62_v14 }
   0x3   :  { %1650 = vmatpush3.bf16.msra.mxu1 %v1962_v9  ;;  %v1985_v17 = vld [vmem:[%s2355_s1] sm:$0xff]  ;;  %s1896_s19 = smov 64   ;;  %s1897_s20 = smov 56   ;;  %vm614_vm5 = vcmask 130048   ;;  %vm616_vm6 = vcmask 195584   ;;  %vm807_vm7 = vcmask 523264  }
   0x4   :  { %1651 = vmatprep.subr.bf16.mxu1 %v1887_v8  ;;  %v84_v16 = vsub.s32 0, %v1979_v15  ;;  %v89_v18 = vsub.s32 1, %v1979_v15  ;;  %v2002_v26 = vld [vmem:[%s2356_s3] ss:$0 sm:$0xff]  ;;  %s1892_s3 = smov 80   ;;  %vm2044_vm3 = vcmp.gt.s32.totalorder %v65_v44, %v1979_v15  ;;  %s1898_s21 = smov 48  }
   0x5   :  { %s1899_s22 = smov 40   ;;  %s1900_s23 = smov 8   ;;  %vm1546_vm8 = vcmask 257024  }
   0x6   :  { %v1989_v19 = vrot.slane %v1985_v17, %v84_v16  ;;  %v1992_v22 = vrot.slane %v1985_v17, %v89_v18  ;;  %s1901_s30 = smov 16  }
   0x7   :  { %1652 = vmatpush3.bf16.msra.mxu1 %v1973_v10 }
   0x8   :  { %1657 = vmatprep.subr.bf16.mxu1 %v1887_v8 }
   0x9   :  { %v1952_v1 = vld [vmem:[#allocation2] sm:$0xff] }
   0xa   :  { %v68_v2 = vsel %vm36_vm0, %v1952_v1, 0.0 }
   0xb   :  { %69 = vadd.xlane.f32.xlu0 %v68_v2 }
  0x94   :  { %v70_v3 = vpop.xlane.xlu0 %69 }
  0x95   :  { %v72_v4 = vmul.f32 0.03125, %v70_v3 }
  0x97   :  { %v73_v5 = vsub.f32 %v1952_v1, %v72_v4 }
  0x99   :  { %v74_v6 = vmul.f32 %v73_v5, %v73_v5 }
  0x9b   :  { %v75_v7 = vsel %vm36_vm0, %v74_v6, 0.0 }
  0x9c   :  { %76 = vadd.xlane.f32.xlu0 %v75_v7 }
 0x125   :  { %v77_v11 = vpop.xlane.xlu0 %76 }
 0x126   :  { %v78_v12 = vmul.f32 0.03125, %v77_v11 }
 0x128   :  { %v79_v13 = vadd.f32 1e-05, %v78_v12 }
 0x12a   :  { %1843 = vrsqrt.f32 %v79_v13 }
 0x137   :  { %v1844_v20 = vpop.eup %1843 }
 0x138   :  { %v81_v21 = vmul.f32 %v1844_v20, %v73_v5 }
 0x13a   :  { %v86_v23 = vmul.f32 %v1989_v19, %v81_v21 }
 0x13c   :  { %v91_v24 = vadd.f32 %v1992_v22, %v86_v23 }
 0x13e   :  { %v92_v25 = vpack.c.bf16 %v91_v24, %v91_v24 }
 0x140   :  { %1654 = vmatmul.mubr.msk.bf16.vlgmr.msra.gmra.mxu1 %vm36_vm0, %v92_v25 }
 0x141   :  { %1659 = vmatprep.mubr.msk.bf16.mxu1 %vm1888_vm1, %v1887_v8 }
 0x200   :  { %v148_v27 = vpop.f32.mrf.mxu1 }
 0x201   :  { %v149_v28 = vadd.f32 %v2002_v26, %v148_v27 }
 0x202   :  { %v1655_v29 = vpop.f32.mrf.mxu1 }
 0x203   :  { %v2005_v30 = vpack.c.bf16 %v149_v28, %v149_v28 }
 0x204   :  { %v151_v31 = vpop.f32.mrf.mxu1 }
 0x205   :  { %268 = vrot.lane.b32.xlu0 %v2005_v30, %s1889_s13  ;;  %156 = vrot.lane.b32.xlu1 %v2005_v30, %s1890_s14 }
 0x206   :  { %v1656_v32 = vpop.f32.mrf.mxu1 }
 0x209   :  { %270 = vrot.lane.b32.xlu1 %v2005_v30, %s1891_s15 }
 0x20d   :  { %381 = vrot.lane.b32.xlu1 %v2005_v30, %s1892_s3 }
 0x211   :  { %379 = vrot.lane.b32.xlu1 %v2005_v30, %s1893_s16 }
 0x215   :  { %492 = vrot.lane.b32.xlu1 %v2005_v30, %s1894_s17 }
 0x219   :  { %490 = vrot.lane.b32.xlu1 %v2005_v30, %s1895_s18 }
 0x277   :  { %v157_v33 = vpop.permute.xlu1 %156  ;;  %v269_v38 = vpop.permute.xlu0 %268 }
 0x278   :  { %v163_v34 = vsel %vm158_vm2, %v157_v33, 0 }
 0x279   :  { %1658 = vmatpush3.bf16.xpose.msra.mxu1 %v163_v34 }
 0x27a   :  { %1669 = vmatprep.subr.bf16.mxu1 %v1887_v8 }
 0x27b   :  { %v271_v35 = vpop.permute.xlu1 %270 }
 0x27c   :  { %v276_v36 = vsel %vm158_vm2, %v271_v35, 0 }
 0x27f   :  { %v382_v37 = vpop.permute.xlu1 %381 }
 0x280   :  { %1660 = vmatmul.mubr.msk.bf16.vlgmr.msra.gmra.mxu1 %vm158_vm2, %v2005_v30  ;;  %v387_v40 = vsel %vm158_vm2, %v382_v37, 0 }
 0x281   :  { %1670 = vmatpush3.bf16.xpose.msra.mxu1 %v276_v36  ;;  %1671 = vmatprep.mubr.msk.bf16.mxu1 %vm1888_vm1, %v1887_v8 }
 0x282   :  { %1681 = vmatprep.subr.bf16.mxu1 %v1887_v8 }
 0x283   :  { %v380_v39 = vpop.permute.xlu1 %379 }
 0x287   :  { %v493_v41 = vpop.permute.xlu1 %492 }
 0x288   :  { %1672 = vmatmul.mubr.msk.bf16.vlgmr.msra.gmra.mxu1 %vm158_vm2, %v269_v38  ;;  %v498_v42 = vsel %vm158_vm2, %v493_v41, 0 }
 0x289   :  { %1682 = vmatpush3.bf16.xpose.msra.mxu1 %v387_v40  ;;  %1683 = vmatprep.mubr.msk.bf16.mxu1 %vm1888_vm1, %v1887_v8 }
 0x28a   :  { %1693 = vmatprep.subr.bf16.mxu1 %v1887_v8 }
 0x28b   :  { %v491_v43 = vpop.permute.xlu1 %490 }
 0x290   :  { %1684 = vmatmul.mubr.msk.bf16.vlgmr.msra.gmra.mxu1 %vm158_vm2, %v380_v39 }
 0x291   :  { %1694 = vmatpush3.bf16.xpose.msra.mxu1 %v498_v42  ;;  %1695 = vmatprep.mubr.msk.bf16.mxu1 %vm1888_vm1, %v1887_v8 }
 0x292   :  { %1705 = vmatprep.subr.bf16.mxu1 %v1887_v8 }
 0x298   :  { %1696 = vmatmul.mubr.msk.bf16.vlgmr.msra.gmra.mxu1 %vm158_vm2, %v491_v43 }
 0x299   :  { %1709 = vmatprep.mubr.msk.bf16.mxu1 %vm1888_vm1, %v1887_v8 }
 0x340   :  { %v199_v46 = vpop.f32.mrf.mxu1 }
 0x341   :  { %v206_v47 = vsel %vm2044_vm3, -1e+30, %v199_v46 }
 0x342   :  { %v1661_v48 = vpop.f32.mrf.mxu1  ;;  %v207_v49 = vsel %vm158_vm2, %v206_v47, -inf }
 0x343   :  { %208 = vmax.xlane.f32.xlu1 %v207_v49 }
 0x344   :  { %v202_v50 = vpop.f32.mrf.mxu1 }
 0x346   :  { %v1662_v51 = vpop.f32.mrf.mxu1 }
 0x348   :  { %v312_v52 = vpop.f32.mrf.mxu1 }
 0x349   :  { %v318_v53 = vsel %vm2044_vm3, -1e+30, %v312_v52 }
 0x34a   :  { %v1673_v54 = vpop.f32.mrf.mxu1  ;;  %v319_v55 = vsel %vm158_vm2, %v318_v53, -inf }
 0x34b   :  { %320 = vmax.xlane.f32.xlu0 %v319_v55 }
 0x34c   :  { %v315_v56 = vpop.f32.mrf.mxu1 }
 0x34e   :  { %v1674_v57 = vpop.f32.mrf.mxu1 }
 0x350   :  { %v423_v58 = vpop.f32.mrf.mxu1 }
 0x351   :  { %v429_v59 = vsel %vm2044_vm3, -1e+30, %v423_v58 }
 0x352   :  { %v1685_v60 = vpop.f32.mrf.mxu1  ;;  %v430_v61 = vsel %vm158_vm2, %v429_v59, -inf }
 0x353   :  { %431 = vmax.xlane.f32.xlu1 %v430_v61 }
 0x354   :  { %v426_v62 = vpop.f32.mrf.mxu1 }
 0x356   :  { %v1686_v63 = vpop.f32.mrf.mxu1 }
 0x358   :  { %v534_v0 = vpop.f32.mrf.mxu1 }
 0x359   :  { %v540_v2 = vsel %vm2044_vm3, -1e+30, %v534_v0 }
 0x35a   :  { %v1697_v3 = vpop.f32.mrf.mxu1  ;;  %v541_v4 = vsel %vm158_vm2, %v540_v2, -inf }
 0x35b   :  { %542 = vmax.xlane.f32.xlu0 %v541_v4 }
 0x35c   :  { %v537_v5 = vpop.f32.mrf.mxu1 }
 0x35d   :  { %v2096_v5 = vld [vmem:[%s2357_s4 + $0x8] sm:$0xff]  }
 0x35e   :  { %v1698_v6 = vpop.f32.mrf.mxu1  ;;  %1706 = vmatpush3.bf16.msra.mxu1 %v2096_v5 }
 0x35f   :  { %1707 = vmatprep.subr.bf16.mxu1 %v1887_v8  ;;  %v2103_v6 = vld [vmem:[%s2357_s4] sm:$0xff]   ;;  %s1902_s4 = smov 24  }
 0x362   :  { %1708 = vmatpush3.bf16.msra.mxu1 %v2103_v6 }
 0x363   :  { %1721 = vmatprep.subr.bf16.mxu1 %v1887_v8 }
 0x3cc   :  { %v209_v7 = vpop.xlane.xlu1 %208 }
 0x3cd   :  { %v210_v11 = vsub.f32 %v206_v47, %v209_v7  ;;  %v35_v7 = vld [vmem:[%s2353_s0 + $0x8] sm:$0xff] }
 0x3ce   :  { %38 = vst.msk [vmem:[#allocation2 + $0x8] sm:$0xff] %vm36_vm0, %v35_v7 }
 0x3cf   :  { %v211_v12 = vmul.f32 1.442695, %v210_v11 }
 0x3d1   :  { %1845 = vpow2.f32 %v211_v12 }
 0x3d4   :  { %v321_v13 = vpop.xlane.xlu0 %320 }
 0x3d5   :  { %v322_v14 = vsub.f32 %v318_v53, %v321_v13 }
 0x3d7   :  { %v323_v16 = vmul.f32 1.442695, %v322_v14 }
 0x3d9   :  { %1847 = vpow2.f32 %v323_v16 }
 0x3dc   :  { %v432_v31 = vpop.xlane.xlu1 %431 }
 0x3dd   :  { %v433_v32 = vsub.f32 %v429_v59, %v432_v31 }
 0x3de   :  { %v1846_v18 = vpop.eup %1845 }
 0x3df   :  { %v213_v20 = vsel %vm158_vm2, %v1846_v18, 0.0  ;;  %v434_v33 = vmul.f32 1.442695, %v433_v32 }
 0x3e0   :  { %214 = vadd.xlane.f32.xlu1 %v213_v20 }
 0x3e4   :  { %v543_v21 = vpop.xlane.xlu0 %542 }
 0x3e5   :  { %v544_v23 = vsub.f32 %v540_v2, %v543_v21 }
 0x3e6   :  { %v1848_v24 = vpop.eup %1847 }
 0x3e7   :  { %v545_v25 = vmul.f32 1.442695, %v544_v23  ;;  %v325_v27 = vsel %vm158_vm2, %v1848_v24, 0.0  ;;  %v2113_v23 = vld [vmem:[#allocation2 + $0x8] sm:$0xff] }
 0x3e8   :  { %326 = vadd.xlane.f32.xlu0 %v325_v27 }
 0x3e9   :  { %1849 = vpow2.f32 %v545_v25 }
 0x3ea   :  { %1851 = vpow2.f32 %v434_v33 }
 0x3f1   :  { %219 = vrot.lane.b32.xlu1 %v2005_v30, %s1896_s19 }
 0x3f6   :  { %v1850_v28 = vpop.eup %1849 }
 0x3f7   :  { %v547_v29 = vsel %vm158_vm2, %v1850_v28, 0.0  ;;  %v1852_v34 = vpop.eup %1851 }
 0x3f8   :  { %548 = vadd.xlane.f32.xlu0 %v547_v29  ;;  %v436_v35 = vsel %vm158_vm2, %v1852_v34, 0.0 }
 0x40e   :  { %331 = vrot.lane.b32.xlu0 %v2005_v30, %s1897_s20 }
 0x415   :  { %437 = vadd.xlane.f32.xlu1 %v436_v35 }
 0x426   :  { %442 = vrot.lane.b32.xlu1 %v2005_v30, %s1898_s21 }
 0x42a   :  { %553 = vrot.lane.b32.xlu1 %v2005_v30, %s1899_s22 }
 0x469   :  { %v215_v36 = vpop.xlane.xlu1 %214 }
 0x46a   :  { %1853 = vrcp.f32 %v215_v36  ;;  %v680_v36 = vsub.s32 3, %v1979_v15 }
 0x46d   :  { %v220_v37 = vpop.permute.xlu1 %219 }
 0x46e   :  { %v226_v38 = vsel %vm224_vm4, %v220_v37, 0 }
 0x46f   :  { %1664 = vmatpush3.bf16.msra.mxu0 %v226_v38 }
 0x470   :  { %1675 = vmatprep.subr.bf16.mxu0 %v1887_v8 }
 0x471   :  { %v327_v39 = vpop.xlane.xlu0 %326 }
 0x472   :  { %1855 = vrcp.f32 %v327_v39  ;;  %v2129_v39 = vrot.slane %v1985_v17, %v680_v36 }
 0x477   :  { %v1854_v40 = vpop.eup %1853 }
 0x478   :  { %v217_v41 = vmul.f32 %v1854_v40, %v1846_v18 }
 0x47a   :  { %v218_v42 = vpack.c.bf16 %v217_v41, %v217_v41 }
 0x47c   :  { %1666 = vmatmul.mubr.msk.bf16.vlgmr.msra.gmra.mxu0 %vm158_vm2, %v218_v42 }
 0x47d   :  { %1677 = vmatprep.mubr.msk.bf16.mxu0 %vm1888_vm1, %v1887_v8 }
 0x47f   :  { %v1856_v30 = vpop.eup %1855 }
 0x480   :  { %v329_v44 = vmul.f32 %v1856_v30, %v1848_v24  ;;  %v860_v24 = vsel %vm36_vm0, %v2113_v23, 0.0 }
 0x481   :  { %v549_v43 = vpop.xlane.xlu0 %548 }
 0x482   :  { %v330_v48 = vpack.c.bf16 %v329_v44, %v329_v44 }
 0x485   :  { %v332_v46 = vpop.permute.xlu0 %331 }
 0x486   :  { %v337_v47 = vsel %vm224_vm4, %v332_v46, 0 }
 0x487   :  { %1676 = vmatpush3.bf16.msra.mxu0 %v337_v47 }
 0x488   :  { %1687 = vmatprep.subr.bf16.mxu0 %v1887_v8 }
 0x48a   :  { %1678 = vmatmul.mubr.msk.bf16.vlgmr.msra.gmra.mxu0 %vm158_vm2, %v330_v48 }
 0x48b   :  { %1689 = vmatprep.mubr.msk.bf16.mxu0 %vm1888_vm1, %v1887_v8 }
 0x49e   :  { %v438_v49 = vpop.xlane.xlu1 %437 }
 0x49f   :  { %1857 = vrcp.f32 %v438_v49 }
 0x4a0   :  { %1859 = vrcp.f32 %v549_v43 }
 0x4a2   :  { %v443_v50 = vpop.permute.xlu1 %442 }
 0x4a3   :  { %v448_v51 = vsel %vm224_vm4, %v443_v50, 0 }
 0x4a4   :  { %1688 = vmatpush3.bf16.msra.mxu0 %v448_v51 }
 0x4a5   :  { %1699 = vmatprep.subr.bf16.mxu0 %v1887_v8 }
 0x4a6   :  { %v554_v54 = vpop.permute.xlu1 %553 }
 0x4a7   :  { %v559_v57 = vsel %vm224_vm4, %v554_v54, 0 }
 0x4ac   :  { %v1858_v52 = vpop.eup %1857 }
 0x4ad   :  { %v440_v53 = vmul.f32 %v1858_v52, %v1852_v34  ;;  %v1860_v56 = vpop.eup %1859  ;;  %v621_v34 = vsub.s32 2, %v1979_v15 }
 0x4ae   :  { %v551_v58 = vmul.f32 %v1860_v56, %v1850_v28  ;;  %v2151_v56 = vld [vmem:[%s2358_s5] sm:$0xff]  }
 0x4af   :  { %v441_v55 = vpack.c.bf16 %v440_v53, %v440_v53  ;;  %v2126_v37 = vrot.slane %v1985_v17, %v621_v34 }
 0x4b0   :  { %v552_v59 = vpack.c.bf16 %v551_v58, %v551_v58 }
 0x4b1   :  { %1690 = vmatmul.mubr.msk.bf16.vlgmr.msra.gmra.mxu0 %vm158_vm2, %v441_v55 }
 0x4b2   :  { %1700 = vmatpush3.bf16.msra.mxu0 %v559_v57  ;;  %1701 = vmatprep.mubr.msk.bf16.mxu0 %vm1888_vm1, %v1887_v8 }
 0x4b3   :  { %1713 = vmatprep.subr.bf16.mxu0 %v1887_v8 }
 0x4b9   :  { %1702 = vmatmul.mubr.msk.bf16.vlgmr.msra.gmra.mxu0 %vm158_vm2, %v552_v59 }
 0x4ba   :  { %1717 = vmatprep.mubr.msk.bf16.mxu0 %vm1888_vm1, %v1887_v8 }
 0x53c   :  { %v262_v60 = vpop.f32.mrf.mxu0 }
 0x53e   :  { %v1667_v61 = vpop.f32.mrf.mxu0 }
 0x540   :  { %v265_v62 = vpop.f32.mrf.mxu0 }
 0x542   :  { %v1668_v63 = vpop.f32.mrf.mxu0 }
 0x543   :  { %v699_v63 = vsub.s32 4, %v1979_v15 }
 0x54a   :  { %v373_v0 = vpop.f32.mrf.mxu0 }
 0x54b   :  { %602 = vrot.lane.b32.xlu0 %v373_v0, %s1900_s23  ;;  %v704_v0 = vsub.s32 5, %v1979_v15 }
 0x54c   :  { %v1679_v2 = vpop.f32.mrf.mxu0 }
 0x54e   :  { %v376_v3 = vpop.f32.mrf.mxu0 }
 0x54f   :  { %v2159_v3 = vrot.slane %v1985_v17, %v699_v63  ;;  %v853_v63 = vsub.s32 7, %v1979_v15 }
 0x550   :  { %v1680_v4 = vpop.f32.mrf.mxu0 }
 0x571   :  { %v484_v11 = vpop.f32.mrf.mxu0 }
 0x572   :  { %606 = vrot.lane.b32.xlu1 %v484_v11, %s1901_s30  ;;  %v2162_v11 = vrot.slane %v1985_v17, %v704_v0 }
 0x573   :  { %v1691_v12 = vpop.f32.mrf.mxu0 }
 0x575   :  { %v487_v13 = vpop.f32.mrf.mxu0 }
 0x577   :  { %v1692_v14 = vpop.f32.mrf.mxu0 }
 0x579   :  { %v595_v16 = vpop.f32.mrf.mxu0 }
 0x57a   :  { %610 = vrot.lane.b32.xlu0 %v595_v16, %s1902_s4 }
 0x57b   :  { %v1703_v18 = vpop.f32.mrf.mxu0 }
 0x57d   :  { %v598_v20 = vpop.f32.mrf.mxu0 }
 0x57f   :  { %v1704_v21 = vpop.f32.mrf.mxu0 }
 0x599   :  { %861 = vadd.xlane.f32.xlu0 %v860_v24  ;;  %v2209_v24 = vld [vmem:[%s2360_s6] ss:$0 sm:$0xff] }
 0x5bd   :  { %v603_v25 = vpop.permute.xlu0 %602 }
 0x5be   :  { %v613_v28 = vsel %vm158_vm2, %v262_v60, %v603_v25 }
 0x5e4   :  { %v607_v27 = vpop.permute.xlu1 %606 }
 0x5e5   :  { %v615_v29 = vsel %vm614_vm5, %v613_v28, %v607_v27 }
 0x5ec   :  { %v611_v31 = vpop.permute.xlu0 %610 }
 0x5ed   :  { %v617_v32 = vsel %vm616_vm6, %v615_v29, %v611_v31 }
 0x5ee   :  { %v618_v33 = vpack.c.bf16 %v617_v32, %v617_v32 }
 0x5f0   :  { %1710 = vmatmul.mubr.msk.bf16.vlgmr.msra.gmra.mxu1 %vm36_vm0, %v618_v33 }
 0x5f1   :  { %1729 = vmatprep.mubr.msk.bf16.mxu1 %vm1888_vm1, %v1887_v8 }
 0x622   :  { %v862_v35 = vpop.xlane.xlu0 %861 }
 0x623   :  { %v863_v38 = vmul.f32 0.03125, %v862_v35 }
 0x625   :  { %v864_v42 = vsub.f32 %v2113_v23, %v863_v38 }
 0x627   :  { %v865_v47 = vmul.f32 %v864_v42, %v864_v42 }
 0x629   :  { %v866_v50 = vsel %vm36_vm0, %v865_v47, 0.0 }
 0x6b0   :  { %v672_v40 = vpop.f32.mrf.mxu1 }
 0x6b1   :  { %v673_v41 = vadd.f32 %v672_v40, %v2126_v37 }
 0x6b2   :  { %v1711_v30 = vpop.f32.mrf.mxu1 }
 0x6b3   :  { %v682_v43 = vmul.f32 %v2129_v39, %v673_v41 }
 0x6b4   :  { %v675_v44 = vpop.f32.mrf.mxu1 }
 0x6b5   :  { %v2135_v46 = vadd.f32 %v682_v43, %v1952_v1  ;;  %v2145_v1 = vld [vmem:[%s2358_s5 + $0x8] sm:$0xff]  }
 0x6b6   :  { %v1712_v48 = vpop.f32.mrf.mxu1  ;;  %1714 = vmatpush3.bf16.msra.mxu0 %v2145_v1 }
 0x6b7   :  { %v684_v49 = vsel %vm36_vm0, %v2135_v46, 0.0  ;;  %1715 = vmatprep.subr.bf16.mxu0 %v1887_v8 }
 0x6b8   :  { %685 = vadd.xlane.f32.xlu1 %v684_v49 }
 0x6ba   :  { %1716 = vmatpush3.bf16.msra.mxu0 %v2151_v56 }
 0x6bb   :  { %1733 = vmatprep.subr.bf16.mxu0 %v1887_v8 }
 0x6bc   :  { %867 = vadd.xlane.f32.xlu1 %v866_v50 }
 0x741   :  { %v686_v51 = vpop.xlane.xlu1 %685 }
 0x742   :  { %v687_v52 = vmul.f32 0.03125, %v686_v51 }
 0x744   :  { %v688_v53 = vsub.f32 %v2135_v46, %v687_v52 }
 0x745   :  { %v868_v57 = vpop.xlane.xlu1 %867 }
 0x746   :  { %v689_v54 = vmul.f32 %v688_v53, %v688_v53  ;;  %v869_v58 = vmul.f32 0.03125, %v868_v57 }
 0x748   :  { %v690_v55 = vsel %vm36_vm0, %v689_v54, 0.0  ;;  %v870_v59 = vadd.f32 1e-05, %v869_v58 }
 0x749   :  { %691 = vadd.xlane.f32.xlu0 %v690_v55 }
 0x74a   :  { %1861 = vrsqrt.f32 %v870_v59 }
 0x757   :  { %v1862_v2 = vpop.eup %1861 }
 0x758   :  { %v872_v12 = vmul.f32 %v1862_v2, %v864_v42  ;;  %v2263_v2 = vrot.slane %v1985_v17, %v853_v63 }
 0x75a   :  { %v873_v18 = vmul.f32 %v872_v12, %v1989_v19  ;;  %v2195_v19 = vld [vmem:[%s2359_s7 + $0x8] sm:$0xff]  }
 0x75c   :  { %v874_v20 = vadd.f32 %v873_v18, %v1992_v22  ;;  %v2202_v22 = vld [vmem:[%s2359_s7] sm:$0xff]  }
 0x75e   :  { %v875_v21 = vpack.c.bf16 %v874_v20, %v874_v20 }
 0x7d2   :  { %v692_v60 = vpop.xlane.xlu0 %691 }
 0x7d3   :  { %v693_v61 = vmul.f32 0.03125, %v692_v60 }
 0x7d5   :  { %v694_v62 = vadd.f32 1e-05, %v693_v61 }
 0x7d7   :  { %1863 = vrsqrt.f32 %v694_v62  ;;  %v781_v62 = vsub.s32 6, %v1979_v15 }
 0x7d9   :  { %v2260_v0 = vrot.slane %v1985_v17, %v781_v62 }
 0x7e4   :  { %v1864_v4 = vpop.eup %1863 }
 0x7e5   :  { %v696_v7 = vmul.f32 %v1864_v4, %v688_v53 }
 0x7e7   :  { %v701_v13 = vmul.f32 %v2159_v3, %v696_v7 }
 0x7e9   :  { %v706_v14 = vadd.f32 %v2162_v11, %v701_v13 }
 0x7eb   :  { %v707_v16 = vpack.c.bf16 %v706_v14, %v706_v14 }
 0x7ed   :  { %1718 = vmatmul.mubr.msk.bf16.vlgmr.msra.gmra.mxu0 %vm36_vm0, %v707_v16 }
 0x7ee   :  { %1734 = vmatpush3.bf16.msra.mxu0 %v1962_v9  ;;  %1737 = vmatprep.mubr.msk.bf16.mxu0 %vm1888_vm1, %v1887_v8  ;;  %v2181_v9 = vld [vmem:[%s2359_s7 + $0x18] sm:$0xff]  }
 0x7ef   :  { %1735 = vmatprep.subr.bf16.mxu0 %v1887_v8  ;;  %1722 = vmatpush3.bf16.msra.mxu1 %v2181_v9 }
 0x7f0   :  { %1723 = vmatprep.subr.bf16.mxu1 %v1887_v8 }
 0x7f2   :  { %1736 = vmatpush3.bf16.msra.mxu0 %v1973_v10  ;;  %v2188_v10 = vld [vmem:[%s2359_s7 + $0x10] sm:$0xff]  }
 0x7f3   :  { %1741 = vmatprep.subr.bf16.mxu0 %v1887_v8  ;;  %1724 = vmatpush3.bf16.msra.mxu1 %v2188_v10 }
 0x7f4   :  { %1725 = vmatprep.subr.bf16.mxu1 %v1887_v8 }
 0x7f5   :  { %1738 = vmatmul.mubr.msk.bf16.vlgmr.msra.gmra.mxu0 %vm36_vm0, %v875_v21 }
 0x7f6   :  { %1743 = vmatprep.mubr.msk.bf16.mxu0 %vm1888_vm1, %v1887_v8 }
 0x7f7   :  { %1726 = vmatpush3.bf16.msra.mxu1 %v2195_v19 }
 0x7f8   :  { %1727 = vmatprep.subr.bf16.mxu1 %v1887_v8 }
 0x7fb   :  { %1728 = vmatpush3.bf16.msra.mxu1 %v2202_v22 }
 0x7fc   :  { %1747 = vmatprep.subr.bf16.mxu1 %v1887_v8 }
 0x8ad   :  { %v763_v25 = vpop.f32.mrf.mxu0 }
 0x8ae   :  { %v764_v27 = vadd.f32 %v2209_v24, %v763_v25 }
 0x8af   :  { %v1719_v28 = vpop.f32.mrf.mxu0 }
 0x8b0   :  { %v769_v29 = vmul.f32 %v764_v27, %v764_v27 }
 0x8b1   :  { %v766_v31 = vpop.f32.mrf.mxu0 }
 0x8b2   :  { %v770_v32 = vmul.f32 %v769_v29, %v764_v27 }
 0x8b3   :  { %v1720_v33 = vpop.f32.mrf.mxu0 }
 0x8b4   :  { %v771_v34 = vmul.f32 0.044715, %v770_v32 }
 0x8b5   :  { %v913_v35 = vpop.f32.mrf.mxu0 }
 0x8b6   :  { %v772_v36 = vadd.f32 %v771_v34, %v764_v27  ;;  %v914_v38 = vadd.f32 %v2002_v26, %v913_v35 }
 0x8b7   :  { %v1739_v40 = vpop.f32.mrf.mxu0 }
 0x8b8   :  { %v773_v41 = vmul.f32 0.7978846, %v772_v36  ;;  %v2213_v42 = vpack.c.bf16 %v914_v38, %v914_v38 }
 0x8b9   :  { %v916_v30 = vpop.f32.mrf.mxu0 }
 0x8ba   :  { %1865 = vtanh.f32 %v773_v41  ;;  %1032 = vrot.lane.b32.xlu1 %v2213_v42, %s1891_s15  ;;  %921 = vrot.lane.b32.xlu0 %v2213_v42, %s1890_s14 }
 0x8bb   :  { %v1740_v43 = vpop.f32.mrf.mxu0 }
 0x8be   :  { %1030 = vrot.lane.b32.xlu1 %v2213_v42, %s1889_s13  ;;  %1143 = vrot.lane.b32.xlu0 %v2213_v42, %s1892_s3 }
 0x8c2   :  { %1141 = vrot.lane.b32.xlu1 %v2213_v42, %s1893_s16  ;;  %1254 = vrot.lane.b32.xlu0 %v2213_v42, %s1894_s17 }
 0x8c6   :  { %1252 = vrot.lane.b32.xlu1 %v2213_v42, %s1895_s18 }
 0x8c7   :  { %v1866_v26 = vpop.eup %1865 }
 0x8c8   :  { %v775_v44 = vadd.f32 1.0, %v1866_v26 }
 0x8ca   :  { %v776_v47 = vmul.f32 0.5, %v775_v44 }
 0x8cc   :  { %v777_v48 = vmul.f32 %v776_v47, %v764_v27 }
 0x8ce   :  { %v778_v49 = vpack.c.bf16 %v777_v48, %v777_v48 }
 0x8d0   :  { %1730 = vmatmul.mubr.msk.bf16.vlgmr.msra.gmra.mxu1 %vm807_vm7, %v778_v49 }
 0x8d1   :  { %1749 = vmatprep.mubr.msk.bf16.mxu1 %vm1888_vm1, %v1887_v8 }
 0x92c   :  { %v922_v50 = vpop.permute.xlu0 %921  ;;  %v1033_v52 = vpop.permute.xlu1 %1032 }
 0x92d   :  { %v927_v51 = vsel %vm158_vm2, %v922_v50, 0  ;;  %v1038_v53 = vsel %vm158_vm2, %v1033_v52, 0 }
 0x92e   :  { %1742 = vmatpush3.bf16.xpose.msra.mxu0 %v927_v51 }
 0x92f   :  { %1753 = vmatprep.subr.bf16.mxu0 %v1887_v8 }
 0x930   :  { %v1144_v54 = vpop.permute.xlu0 %1143  ;;  %v1031_v55 = vpop.permute.xlu1 %1030 }
 0x931   :  { %v1149_v57 = vsel %vm158_vm2, %v1144_v54, 0 }
 0x934   :  { %v1255_v58 = vpop.permute.xlu0 %1254  ;;  %v1142_v59 = vpop.permute.xlu1 %1141 }
 0x935   :  { %1744 = vmatmul.mubr.msk.bf16.vlgmr.msra.gmra.mxu0 %vm158_vm2, %v2213_v42  ;;  %v1260_v60 = vsel %vm158_vm2, %v1255_v58, 0 }
 0x936   :  { %1754 = vmatpush3.bf16.xpose.msra.mxu0 %v1038_v53  ;;  %1755 = vmatprep.mubr.msk.bf16.mxu0 %vm1888_vm1, %v1887_v8 }
 0x937   :  { %1765 = vmatprep.subr.bf16.mxu0 %v1887_v8 }
 0x938   :  { %v1253_v61 = vpop.permute.xlu1 %1252 }
 0x93d   :  { %1756 = vmatmul.mubr.msk.bf16.vlgmr.msra.gmra.mxu0 %vm158_vm2, %v1031_v55 }
 0x93e   :  { %1766 = vmatpush3.bf16.xpose.msra.mxu0 %v1149_v57  ;;  %1767 = vmatprep.mubr.msk.bf16.mxu0 %vm1888_vm1, %v1887_v8 }
 0x93f   :  { %1777 = vmatprep.subr.bf16.mxu0 %v1887_v8 }
 0x945   :  { %1768 = vmatmul.mubr.msk.bf16.vlgmr.msra.gmra.mxu0 %vm158_vm2, %v1142_v59 }
 0x946   :  { %1778 = vmatpush3.bf16.xpose.msra.mxu0 %v1260_v60  ;;  %1779 = vmatprep.mubr.msk.bf16.mxu0 %vm1888_vm1, %v1887_v8 }
 0x947   :  { %1789 = vmatprep.subr.bf16.mxu0 %v1887_v8 }
 0x94d   :  { %1780 = vmatmul.mubr.msk.bf16.vlgmr.msra.gmra.mxu0 %vm158_vm2, %v1253_v61 }
 0x94e   :  { %1790 = vmatpush3.bf16.msra.mxu0 %v2096_v5  ;;  %1793 = vmatprep.mubr.msk.bf16.mxu0 %vm1888_vm1, %v1887_v8 }
 0x94f   :  { %1791 = vmatprep.subr.bf16.mxu0 %v1887_v8 }
 0x952   :  { %1792 = vmatpush3.bf16.msra.mxu0 %v2103_v6 }
 0x953   :  { %1805 = vmatprep.subr.bf16.mxu0 %v1887_v8 }
 0x990   :  { %v845_v5 = vpop.f32.mrf.mxu1 }
 0x991   :  { %v846_v4 = vadd.f32 %v845_v5, %v2260_v0 }
 0x992   :  { %v1731_v7 = vpop.f32.mrf.mxu1 }
 0x993   :  { %v855_v12 = vmul.f32 %v2263_v2, %v846_v4 }
 0x994   :  { %v848_v13 = vpop.f32.mrf.mxu1 }
 0x995   :  { %v856_v6 = vadd.f32 %v855_v12, %v2135_v46 }
 0x996   :  { %v1732_v14 = vpop.f32.mrf.mxu1 }
 0x997   :  { %857 = vst.msk [vmem:[#allocation2] sm:$0xff] %vm36_vm0, %v856_v6 }
 0x99e   :  { %v1542_v16 = vld [vmem:[#allocation2] sm:$0xff] }
 0x99f   :  { %v1544_v15 = vpack.c.bf16 %v1542_v16, %v1542_v16 }
 0x9a1   :  { %1547 = vst.msk [vmem:[%s2361_s8] sm:$0xf] %vm1546_vm8, %v1544_v15 }
 0x9f5   :  { %v963_v17 = vpop.f32.mrf.mxu0 }
 0x9f6   :  { %v969_v18 = vsel %vm2044_vm3, -1e+30, %v963_v17 }
 0x9f7   :  { %v1745_v20 = vpop.f32.mrf.mxu0  ;;  %v970_v21 = vsel %vm158_vm2, %v969_v18, -inf }
 0x9f8   :  { %971 = vmax.xlane.f32.xlu0 %v970_v21 }
 0x9f9   :  { %v966_v46 = vpop.f32.mrf.mxu0 }
 0x9fb   :  { %v1746_v25 = vpop.f32.mrf.mxu0 }
 0x9fd   :  { %v1074_v27 = vpop.f32.mrf.mxu0 }
 0x9fe   :  { %v1080_v28 = vsel %vm2044_vm3, -1e+30, %v1074_v27 }
 0x9ff   :  { %v1757_v29 = vpop.f32.mrf.mxu0  ;;  %v1081_v31 = vsel %vm158_vm2, %v1080_v28, -inf }
 0xa00   :  { %1082 = vmax.xlane.f32.xlu1 %v1081_v31 }
 0xa01   :  { %v1077_v32 = vpop.f32.mrf.mxu0 }
 0xa03   :  { %v1758_v33 = vpop.f32.mrf.mxu0 }
 0xa05   :  { %v1185_v34 = vpop.f32.mrf.mxu0 }
 0xa06   :  { %v1191_v35 = vsel %vm2044_vm3, -1e+30, %v1185_v34 }
 0xa07   :  { %v1769_v36 = vpop.f32.mrf.mxu0  ;;  %v1192_v38 = vsel %vm158_vm2, %v1191_v35, -inf }
 0xa08   :  { %1193 = vmax.xlane.f32.xlu0 %v1192_v38 }
 0xa09   :  { %v1188_v40 = vpop.f32.mrf.mxu0 }
 0xa0b   :  { %v1770_v41 = vpop.f32.mrf.mxu0 }
 0xa0d   :  { %v1296_v30 = vpop.f32.mrf.mxu0 }
 0xa0e   :  { %v1302_v43 = vsel %vm2044_vm3, -1e+30, %v1296_v30 }
 0xa0f   :  { %v1781_v26 = vpop.f32.mrf.mxu0  ;;  %v1303_v44 = vsel %vm158_vm2, %v1302_v43, -inf }
 0xa10   :  { %1304 = vmax.xlane.f32.xlu0 %v1303_v44 }
 0xa11   :  { %v1299_v47 = vpop.f32.mrf.mxu0 }
 0xa13   :  { %v1782_v48 = vpop.f32.mrf.mxu0 }
 0xa81   :  { %v972_v49 = vpop.xlane.xlu0 %971 }
 0xa82   :  { %v973_v50 = vsub.f32 %v969_v18, %v972_v49 }
 0xa84   :  { %v974_v51 = vmul.f32 1.442695, %v973_v50 }
 0xa86   :  { %1867 = vpow2.f32 %v974_v51 }
 0xa89   :  { %v1083_v52 = vpop.xlane.xlu1 %1082 }
 0xa8a   :  { %v1084_v53 = vsub.f32 %v1080_v28, %v1083_v52 }
 0xa8c   :  { %v1085_v54 = vmul.f32 1.442695, %v1084_v53 }
 0xa8e   :  { %1869 = vpow2.f32 %v1085_v54 }
 0xa91   :  { %v1194_v58 = vpop.xlane.xlu0 %1193 }
 0xa92   :  { %v1195_v4 = vsub.f32 %v1191_v35, %v1194_v58 }
 0xa93   :  { %v1868_v55 = vpop.eup %1867 }
 0xa94   :  { %v976_v57 = vsel %vm158_vm2, %v1868_v55, 0.0  ;;  %v1196_v7 = vmul.f32 1.442695, %v1195_v4 }
 0xa95   :  { %977 = vadd.xlane.f32.xlu1 %v976_v57 }
 0xa99   :  { %v1305_v45 = vpop.xlane.xlu0 %1304 }
 0xa9a   :  { %v1306_v59 = vsub.f32 %v1302_v43, %v1305_v45 }
 0xa9b   :  { %v1870_v60 = vpop.eup %1869 }
 0xa9c   :  { %v1307_v61 = vmul.f32 1.442695, %v1306_v59  ;;  %v1087_v62 = vsel %vm158_vm2, %v1870_v60, 0.0 }
 0xa9d   :  { %1088 = vadd.xlane.f32.xlu0 %v1087_v62 }
 0xa9e   :  { %1871 = vpow2.f32 %v1307_v61 }
 0xa9f   :  { %1873 = vpow2.f32 %v1196_v7 }
 0xaa6   :  { %982 = vrot.lane.b32.xlu1 %v2213_v42, %s1896_s19 }
 0xaab   :  { %v1872_v63 = vpop.eup %1871 }
 0xaac   :  { %v1309_v5 = vsel %vm158_vm2, %v1872_v63, 0.0  ;;  %v1874_v12 = vpop.eup %1873 }
 0xaad   :  { %1310 = vadd.xlane.f32.xlu0 %v1309_v5  ;;  %v1198_v13 = vsel %vm158_vm2, %v1874_v12, 0.0 }
 0xac3   :  { %1093 = vrot.lane.b32.xlu0 %v2213_v42, %s1897_s20 }
 0xaca   :  { %1199 = vadd.xlane.f32.xlu1 %v1198_v13 }
 0xadb   :  { %1204 = vrot.lane.b32.xlu1 %v2213_v42, %s1898_s21 }
 0xadf   :  { %1315 = vrot.lane.b32.xlu1 %v2213_v42, %s1899_s22 }
 0xb1e   :  { %v978_v6 = vpop.xlane.xlu1 %977 }
 0xb1f   :  { %1875 = vrcp.f32 %v978_v6 }
 0xb22   :  { %v983_v14 = vpop.permute.xlu1 %982 }
 0xb23   :  { %v988_v16 = vsel %vm224_vm4, %v983_v14, 0 }
 0xb24   :  { %1748 = vmatpush3.bf16.msra.mxu1 %v988_v16 }
 0xb25   :  { %1759 = vmatprep.subr.bf16.mxu1 %v1887_v8 }
 0xb26   :  { %v1089_v15 = vpop.xlane.xlu0 %1088 }
 0xb27   :  { %1877 = vrcp.f32 %v1089_v15 }
 0xb2c   :  { %v1876_v17 = vpop.eup %1875 }
 0xb2d   :  { %v980_v18 = vmul.f32 %v1876_v17, %v1868_v55 }
 0xb2f   :  { %v981_v20 = vpack.c.bf16 %v980_v18, %v980_v18 }
 0xb31   :  { %1750 = vmatmul.mubr.msk.bf16.vlgmr.msra.gmra.mxu1 %vm158_vm2, %v981_v20 }
 0xb32   :  { %1761 = vmatprep.mubr.msk.bf16.mxu1 %vm1888_vm1, %v1887_v8 }
 0xb34   :  { %v1878_v21 = vpop.eup %1877 }
 0xb35   :  { %v1091_v46 = vmul.f32 %v1878_v21, %v1870_v60 }
 0xb36   :  { %v1311_v42 = vpop.xlane.xlu0 %1310 }
 0xb37   :  { %v1092_v28 = vpack.c.bf16 %v1091_v46, %v1091_v46 }
 0xb3a   :  { %v1094_v25 = vpop.permute.xlu0 %1093 }
 0xb3b   :  { %v1099_v27 = vsel %vm224_vm4, %v1094_v25, 0 }
 0xb3c   :  { %1760 = vmatpush3.bf16.msra.mxu1 %v1099_v27 }
 0xb3d   :  { %1771 = vmatprep.subr.bf16.mxu1 %v1887_v8 }
 0xb3f   :  { %1762 = vmatmul.mubr.msk.bf16.vlgmr.msra.gmra.mxu1 %vm158_vm2, %v1092_v28 }
 0xb40   :  { %1773 = vmatprep.mubr.msk.bf16.mxu1 %vm1888_vm1, %v1887_v8 }
 0xb53   :  { %v1200_v29 = vpop.xlane.xlu1 %1199 }
 0xb54   :  { %1879 = vrcp.f32 %v1200_v29 }
 0xb55   :  { %1881 = vrcp.f32 %v1311_v42 }
 0xb57   :  { %v1205_v31 = vpop.permute.xlu1 %1204 }
 0xb58   :  { %v1210_v32 = vsel %vm224_vm4, %v1205_v31, 0 }
 0xb59   :  { %1772 = vmatpush3.bf16.msra.mxu1 %v1210_v32 }
 0xb5a   :  { %1783 = vmatprep.subr.bf16.mxu1 %v1887_v8 }
 0xb5b   :  { %v1316_v35 = vpop.permute.xlu1 %1315 }
 0xb5c   :  { %v1321_v40 = vsel %vm224_vm4, %v1316_v35, 0 }
 0xb61   :  { %v1880_v33 = vpop.eup %1879 }
 0xb62   :  { %v1202_v34 = vmul.f32 %v1880_v33, %v1874_v12  ;;  %v1882_v38 = vpop.eup %1881 }
 0xb63   :  { %v1313_v41 = vmul.f32 %v1882_v38, %v1872_v63 }
 0xb64   :  { %v1203_v36 = vpack.c.bf16 %v1202_v34, %v1202_v34 }
 0xb65   :  { %v1314_v30 = vpack.c.bf16 %v1313_v41, %v1313_v41 }
 0xb66   :  { %1774 = vmatmul.mubr.msk.bf16.vlgmr.msra.gmra.mxu1 %vm158_vm2, %v1203_v36 }
 0xb67   :  { %1784 = vmatpush3.bf16.msra.mxu1 %v1321_v40  ;;  %1785 = vmatprep.mubr.msk.bf16.mxu1 %vm1888_vm1, %v1887_v8 }
 0xb68   :  { %1797 = vmatprep.subr.bf16.mxu1 %v1887_v8 }
 0xb6e   :  { %1786 = vmatmul.mubr.msk.bf16.vlgmr.msra.gmra.mxu1 %vm158_vm2, %v1314_v30 }
 0xb6f   :  { %1798 = vmatpush3.bf16.msra.mxu1 %v2145_v1  ;;  %1801 = vmatprep.mubr.msk.bf16.mxu1 %vm1888_vm1, %v1887_v8 }
 0xb70   :  { %1799 = vmatprep.subr.bf16.mxu1 %v1887_v8 }
 0xb73   :  { %1800 = vmatpush3.bf16.msra.mxu1 %v2151_v56 }
 0xbf1   :  { %v1024_v43 = vpop.f32.mrf.mxu1 }
 0xbf3   :  { %v1751_v26 = vpop.f32.mrf.mxu1 }
 0xbf5   :  { %v1027_v44 = vpop.f32.mrf.mxu1 }
 0xbf7   :  { %v1752_v47 = vpop.f32.mrf.mxu1 }
 0xbff   :  { %v1135_v48 = vpop.f32.mrf.mxu1 }
 0xc00   :  { %1364 = vrot.lane.b32.xlu0 %v1135_v48, %s1900_s23 }
 0xc01   :  { %v1763_v49 = vpop.f32.mrf.mxu1 }
 0xc03   :  { %v1138_v50 = vpop.f32.mrf.mxu1 }
 0xc05   :  { %v1764_v51 = vpop.f32.mrf.mxu1 }
 0xc26   :  { %v1246_v52 = vpop.f32.mrf.mxu1 }
 0xc27   :  { %1368 = vrot.lane.b32.xlu1 %v1246_v52, %s1901_s30 }
 0xc28   :  { %v1775_v1 = vpop.f32.mrf.mxu1 }
 0xc2a   :  { %v1249_v53 = vpop.f32.mrf.mxu1 }
 0xc2c   :  { %v1776_v54 = vpop.f32.mrf.mxu1 }
 0xc2e   :  { %v1357_v55 = vpop.f32.mrf.mxu1 }
 0xc2f   :  { %1372 = vrot.lane.b32.xlu0 %v1357_v55, %s1902_s4 }
 0xc30   :  { %v1787_v56 = vpop.f32.mrf.mxu1 }
 0xc32   :  { %v1360_v57 = vpop.f32.mrf.mxu1 }
 0xc34   :  { %v1788_v58 = vpop.f32.mrf.mxu1 }
 0xc72   :  { %v1365_v45 = vpop.permute.xlu0 %1364 }
 0xc73   :  { %v1375_v60 = vsel %vm158_vm2, %v1024_v43, %v1365_v45 }
 0xc99   :  { %v1369_v59 = vpop.permute.xlu1 %1368 }
 0xc9a   :  { %v1376_v61 = vsel %vm614_vm5, %v1375_v60, %v1369_v59 }
 0xca1   :  { %v1373_v62 = vpop.permute.xlu0 %1372 }
 0xca2   :  { %v1377_v63 = vsel %vm616_vm6, %v1376_v61, %v1373_v62 }
 0xca3   :  { %v1378_v5 = vpack.c.bf16 %v1377_v63, %v1377_v63 }
 0xca5   :  { %1794 = vmatmul.mubr.msk.bf16.vlgmr.msra.gmra.mxu0 %vm36_vm0, %v1378_v5 }
 0xca6   :  { %1806 = vmatpush3.bf16.msra.mxu0 %v2181_v9  ;;  %1813 = vmatprep.mubr.msk.bf16.mxu0 %vm1888_vm1, %v1887_v8 }
 0xca7   :  { %1807 = vmatprep.subr.bf16.mxu0 %v1887_v8 }
 0xcaa   :  { %1808 = vmatpush3.bf16.msra.mxu0 %v2188_v10 }
 0xcab   :  { %1809 = vmatprep.subr.bf16.mxu0 %v1887_v8 }
 0xcae   :  { %1810 = vmatpush3.bf16.msra.mxu0 %v2195_v19 }
 0xcaf   :  { %1811 = vmatprep.subr.bf16.mxu0 %v1887_v8 }
 0xcb2   :  { %1812 = vmatpush3.bf16.msra.mxu0 %v2202_v22 }
 0xd65   :  { %v1416_v4 = vpop.f32.mrf.mxu0 }
 0xd66   :  { %v1417_v7 = vadd.f32 %v1416_v4, %v2126_v37 }
 0xd67   :  { %v1795_v12 = vpop.f32.mrf.mxu0 }
 0xd68   :  { %v1422_v9 = vmul.f32 %v1417_v7, %v2129_v39 }
 0xd69   :  { %v1419_v13 = vpop.f32.mrf.mxu0 }
 0xd6a   :  { %v1423_v6 = vadd.f32 %v1422_v9, %v2113_v23 }
 0xd6b   :  { %v1796_v14 = vpop.f32.mrf.mxu0 }
 0xd6c   :  { %v1424_v10 = vsel %vm36_vm0, %v1423_v6, 0.0 }
 0xd6d   :  { %1425 = vadd.xlane.f32.xlu1 %v1424_v10 }
 0xdf6   :  { %v1426_v16 = vpop.xlane.xlu1 %1425 }
 0xdf7   :  { %v1427_v15 = vmul.f32 0.03125, %v1426_v16 }
 0xdf9   :  { %v1428_v19 = vsub.f32 %v1423_v6, %v1427_v15 }
 0xdfb   :  { %v1429_v17 = vmul.f32 %v1428_v19, %v1428_v19 }
 0xdfd   :  { %v1430_v8 = vsel %vm36_vm0, %v1429_v17, 0.0 }
 0xdfe   :  { %1431 = vadd.xlane.f32.xlu0 %v1430_v8 }
 0xe87   :  { %v1432_v22 = vpop.xlane.xlu0 %1431 }
 0xe88   :  { %v1433_v18 = vmul.f32 0.03125, %v1432_v22 }
 0xe8a   :  { %v1434_v37 = vadd.f32 1e-05, %v1433_v18 }
 0xe8c   :  { %1883 = vrsqrt.f32 %v1434_v37 }
 0xe99   :  { %v1884_v20 = vpop.eup %1883 }
 0xe9a   :  { %v1436_v39 = vmul.f32 %v1884_v20, %v1428_v19 }
 0xe9c   :  { %v1437_v21 = vmul.f32 %v1436_v39, %v2159_v3 }
 0xe9e   :  { %v1438_v23 = vadd.f32 %v1437_v21, %v2162_v11 }
 0xea0   :  { %v1439_v42 = vpack.c.bf16 %v1438_v23, %v1438_v23 }
 0xea2   :  { %1802 = vmatmul.mubr.msk.bf16.vlgmr.msra.gmra.mxu1 %vm36_vm0, %v1439_v42 }
 0xf62   :  { %v1477_v46 = vpop.f32.mrf.mxu1 }
 0xf63   :  { %v1478_v25 = vadd.f32 %v2209_v24, %v1477_v46 }
 0xf64   :  { %v1803_v27 = vpop.f32.mrf.mxu1 }
 0xf65   :  { %v1483_v28 = vmul.f32 %v1478_v25, %v1478_v25 }
 0xf66   :  { %v1480_v29 = vpop.f32.mrf.mxu1 }
 0xf67   :  { %v1484_v31 = vmul.f32 %v1483_v28, %v1478_v25 }
 0xf68   :  { %v1804_v32 = vpop.f32.mrf.mxu1 }
 0xf69   :  { %v1485_v33 = vmul.f32 0.044715, %v1484_v31 }
 0xf6b   :  { %v1486_v34 = vadd.f32 %v1485_v33, %v1478_v25 }
 0xf6d   :  { %v1487_v35 = vmul.f32 0.7978846, %v1486_v34 }
 0xf6f   :  { %1885 = vtanh.f32 %v1487_v35 }
 0xf7c   :  { %v1886_v36 = vpop.eup %1885 }
 0xf7d   :  { %v1489_v38 = vadd.f32 1.0, %v1886_v36 }
 0xf7f   :  { %v1490_v3 = vmul.f32 0.5, %v1489_v38 }
 0xf81   :  { %v1491_v40 = vmul.f32 %v1490_v3, %v1478_v25 }
 0xf83   :  { %v1492_v11 = vpack.c.bf16 %v1491_v40, %v1491_v40 }
 0xf85   :  { %1814 = vmatmul.mubr.msk.bf16.vlgmr.msra.gmra.mxu0 %vm807_vm7, %v1492_v11 }
0x1045   :  { %v1530_v41 = vpop.f32.mrf.mxu0 }
0x1046   :  { %v1531_v30 = vadd.f32 %v1530_v41, %v2260_v0 }
0x1047   :  { %v1815_v24 = vpop.f32.mrf.mxu0 }
0x1048   :  { %v1536_v43 = vmul.f32 %v1531_v30, %v2263_v2 }
0x1049   :  { %v1533_v26 = vpop.f32.mrf.mxu0 }
0x104a   :  { %v1537_v44 = vadd.f32 %v1536_v43, %v1423_v6 }
0x104b   :  { %v1816_v47 = vpop.f32.mrf.mxu0 }
0x104c   :  { %1538 = vst.msk [vmem:[#allocation2 + $0x8] sm:$0xff] %vm36_vm0, %v1537_v44 }
0x1053   :  { %v1543_v48 = vld [vmem:[#allocation2 + $0x8] sm:$0xff] }
0x1054   :  { %v1545_v49 = vpack.c.bf16 %v1543_v48, %v1543_v48 }
0x1056   :  { %1548 = vst.msk [vmem:[%s2361_s8 + $0x4] sm:$0xf] %vm1546_vm8, %v1545_v49 }

</bundles_post_ra>
